<compile_context>
chip_gen: v7x
topology: tpu7x:2x2x1
jax: 0.10.0
libtpu: 0.0.40
codegen_flags: <defaults>
</compile_context>

<pallas_src>
import functools

import jax
import jax.numpy as jnp
import numpy as np
from jax import lax
from jax.experimental import pallas as pl
from jax.experimental.pallas import tpu as pltpu

BN_EPS = 1e-5
LRELU_SLOPE = 0.2
_SUBLANE = 8
_LANE = 128
_CPAD = 128        # per-channel BN statistics padded to one full lane group


def _round_up(x, m):
    return (x + m - 1) // m * m


def _conv_out(size, k, s, p):
    return (size + 2 * p - k) // s + 1


# --------------------------------- kernel ---------------------------------- #
def _disc_kernel(x_ref,
                 d1_ref, d2_ref, d3_ref, d4_ref,
                 b1_ref, b2_ref, b3_ref, b4_ref,
                 g2_ref, be2_ref, g3_ref, be3_ref, g4_ref, be4_ref,
                 r2_ref, rt2_ref, r3_ref, rt3_ref, r4_ref, rt4_ref,
                 w5_ref, d5_ref,
                 o_ref,
                 c1_scr, c2_scr, c3_scr, c4_scr,
                 *, dims, counts):
    d_refs = (d1_ref, d2_ref, d3_ref, d4_ref)
    b_refs = (b1_ref, b2_ref, b3_ref, b4_ref)
    c_scrs = (c1_scr, c2_scr, c3_scr, c4_scr)
    bn_refs = (None,
               (g2_ref, be2_ref, r2_ref, rt2_ref),
               (g3_ref, be3_ref, r3_ref, rt3_ref),
               (g4_ref, be4_ref, r4_ref, rt4_ref))

    y = x_ref[...]                                   # (M0, L0), channel minor
    for l in range(4):
        kh, m_out, lin_pad = dims[l]

        # conv layer = 2 MXU matmuls: stacked row decimation, then stacked
        # block-Toeplitz weights (precomputed outside the kernel).
        rows = jnp.dot(d_refs[l][...], y,
                       preferred_element_type=jnp.float32)   # (kh*M, Lin)
        cat = c_scrs[l]
        for i in range(kh):                          # aligned block copies
            cat[:, i * lin_pad:(i + 1) * lin_pad] = \
                rows[i * m_out:(i + 1) * m_out, :]
        y = jnp.dot(cat[...], b_refs[l][...],
                    preferred_element_type=jnp.float32)       # (M, Lout)

        if bn_refs[l] is not None:                   # training-mode BatchNorm
            g_ref, b_ref, r_ref, rt_ref = bn_refs[l]
            s1 = jnp.sum(y, axis=0, keepdims=True)            # (1, Lout)
            s2 = jnp.sum(y * y, axis=0, keepdims=True)
            cs1 = jnp.dot(s1, r_ref[...],
                          preferred_element_type=jnp.float32)  # (1, CPAD)
            cs2 = jnp.dot(s2, r_ref[...],
                          preferred_element_type=jnp.float32)
            inv_n = 1.0 / counts[l]
            mean = cs1 * inv_n
            var = cs2 * inv_n - mean * mean          # biased (PyTorch train)
            scale = g_ref[...] * lax.rsqrt(var + BN_EPS)
            bias = b_ref[...] - mean * scale
            scale_f = jnp.dot(scale, rt_ref[...],
                              preferred_element_type=jnp.float32)  # (1, Lout)
            bias_f = jnp.dot(bias, rt_ref[...],
                             preferred_element_type=jnp.float32)
            y = y * scale_f + bias_f                 # single FMA on the tile

        y = jnp.maximum(y, LRELU_SLOPE * y)          # LeakyReLU(0.2)

    # Final conv (3x3 valid -> 1 channel) == per-image dot product + sigmoid.
    z = y * w5_ref[...]                              # (M4, L4)
    per_img = jnp.dot(d5_ref[...], z, preferred_element_type=jnp.float32)
    logits = jnp.sum(per_img, axis=1, keepdims=True)  # (N, 1)
    o_ref[...] = (1.0 / (1.0 + jnp.exp(-logits))).astype(o_ref.dtype)


# ------------------------------- JAX wrapper -------------------------------- #
def _full_spec(shape):
    zeros = (0,) * len(shape)
    return pl.BlockSpec(shape, lambda i, _z=zeros: _z)


def discriminator_forward(img, conv_ws, bn_params):
    N, nc, H, W = img.shape
    ndf = conv_ws[0].shape[0]
    # (kh, kw, stride, pad) per conv layer of the PyTorch module.
    conv_cfg = [(2, 2, 2, 1), (3, 3, 2, 1), (3, 3, 2, 1), (3, 3, 2, 1),
                (3, 3, 1, 0)]
    chans = [nc, ndf, ndf * 2, ndf * 4, ndf * 8, 1]

    h_sizes, w_sizes = [H], [W]
    for kh, kw, s, p in conv_cfg:
        h_sizes.append(_conv_out(h_sizes[-1], kh, s, p))
        w_sizes.append(_conv_out(w_sizes[-1], kw, s, p))
    assert h_sizes[5] == 1 and w_sizes[5] == 1, "final conv must output 1x1"
    assert h_sizes[4] == conv_cfg[4][0] and w_sizes[4] == conv_cfg[4][1], (
        "final conv must see exactly a kernel-sized map (use 32x32 input)")

    # padded activation geometry: rows -> mult of 8, lanes -> mult of 128
    m_pads = [_round_up(N * h_sizes[l], _SUBLANE) for l in range(5)]
    lane_pads = [_round_up(w_sizes[l] * chans[l], _LANE) for l in range(5)]

    # ---- input: NCHW -> channel-minor 2-D, padded to (M0, L0) ------------- #
    x = img.transpose(0, 2, 3, 1).reshape(N * H, W * nc)
    x = jnp.pad(x, ((0, m_pads[0] - N * H), (0, lane_pads[0] - W * nc)))

    # ---- constant stacked row-decimation matrices D (numpy, static) ------- #
    d_args = []
    for l in range(4):
        kh, _, s, p = conv_cfg[l]
        hin, ho = h_sizes[l], h_sizes[l + 1]
        m_in, m_out = m_pads[l], m_pads[l + 1]
        d = np.zeros((kh * m_out, m_in), np.float32)
        for i in range(kh):
            for b in range(N):
                for o in range(ho):
                    h = o * s + i - p
                    if 0 <= h < hin:
                        d[i * m_out + b * ho + o, b * hin + h] = 1.0
        d_args.append(jnp.asarray(d))

    # ---- stacked block-Toeplitz weights B, precomputed OUTSIDE the kernel - #
    b_args = []
    for l in range(4):
        kh, kw, s, p = conv_cfg[l]
        win, wo = w_sizes[l], w_sizes[l + 1]
        cin, cout = chans[l], chans[l + 1]
        lin_pad, lout_pad = lane_pads[l], lane_pads[l + 1]
        m = np.zeros((kh, kw, win, wo), np.float32)   # column decimation
        for i in range(kh):
            for j in range(kw):
                for w in range(wo):
                    src = w * s + j - p
                    if 0 <= src < win:
                        m[i, j, src, w] = 1.0
        wt = conv_ws[l].transpose(2, 3, 1, 0)         # (kh, kw, Cin, Cout)
        b4 = jnp.einsum('ijsw,ijcd->iscwd', jnp.asarray(m), wt)
        b4 = b4.reshape(kh, win * cin, wo * cout)
        b4 = jnp.pad(b4, ((0, 0), (0, lin_pad - win * cin),
                          (0, lout_pad - wo * cout)))
        b_args.append(b4.reshape(kh * lin_pad, lout_pad))

    # ---- BatchNorm: padded gamma/beta + constant replication matrices ----- #
    gb_args, r_args = [], []
    counts = [1.0, 0.0, 0.0, 0.0]
    for idx, l in enumerate((1, 2, 3)):
        cout, wo = chans[l + 1], w_sizes[l + 1]
        lout_pad = lane_pads[l + 1]
        counts[l] = float(N * h_sizes[l + 1] * w_sizes[l + 1])
        g, b = bn_params[idx]
        gb_args.append(jnp.pad(g.reshape(1, -1), ((0, 0), (0, _CPAD - cout))))
        gb_args.append(jnp.pad(b.reshape(1, -1), ((0, 0), (0, _CPAD - cout))))
        r = np.zeros((lout_pad, _CPAD), np.float32)
        for w in range(wo):
            for c in range(cout):
                r[w * cout + c, c] = 1.0
        r_args.append(jnp.asarray(r))
        r_args.append(jnp.asarray(r.T.copy()))

    # ---- final conv weights arranged to layer-4's layout, batch-tiled ----- #
    w5 = conv_ws[4][0].transpose(1, 2, 0).reshape(
        h_sizes[4], w_sizes[4] * chans[4])
    w5 = jnp.tile(w5, (N, 1))
    w5 = jnp.pad(w5, ((0, m_pads[4] - N * h_sizes[4]),
                      (0, lane_pads[4] - w_sizes[4] * chans[4])))

    d5 = np.zeros((N, m_pads[4]), np.float32)
    for b in range(N):
        d5[b, b * h_sizes[4]:(b + 1) * h_sizes[4]] = 1.0
    d5 = jnp.asarray(d5)

    args = [x] + d_args + b_args + gb_args + r_args + [w5, d5]

    dims = tuple((conv_cfg[l][0], m_pads[l + 1], lane_pads[l])
                 for l in range(4))
    scratch = [pltpu.VMEM((m_pads[l + 1], conv_cfg[l][0] * lane_pads[l]),
                          jnp.float32) for l in range(4)]

    kernel = functools.partial(_disc_kernel, dims=dims, counts=tuple(counts))
    out = pl.pallas_call(
        kernel,
        out_shape=jax.ShapeDtypeStruct((N, 1), jnp.float32),
        grid=(1,),
        in_specs=[_full_spec(a.shape) for a in args],
        out_specs=pl.BlockSpec((N, 1), lambda i: (0, 0)),
        scratch_shapes=scratch,
    )(*args)
    # (N,1,1,1).view(-1,1).squeeze(1) -> (N,)
    return out.reshape(-1)


# ------------------------------ param init --------------------------------- #
def init_params(key, nc, ndf):
    conv_shapes = [
        (ndf, nc, 2, 2),
        (ndf * 2, ndf, 3, 3),
        (ndf * 4, ndf * 2, 3, 3),
        (ndf * 8, ndf * 4, 3, 3),
        (1, ndf * 8, 3, 3),
    ]
    conv_ws = []
    for co, ci, kh, kw in conv_shapes:
        key, sub = jax.random.split(key)
        conv_ws.append(0.05 * jax.random.normal(sub, (co, ci, kh, kw),
                                                jnp.float32))
    # fresh nn.BatchNorm2d: gamma=1, beta=0
    bn_params = [
        (jnp.ones((c,), jnp.float32), jnp.zeros((c,), jnp.float32))
        for c in (ndf * 2, ndf * 4, ndf * 8)
    ]
    return conv_ws, bn_params


# --------------------------- pure-JAX reference ----------------------------- #
def reference_forward(x, conv_ws, bn_params):
    def conv(x, w, stride, pad):
        return lax.conv_general_dilated(
            x, w, (stride, stride), ((pad, pad), (pad, pad)),
            dimension_numbers=("NCHW", "OIHW", "NCHW"))

    def lrelu(y):
        return jnp.where(y >= 0, y, LRELU_SLOPE * y)

    def bn(y, gamma, beta):
        mean = jnp.mean(y, axis=(0, 2, 3), keepdims=True)
        var = jnp.mean((y - mean) ** 2, axis=(0, 2, 3), keepdims=True)
        return ((y - mean) / jnp.sqrt(var + BN_EPS)) * gamma.reshape(1, -1, 1, 1) \
            + beta.reshape(1, -1, 1, 1)

    y = lrelu(conv(x, conv_ws[0], 2, 1))
    y = lrelu(bn(conv(y, conv_ws[1], 2, 1), *bn_params[0]))
    y = lrelu(bn(conv(y, conv_ws[2], 2, 1), *bn_params[1]))
    y = lrelu(bn(conv(y, conv_ws[3], 2, 1), *bn_params[2]))
    y = jax.nn.sigmoid(conv(y, conv_ws[4], 1, 0))
    return y.reshape(-1)


if __name__ == "__main__":
    # CIFAR-shaped input: 32x32 spatial is required so the final valid 3x3
    # conv sees a 3x3 map; keep batch and feature_maps small.
    N, nc, ndf, H = 2, 3, 8, 32
    key = jax.random.PRNGKey(0)
    key, kx = jax.random.split(key)
    img = jax.random.normal(kx, (N, nc, H, H), jnp.float32)
    conv_ws, bn_params = init_params(key, nc, ndf)

    out = jax.jit(discriminator_forward)(img, conv_ws, bn_params)
    out = jax.block_until_ready(out)

    ref = reference_forward(img, conv_ws, bn_params)
    assert out.shape == (N,), out.shape
    assert jnp.allclose(out, ref, atol=2e-4, rtol=2e-4), (out, ref)
    print("KERNEL_OK")
</pallas_src>

<mosaic_0001>
module attributes {stable_mosaic.version = 11 : i64} {
  func.func @_disc_kernel(%arg0: i32, %arg1: memref<64x128xf32, #tpu.memory_space<vmem>>, %arg2: memref<80x64xf32, #tpu.memory_space<vmem>>, %arg3: memref<72x40xf32, #tpu.memory_space<vmem>>, %arg4: memref<48x24xf32, #tpu.memory_space<vmem>>, %arg5: memref<24x16xf32, #tpu.memory_space<vmem>>, %arg6: memref<256x256xf32, #tpu.memory_space<vmem>>, %arg7: memref<768x256xf32, #tpu.memory_space<vmem>>, %arg8: memref<768x256xf32, #tpu.memory_space<vmem>>, %arg9: memref<768x256xf32, #tpu.memory_space<vmem>>, %arg10: memref<1x128xf32, #tpu.memory_space<vmem>>, %arg11: memref<1x128xf32, #tpu.memory_space<vmem>>, %arg12: memref<1x128xf32, #tpu.memory_space<vmem>>, %arg13: memref<1x128xf32, #tpu.memory_space<vmem>>, %arg14: memref<1x128xf32, #tpu.memory_space<vmem>>, %arg15: memref<1x128xf32, #tpu.memory_space<vmem>>, %arg16: memref<256x128xf32, #tpu.memory_space<vmem>>, %arg17: memref<128x256xf32, #tpu.memory_space<vmem>>, %arg18: memref<256x128xf32, #tpu.memory_space<vmem>>, %arg19: memref<128x256xf32, #tpu.memory_space<vmem>>, %arg20: memref<256x128xf32, #tpu.memory_space<vmem>>, %arg21: memref<128x256xf32, #tpu.memory_space<vmem>>, %arg22: memref<8x256xf32, #tpu.memory_space<vmem>>, %arg23: memref<2x8xf32, #tpu.memory_space<vmem>>, %arg24: memref<2x1xf32, #tpu.memory_space<vmem>>, %arg25: memref<40x256xf32, #tpu.memory_space<vmem>>, %arg26: memref<24x768xf32, #tpu.memory_space<vmem>>, %arg27: memref<16x768xf32, #tpu.memory_space<vmem>>, %arg28: memref<8x768xf32, #tpu.memory_space<vmem>>) attributes {dimension_semantics = [#tpu.dimension_semantics<arbitrary>], iteration_bounds = array<i64: 1>, scalar_prefetch = 0 : i64, scratch_operands = 4 : i64, tpu.core_type = #tpu.core_type<tc>, window_params = [{pipeline_mode = #tpu.pipeline_mode<synchronous>, transform_indices = @transform_0, window_bounds = array<i64: 64, 128>}, {pipeline_mode = #tpu.pipeline_mode<synchronous>, transform_indices = @transform_1, window_bounds = array<i64: 80, 64>}, {pipeline_mode = #tpu.pipeline_mode<synchronous>, transform_indices = @transform_2, window_bounds = array<i64: 72, 40>}, {pipeline_mode = #tpu.pipeline_mode<synchronous>, transform_indices = @transform_3, window_bounds = array<i64: 48, 24>}, {pipeline_mode = #tpu.pipeline_mode<synchronous>, transform_indices = @transform_4, window_bounds = array<i64: 24, 16>}, {pipeline_mode = #tpu.pipeline_mode<synchronous>, transform_indices = @transform_5, window_bounds = array<i64: 256, 256>}, {pipeline_mode = #tpu.pipeline_mode<synchronous>, transform_indices = @transform_6, window_bounds = array<i64: 768, 256>}, {pipeline_mode = #tpu.pipeline_mode<synchronous>, transform_indices = @transform_7, window_bounds = array<i64: 768, 256>}, {pipeline_mode = #tpu.pipeline_mode<synchronous>, transform_indices = @transform_8, window_bounds = array<i64: 768, 256>}, {pipeline_mode = #tpu.pipeline_mode<synchronous>, transform_indices = @transform_9, window_bounds = array<i64: 1, 128>}, {pipeline_mode = #tpu.pipeline_mode<synchronous>, transform_indices = @transform_10, window_bounds = array<i64: 1, 128>}, {pipeline_mode = #tpu.pipeline_mode<synchronous>, transform_indices = @transform_11, window_bounds = array<i64: 1, 128>}, {pipeline_mode = #tpu.pipeline_mode<synchronous>, transform_indices = @transform_12, window_bounds = array<i64: 1, 128>}, {pipeline_mode = #tpu.pipeline_mode<synchronous>, transform_indices = @transform_13, window_bounds = array<i64: 1, 128>}, {pipeline_mode = #tpu.pipeline_mode<synchronous>, transform_indices = @transform_14, window_bounds = array<i64: 1, 128>}, {pipeline_mode = #tpu.pipeline_mode<synchronous>, transform_indices = @transform_15, window_bounds = array<i64: 256, 128>}, {pipeline_mode = #tpu.pipeline_mode<synchronous>, transform_indices = @transform_16, window_bounds = array<i64: 128, 256>}, {pipeline_mode = #tpu.pipeline_mode<synchronous>, transform_indices = @transform_17, window_bounds = array<i64: 256, 128>}, {pipeline_mode = #tpu.pipeline_mode<synchronous>, transform_indices = @transform_18, window_bounds = array<i64: 128, 256>}, {pipeline_mode = #tpu.pipeline_mode<synchronous>, transform_indices = @transform_19, window_bounds = array<i64: 256, 128>}, {pipeline_mode = #tpu.pipeline_mode<synchronous>, transform_indices = @transform_20, window_bounds = array<i64: 128, 256>}, {pipeline_mode = #tpu.pipeline_mode<synchronous>, transform_indices = @transform_21, window_bounds = array<i64: 8, 256>}, {pipeline_mode = #tpu.pipeline_mode<synchronous>, transform_indices = @transform_22, window_bounds = array<i64: 2, 8>}, {pipeline_mode = #tpu.pipeline_mode<synchronous>, transform_indices = @transform_23, window_bounds = array<i64: 2, 1>}]} {
    %c0 = arith.constant 0 : index
    %c0_0 = arith.constant 0 : index
    %0 = vector.load %arg1[%c0, %c0_0] : memref<64x128xf32, #tpu.memory_space<vmem>>, vector<64x128xf32>
    %c0_1 = arith.constant 0 : index
    %c0_2 = arith.constant 0 : index
    %1 = vector.load %arg2[%c0_1, %c0_2] : memref<80x64xf32, #tpu.memory_space<vmem>>, vector<80x64xf32>
    %cst = arith.constant dense<0.000000e+00> : vector<80x128xf32>
    %2 = tpu.matmul %1, %0, %cst {dimension_numbers = #tpu.dot_dimension_numbers<[1], [0], [0], [1], [0, 0, 1, 1], [], []>} : vector<80x64xf32>, vector<64x128xf32>, vector<80x128xf32> -> vector<80x128xf32>
    %3 = vector.extract_strided_slice %2 {offsets = [0, 0], sizes = [40, 128], strides = [1, 1]} : vector<80x128xf32> to vector<40x128xf32>
    %c0_3 = arith.constant 0 : index
    %c0_4 = arith.constant 0 : index
    %4 = vector.load %arg25[%c0_3, %c0_4] : memref<40x256xf32, #tpu.memory_space<vmem>>, vector<40x128xf32>
    tpu.vector_store %arg25[%c0_3, %c0_4], %3 {strides = array<i32>} : memref<40x256xf32, #tpu.memory_space<vmem>>, vector<40x128xf32>,
    %5 = vector.extract_strided_slice %2 {offsets = [40, 0], sizes = [40, 128], strides = [1, 1]} : vector<80x128xf32> to vector<40x128xf32>
    %c0_5 = arith.constant 0 : index
    %c128 = arith.constant 128 : index
    %6 = vector.load %arg25[%c0_5, %c128] : memref<40x256xf32, #tpu.memory_space<vmem>>, vector<40x128xf32>
    tpu.vector_store %arg25[%c0_5, %c128], %5 {strides = array<i32>} : memref<40x256xf32, #tpu.memory_space<vmem>>, vector<40x128xf32>,
    %c0_6 = arith.constant 0 : index
    %c0_7 = arith.constant 0 : index
    %7 = vector.load %arg25[%c0_6, %c0_7] : memref<40x256xf32, #tpu.memory_space<vmem>>, vector<40x256xf32>
    %c0_8 = arith.constant 0 : index
    %c0_9 = arith.constant 0 : index
    %8 = vector.load %arg6[%c0_8, %c0_9] : memref<256x256xf32, #tpu.memory_space<vmem>>, vector<256x256xf32>
    %cst_10 = arith.constant dense<0.000000e+00> : vector<40x256xf32>
    %9 = tpu.matmul %7, %8, %cst_10 {dimension_numbers = #tpu.dot_dimension_numbers<[1], [0], [0], [1], [0, 0, 1, 1], [], []>} : vector<40x256xf32>, vector<256x256xf32>, vector<40x256xf32> -> vector<40x256xf32>
    %cst_11 = arith.constant 2.000000e-01 : f32
    %10 = vector.broadcast %cst_11 : f32 to vector<40x256xf32>
    %11 = arith.mulf %10, %9 : vector<40x256xf32>
    %12 = arith.maximumf %9, %11 : vector<40x256xf32>
    %c0_12 = arith.constant 0 : index
    %c0_13 = arith.constant 0 : index
    %13 = vector.load %arg3[%c0_12, %c0_13] : memref<72x40xf32, #tpu.memory_space<vmem>>, vector<72x40xf32>
    %cst_14 = arith.constant dense<0.000000e+00> : vector<72x256xf32>
    %14 = tpu.matmul %13, %12, %cst_14 {dimension_numbers = #tpu.dot_dimension_numbers<[1], [0], [0], [1], [0, 0, 1, 1], [], []>} : vector<72x40xf32>, vector<40x256xf32>, vector<72x256xf32> -> vector<72x256xf32>
    %15 = vector.extract_strided_slice %14 {offsets = [0, 0], sizes = [24, 256], strides = [1, 1]} : vector<72x256xf32> to vector<24x256xf32>
    %c0_15 = arith.constant 0 : index
    %c0_16 = arith.constant 0 : index
    %16 = vector.load %arg26[%c0_15, %c0_16] : memref<24x768xf32, #tpu.memory_space<vmem>>, vector<24x256xf32>
    tpu.vector_store %arg26[%c0_15, %c0_16], %15 {strides = array<i32>} : memref<24x768xf32, #tpu.memory_space<vmem>>, vector<24x256xf32>,
    %17 = vector.extract_strided_slice %14 {offsets = [24, 0], sizes = [24, 256], strides = [1, 1]} : vector<72x256xf32> to vector<24x256xf32>
    %c0_17 = arith.constant 0 : index
    %c256 = arith.constant 256 : index
    %18 = vector.load %arg26[%c0_17, %c256] : memref<24x768xf32, #tpu.memory_space<vmem>>, vector<24x256xf32>
    tpu.vector_store %arg26[%c0_17, %c256], %17 {strides = array<i32>} : memref<24x768xf32, #tpu.memory_space<vmem>>, vector<24x256xf32>,
    %19 = vector.extract_strided_slice %14 {offsets = [48, 0], sizes = [24, 256], strides = [1, 1]} : vector<72x256xf32> to vector<24x256xf32>
    %c0_18 = arith.constant 0 : index
    %c512 = arith.constant 512 : index
    %20 = vector.load %arg26[%c0_18, %c512] : memref<24x768xf32, #tpu.memory_space<vmem>>, vector<24x256xf32>
    tpu.vector_store %arg26[%c0_18, %c512], %19 {strides = array<i32>} : memref<24x768xf32, #tpu.memory_space<vmem>>, vector<24x256xf32>,
    %c0_19 = arith.constant 0 : index
    %c0_20 = arith.constant 0 : index
    %21 = vector.load %arg26[%c0_19, %c0_20] : memref<24x768xf32, #tpu.memory_space<vmem>>, vector<24x768xf32>
    %c0_21 = arith.constant 0 : index
    %c0_22 = arith.constant 0 : index
    %22 = vector.load %arg7[%c0_21, %c0_22] : memref<768x256xf32, #tpu.memory_space<vmem>>, vector<768x256xf32>
    %cst_23 = arith.constant dense<0.000000e+00> : vector<24x256xf32>
    %23 = tpu.matmul %21, %22, %cst_23 {dimension_numbers = #tpu.dot_dimension_numbers<[1], [0], [0], [1], [0, 0, 1, 1], [], []>} : vector<24x768xf32>, vector<768x256xf32>, vector<24x256xf32> -> vector<24x256xf32>
    %cst_24 = arith.constant dense<0.000000e+00> : vector<256xf32>
    %24 = vector.multi_reduction <add>, %23, %cst_24 [0] : vector<24x256xf32> to vector<256xf32>
    %25 = vector.shape_cast %24 : vector<256xf32> to vector<1x256xf32>
    %26 = arith.mulf %23, %23 : vector<24x256xf32>
    %cst_25 = arith.constant dense<0.000000e+00> : vector<256xf32>
    %27 = vector.multi_reduction <add>, %26, %cst_25 [0] : vector<24x256xf32> to vector<256xf32>
    %28 = vector.shape_cast %27 : vector<256xf32> to vector<1x256xf32>
    %c0_26 = arith.constant 0 : index
    %c0_27 = arith.constant 0 : index
    %29 = vector.load %arg16[%c0_26, %c0_27] : memref<256x128xf32, #tpu.memory_space<vmem>>, vector<256x128xf32>
    %cst_28 = arith.constant dense<0.000000e+00> : vector<1x128xf32>
    %30 = tpu.matmul %25, %29, %cst_28 {dimension_numbers = #tpu.dot_dimension_numbers<[1], [0], [0], [1], [0, 0, 1, 1], [], []>} : vector<1x256xf32>, vector<256x128xf32>, vector<1x128xf32> -> vector<1x128xf32>
    %c0_29 = arith.constant 0 : index
    %c0_30 = arith.constant 0 : index
    %31 = vector.load %arg16[%c0_29, %c0_30] : memref<256x128xf32, #tpu.memory_space<vmem>>, vector<256x128xf32>
    %cst_31 = arith.constant dense<0.000000e+00> : vector<1x128xf32>
    %32 = tpu.matmul %28, %31, %cst_31 {dimension_numbers = #tpu.dot_dimension_numbers<[1], [0], [0], [1], [0, 0, 1, 1], [], []>} : vector<1x256xf32>, vector<256x128xf32>, vector<1x128xf32> -> vector<1x128xf32>
    %cst_32 = arith.constant 0.00617283955 : f32
    %33 = vector.broadcast %cst_32 : f32 to vector<1x128xf32>
    %34 = arith.mulf %30, %33 : vector<1x128xf32>
    %cst_33 = arith.constant 0.00617283955 : f32
    %35 = vector.broadcast %cst_33 : f32 to vector<1x128xf32>
    %36 = arith.mulf %32, %35 : vector<1x128xf32>
    %37 = arith.mulf %34, %34 : vector<1x128xf32>
    %38 = arith.subf %36, %37 : vector<1x128xf32>
    %c0_34 = arith.constant 0 : index
    %c0_35 = arith.constant 0 : index
    %39 = vector.load %arg10[%c0_34, %c0_35] : memref<1x128xf32, #tpu.memory_space<vmem>>, vector<1x128xf32>
    %cst_36 = arith.constant 9.99999974E-6 : f32
    %40 = vector.broadcast %cst_36 : f32 to vector<1x128xf32>
    %41 = arith.addf %38, %40 : vector<1x128xf32>
    %42 = math.rsqrt %41 : vector<1x128xf32>
    %43 = arith.mulf %39, %42 : vector<1x128xf32>
    %c0_37 = arith.constant 0 : index
    %c0_38 = arith.constant 0 : index
    %44 = vector.load %arg11[%c0_37, %c0_38] : memref<1x128xf32, #tpu.memory_space<vmem>>, vector<1x128xf32>
    %45 = arith.mulf %34, %43 : vector<1x128xf32>
    %46 = arith.subf %44, %45 : vector<1x128xf32>
    %c0_39 = arith.constant 0 : index
    %c0_40 = arith.constant 0 : index
    %47 = vector.load %arg17[%c0_39, %c0_40] : memref<128x256xf32, #tpu.memory_space<vmem>>, vector<128x256xf32>
    %cst_41 = arith.constant dense<0.000000e+00> : vector<1x256xf32>
    %48 = tpu.matmul %43, %47, %cst_41 {dimension_numbers = #tpu.dot_dimension_numbers<[1], [0], [0], [1], [0, 0, 1, 1], [], []>} : vector<1x128xf32>, vector<128x256xf32>, vector<1x256xf32> -> vector<1x256xf32>
    %c0_42 = arith.constant 0 : index
    %c0_43 = arith.constant 0 : index
    %49 = vector.load %arg17[%c0_42, %c0_43] : memref<128x256xf32, #tpu.memory_space<vmem>>, vector<128x256xf32>
    %cst_44 = arith.constant dense<0.000000e+00> : vector<1x256xf32>
    %50 = tpu.matmul %46, %49, %cst_44 {dimension_numbers = #tpu.dot_dimension_numbers<[1], [0], [0], [1], [0, 0, 1, 1], [], []>} : vector<1x128xf32>, vector<128x256xf32>, vector<1x256xf32> -> vector<1x256xf32>
    %51 = vector.broadcast %48 : vector<1x256xf32> to vector<24x256xf32>
    %52 = arith.mulf %23, %51 : vector<24x256xf32>
    %53 = vector.broadcast %50 : vector<1x256xf32> to vector<24x256xf32>
    %54 = arith.addf %52, %53 : vector<24x256xf32>
    %cst_45 = arith.constant 2.000000e-01 : f32
    %55 = vector.broadcast %cst_45 : f32 to vector<24x256xf32>
    %56 = arith.mulf %55, %54 : vector<24x256xf32>
    %57 = arith.maximumf %54, %56 : vector<24x256xf32>
    %c0_46 = arith.constant 0 : index
    %c0_47 = arith.constant 0 : index
    %58 = vector.load %arg4[%c0_46, %c0_47] : memref<48x24xf32, #tpu.memory_space<vmem>>, vector<48x24xf32>
    %cst_48 = arith.constant dense<0.000000e+00> : vector<48x256xf32>
    %59 = tpu.matmul %58, %57, %cst_48 {dimension_numbers = #tpu.dot_dimension_numbers<[1], [0], [0], [1], [0, 0, 1, 1], [], []>} : vector<48x24xf32>, vector<24x256xf32>, vector<48x256xf32> -> vector<48x256xf32>
    %60 = vector.extract_strided_slice %59 {offsets = [0, 0], sizes = [16, 256], strides = [1, 1]} : vector<48x256xf32> to vector<16x256xf32>
    %c0_49 = arith.constant 0 : index
    %c0_50 = arith.constant 0 : index
    %61 = vector.load %arg27[%c0_49, %c0_50] : memref<16x768xf32, #tpu.memory_space<vmem>>, vector<16x256xf32>
    tpu.vector_store %arg27[%c0_49, %c0_50], %60 {strides = array<i32>} : memref<16x768xf32, #tpu.memory_space<vmem>>, vector<16x256xf32>,
    %62 = vector.extract_strided_slice %59 {offsets = [16, 0], sizes = [16, 256], strides = [1, 1]} : vector<48x256xf32> to vector<16x256xf32>
    %c0_51 = arith.constant 0 : index
    %c256_52 = arith.constant 256 : index
    %63 = vector.load %arg27[%c0_51, %c256_52] : memref<16x768xf32, #tpu.memory_space<vmem>>, vector<16x256xf32>
    tpu.vector_store %arg27[%c0_51, %c256_52], %62 {strides = array<i32>} : memref<16x768xf32, #tpu.memory_space<vmem>>, vector<16x256xf32>,
    %64 = vector.extract_strided_slice %59 {offsets = [32, 0], sizes = [16, 256], strides = [1, 1]} : vector<48x256xf32> to vector<16x256xf32>
    %c0_53 = arith.constant 0 : index
    %c512_54 = arith.constant 512 : index
    %65 = vector.load %arg27[%c0_53, %c512_54] : memref<16x768xf32, #tpu.memory_space<vmem>>, vector<16x256xf32>
    tpu.vector_store %arg27[%c0_53, %c512_54], %64 {strides = array<i32>} : memref<16x768xf32, #tpu.memory_space<vmem>>, vector<16x256xf32>,
    %c0_55 = arith.constant 0 : index
    %c0_56 = arith.constant 0 : index
    %66 = vector.load %arg27[%c0_55, %c0_56] : memref<16x768xf32, #tpu.memory_space<vmem>>, vector<16x768xf32>
    %c0_57 = arith.constant 0 : index
    %c0_58 = arith.constant 0 : index
    %67 = vector.load %arg8[%c0_57, %c0_58] : memref<768x256xf32, #tpu.memory_space<vmem>>, vector<768x256xf32>
    %cst_59 = arith.constant dense<0.000000e+00> : vector<16x256xf32>
    %68 = tpu.matmul %66, %67, %cst_59 {dimension_numbers = #tpu.dot_dimension_numbers<[1], [0], [0], [1], [0, 0, 1, 1], [], []>} : vector<16x768xf32>, vector<768x256xf32>, vector<16x256xf32> -> vector<16x256xf32>
    %cst_60 = arith.constant dense<0.000000e+00> : vector<256xf32>
    %69 = vector.multi_reduction <add>, %68, %cst_60 [0] : vector<16x256xf32> to vector<256xf32>
    %70 = vector.shape_cast %69 : vector<256xf32> to vector<1x256xf32>
    %71 = arith.mulf %68, %68 : vector<16x256xf32>
    %cst_61 = arith.constant dense<0.000000e+00> : vector<256xf32>
    %72 = vector.multi_reduction <add>, %71, %cst_61 [0] : vector<16x256xf32> to vector<256xf32>
    %73 = vector.shape_cast %72 : vector<256xf32> to vector<1x256xf32>
    %c0_62 = arith.constant 0 : index
    %c0_63 = arith.constant 0 : index
    %74 = vector.load %arg18[%c0_62, %c0_63] : memref<256x128xf32, #tpu.memory_space<vmem>>, vector<256x128xf32>
    %cst_64 = arith.constant dense<0.000000e+00> : vector<1x128xf32>
    %75 = tpu.matmul %70, %74, %cst_64 {dimension_numbers = #tpu.dot_dimension_numbers<[1], [0], [0], [1], [0, 0, 1, 1], [], []>} : vector<1x256xf32>, vector<256x128xf32>, vector<1x128xf32> -> vector<1x128xf32>
    %c0_65 = arith.constant 0 : index
    %c0_66 = arith.constant 0 : index
    %76 = vector.load %arg18[%c0_65, %c0_66] : memref<256x128xf32, #tpu.memory_space<vmem>>, vector<256x128xf32>
    %cst_67 = arith.constant dense<0.000000e+00> : vector<1x128xf32>
    %77 = tpu.matmul %73, %76, %cst_67 {dimension_numbers = #tpu.dot_dimension_numbers<[1], [0], [0], [1], [0, 0, 1, 1], [], []>} : vector<1x256xf32>, vector<256x128xf32>, vector<1x128xf32> -> vector<1x128xf32>
    %cst_68 = arith.constant 2.000000e-02 : f32
    %78 = vector.broadcast %cst_68 : f32 to vector<1x128xf32>
    %79 = arith.mulf %75, %78 : vector<1x128xf32>
    %cst_69 = arith.constant 2.000000e-02 : f32
    %80 = vector.broadcast %cst_69 : f32 to vector<1x128xf32>
    %81 = arith.mulf %77, %80 : vector<1x128xf32>
    %82 = arith.mulf %79, %79 : vector<1x128xf32>
    %83 = arith.subf %81, %82 : vector<1x128xf32>
    %c0_70 = arith.constant 0 : index
    %c0_71 = arith.constant 0 : index
    %84 = vector.load %arg12[%c0_70, %c0_71] : memref<1x128xf32, #tpu.memory_space<vmem>>, vector<1x128xf32>
    %cst_72 = arith.constant 9.99999974E-6 : f32
    %85 = vector.broadcast %cst_72 : f32 to vector<1x128xf32>
    %86 = arith.addf %83, %85 : vector<1x128xf32>
    %87 = math.rsqrt %86 : vector<1x128xf32>
    %88 = arith.mulf %84, %87 : vector<1x128xf32>
    %c0_73 = arith.constant 0 : index
    %c0_74 = arith.constant 0 : index
    %89 = vector.load %arg13[%c0_73, %c0_74] : memref<1x128xf32, #tpu.memory_space<vmem>>, vector<1x128xf32>
    %90 = arith.mulf %79, %88 : vector<1x128xf32>
    %91 = arith.subf %89, %90 : vector<1x128xf32>
    %c0_75 = arith.constant 0 : index
    %c0_76 = arith.constant 0 : index
    %92 = vector.load %arg19[%c0_75, %c0_76] : memref<128x256xf32, #tpu.memory_space<vmem>>, vector<128x256xf32>
    %cst_77 = arith.constant dense<0.000000e+00> : vector<1x256xf32>
    %93 = tpu.matmul %88, %92, %cst_77 {dimension_numbers = #tpu.dot_dimension_numbers<[1], [0], [0], [1], [0, 0, 1, 1], [], []>} : vector<1x128xf32>, vector<128x256xf32>, vector<1x256xf32> -> vector<1x256xf32>
    %c0_78 = arith.constant 0 : index
    %c0_79 = arith.constant 0 : index
    %94 = vector.load %arg19[%c0_78, %c0_79] : memref<128x256xf32, #tpu.memory_space<vmem>>, vector<128x256xf32>
    %cst_80 = arith.constant dense<0.000000e+00> : vector<1x256xf32>
    %95 = tpu.matmul %91, %94, %cst_80 {dimension_numbers = #tpu.dot_dimension_numbers<[1], [0], [0], [1], [0, 0, 1, 1], [], []>} : vector<1x128xf32>, vector<128x256xf32>, vector<1x256xf32> -> vector<1x256xf32>
    %96 = vector.broadcast %93 : vector<1x256xf32> to vector<16x256xf32>
    %97 = arith.mulf %68, %96 : vector<16x256xf32>
    %98 = vector.broadcast %95 : vector<1x256xf32> to vector<16x256xf32>
    %99 = arith.addf %97, %98 : vector<16x256xf32>
    %cst_81 = arith.constant 2.000000e-01 : f32
    %100 = vector.broadcast %cst_81 : f32 to vector<16x256xf32>
    %101 = arith.mulf %100, %99 : vector<16x256xf32>
    %102 = arith.maximumf %99, %101 : vector<16x256xf32>
    %c0_82 = arith.constant 0 : index
    %c0_83 = arith.constant 0 : index
    %103 = vector.load %arg5[%c0_82, %c0_83] : memref<24x16xf32, #tpu.memory_space<vmem>>, vector<24x16xf32>
    %cst_84 = arith.constant dense<0.000000e+00> : vector<24x256xf32>
    %104 = tpu.matmul %103, %102, %cst_84 {dimension_numbers = #tpu.dot_dimension_numbers<[1], [0], [0], [1], [0, 0, 1, 1], [], []>} : vector<24x16xf32>, vector<16x256xf32>, vector<24x256xf32> -> vector<24x256xf32>
    %105 = vector.extract_strided_slice %104 {offsets = [0, 0], sizes = [8, 256], strides = [1, 1]} : vector<24x256xf32> to vector<8x256xf32>
    %c0_85 = arith.constant 0 : index
    %c0_86 = arith.constant 0 : index
    %106 = vector.load %arg28[%c0_85, %c0_86] : memref<8x768xf32, #tpu.memory_space<vmem>>, vector<8x256xf32>
    tpu.vector_store %arg28[%c0_85, %c0_86], %105 {strides = array<i32>} : memref<8x768xf32, #tpu.memory_space<vmem>>, vector<8x256xf32>,
    %107 = vector.extract_strided_slice %104 {offsets = [8, 0], sizes = [8, 256], strides = [1, 1]} : vector<24x256xf32> to vector<8x256xf32>
    %c0_87 = arith.constant 0 : index
    %c256_88 = arith.constant 256 : index
    %108 = vector.load %arg28[%c0_87, %c256_88] : memref<8x768xf32, #tpu.memory_space<vmem>>, vector<8x256xf32>
    tpu.vector_store %arg28[%c0_87, %c256_88], %107 {strides = array<i32>} : memref<8x768xf32, #tpu.memory_space<vmem>>, vector<8x256xf32>,
    %109 = vector.extract_strided_slice %104 {offsets = [16, 0], sizes = [8, 256], strides = [1, 1]} : vector<24x256xf32> to vector<8x256xf32>
    %c0_89 = arith.constant 0 : index
    %c512_90 = arith.constant 512 : index
    %110 = vector.load %arg28[%c0_89, %c512_90] : memref<8x768xf32, #tpu.memory_space<vmem>>, vector<8x256xf32>
    tpu.vector_store %arg28[%c0_89, %c512_90], %109 {strides = array<i32>} : memref<8x768xf32, #tpu.memory_space<vmem>>, vector<8x256xf32>,
    %c0_91 = arith.constant 0 : index
    %c0_92 = arith.constant 0 : index
    %111 = vector.load %arg28[%c0_91, %c0_92] : memref<8x768xf32, #tpu.memory_space<vmem>>, vector<8x768xf32>
    %c0_93 = arith.constant 0 : index
    %c0_94 = arith.constant 0 : index
    %112 = vector.load %arg9[%c0_93, %c0_94] : memref<768x256xf32, #tpu.memory_space<vmem>>, vector<768x256xf32>
    %cst_95 = arith.constant dense<0.000000e+00> : vector<8x256xf32>
    %113 = tpu.matmul %111, %112, %cst_95 {dimension_numbers = #tpu.dot_dimension_numbers<[1], [0], [0], [1], [0, 0, 1, 1], [], []>} : vector<8x768xf32>, vector<768x256xf32>, vector<8x256xf32> -> vector<8x256xf32>
    %cst_96 = arith.constant dense<0.000000e+00> : vector<256xf32>
    %114 = vector.multi_reduction <add>, %113, %cst_96 [0] : vector<8x256xf32> to vector<256xf32>
    %115 = vector.shape_cast %114 : vector<256xf32> to vector<1x256xf32>
    %116 = arith.mulf %113, %113 : vector<8x256xf32>
    %cst_97 = arith.constant dense<0.000000e+00> : vector<256xf32>
    %117 = vector.multi_reduction <add>, %116, %cst_97 [0] : vector<8x256xf32> to vector<256xf32>
    %118 = vector.shape_cast %117 : vector<256xf32> to vector<1x256xf32>
    %c0_98 = arith.constant 0 : index
    %c0_99 = arith.constant 0 : index
    %119 = vector.load %arg20[%c0_98, %c0_99] : memref<256x128xf32, #tpu.memory_space<vmem>>, vector<256x128xf32>
    %cst_100 = arith.constant dense<0.000000e+00> : vector<1x128xf32>
    %120 = tpu.matmul %115, %119, %cst_100 {dimension_numbers = #tpu.dot_dimension_numbers<[1], [0], [0], [1], [0, 0, 1, 1], [], []>} : vector<1x256xf32>, vector<256x128xf32>, vector<1x128xf32> -> vector<1x128xf32>
    %c0_101 = arith.constant 0 : index
    %c0_102 = arith.constant 0 : index
    %121 = vector.load %arg20[%c0_101, %c0_102] : memref<256x128xf32, #tpu.memory_space<vmem>>, vector<256x128xf32>
    %cst_103 = arith.constant dense<0.000000e+00> : vector<1x128xf32>
    %122 = tpu.matmul %118, %121, %cst_103 {dimension_numbers = #tpu.dot_dimension_numbers<[1], [0], [0], [1], [0, 0, 1, 1], [], []>} : vector<1x256xf32>, vector<256x128xf32>, vector<1x128xf32> -> vector<1x128xf32>
    %cst_104 = arith.constant 0.055555556 : f32
    %123 = vector.broadcast %cst_104 : f32 to vector<1x128xf32>
    %124 = arith.mulf %120, %123 : vector<1x128xf32>
    %cst_105 = arith.constant 0.055555556 : f32
    %125 = vector.broadcast %cst_105 : f32 to vector<1x128xf32>
    %126 = arith.mulf %122, %125 : vector<1x128xf32>
    %127 = arith.mulf %124, %124 : vector<1x128xf32>
    %128 = arith.subf %126, %127 : vector<1x128xf32>
    %c0_106 = arith.constant 0 : index
    %c0_107 = arith.constant 0 : index
    %129 = vector.load %arg14[%c0_106, %c0_107] : memref<1x128xf32, #tpu.memory_space<vmem>>, vector<1x128xf32>
    %cst_108 = arith.constant 9.99999974E-6 : f32
    %130 = vector.broadcast %cst_108 : f32 to vector<1x128xf32>
    %131 = arith.addf %128, %130 : vector<1x128xf32>
    %132 = math.rsqrt %131 : vector<1x128xf32>
    %133 = arith.mulf %129, %132 : vector<1x128xf32>
    %c0_109 = arith.constant 0 : index
    %c0_110 = arith.constant 0 : index
    %134 = vector.load %arg15[%c0_109, %c0_110] : memref<1x128xf32, #tpu.memory_space<vmem>>, vector<1x128xf32>
    %135 = arith.mulf %124, %133 : vector<1x128xf32>
    %136 = arith.subf %134, %135 : vector<1x128xf32>
    %c0_111 = arith.constant 0 : index
    %c0_112 = arith.constant 0 : index
    %137 = vector.load %arg21[%c0_111, %c0_112] : memref<128x256xf32, #tpu.memory_space<vmem>>, vector<128x256xf32>
    %cst_113 = arith.constant dense<0.000000e+00> : vector<1x256xf32>
    %138 = tpu.matmul %133, %137, %cst_113 {dimension_numbers = #tpu.dot_dimension_numbers<[1], [0], [0], [1], [0, 0, 1, 1], [], []>} : vector<1x128xf32>, vector<128x256xf32>, vector<1x256xf32> -> vector<1x256xf32>
    %c0_114 = arith.constant 0 : index
    %c0_115 = arith.constant 0 : index
    %139 = vector.load %arg21[%c0_114, %c0_115] : memref<128x256xf32, #tpu.memory_space<vmem>>, vector<128x256xf32>
    %cst_116 = arith.constant dense<0.000000e+00> : vector<1x256xf32>
    %140 = tpu.matmul %136, %139, %cst_116 {dimension_numbers = #tpu.dot_dimension_numbers<[1], [0], [0], [1], [0, 0, 1, 1], [], []>} : vector<1x128xf32>, vector<128x256xf32>, vector<1x256xf32> -> vector<1x256xf32>
    %141 = vector.broadcast %138 : vector<1x256xf32> to vector<8x256xf32>
    %142 = arith.mulf %113, %141 : vector<8x256xf32>
    %143 = vector.broadcast %140 : vector<1x256xf32> to vector<8x256xf32>
    %144 = arith.addf %142, %143 : vector<8x256xf32>
    %cst_117 = arith.constant 2.000000e-01 : f32
    %145 = vector.broadcast %cst_117 : f32 to vector<8x256xf32>
    %146 = arith.mulf %145, %144 : vector<8x256xf32>
    %147 = arith.maximumf %144, %146 : vector<8x256xf32>
    %c0_118 = arith.constant 0 : index
    %c0_119 = arith.constant 0 : index
    %148 = vector.load %arg22[%c0_118, %c0_119] : memref<8x256xf32, #tpu.memory_space<vmem>>, vector<8x256xf32>
    %149 = arith.mulf %147, %148 : vector<8x256xf32>
    %c0_120 = arith.constant 0 : index
    %c0_121 = arith.constant 0 : index
    %150 = vector.load %arg23[%c0_120, %c0_121] : memref<2x8xf32, #tpu.memory_space<vmem>>, vector<2x8xf32>
    %cst_122 = arith.constant dense<0.000000e+00> : vector<2x256xf32>
    %151 = tpu.matmul %150, %149, %cst_122 {dimension_numbers = #tpu.dot_dimension_numbers<[1], [0], [0], [1], [0, 0, 1, 1], [], []>} : vector<2x8xf32>, vector<8x256xf32>, vector<2x256xf32> -> vector<2x256xf32>
    %cst_123 = arith.constant dense<0.000000e+00> : vector<2xf32>
    %152 = vector.multi_reduction <add>, %151, %cst_123 [1] : vector<2x256xf32> to vector<2xf32>
    %153 = vector.shape_cast %152 : vector<2xf32> to vector<2x1xf32>
    %cst_124 = arith.constant 0.000000e+00 : f32
    %154 = vector.broadcast %cst_124 : f32 to vector<2x1xf32>
    %155 = arith.subf %154, %153 : vector<2x1xf32>
    %156 = math.exp %155 : vector<2x1xf32>
    %cst_125 = arith.constant 1.000000e+00 : f32
    %157 = vector.broadcast %cst_125 : f32 to vector<2x1xf32>
    %158 = arith.addf %157, %156 : vector<2x1xf32>
    %cst_126 = arith.constant 1.000000e+00 : f32
    %159 = vector.broadcast %cst_126 : f32 to vector<2x1xf32>
    %160 = arith.divf %159, %158 : vector<2x1xf32>
    %c0_127 = arith.constant 0 : index
    %c0_128 = arith.constant 0 : index
    %161 = vector.load %arg24[%c0_127, %c0_128] : memref<2x1xf32, #tpu.memory_space<vmem>>, vector<2x1xf32>
    tpu.vector_store %arg24[%c0_127, %c0_128], %160 {strides = array<i32>} : memref<2x1xf32, #tpu.memory_space<vmem>>, vector<2x1xf32>,
    return
  }
  func.func @transform_0(%arg0: i32) -> (i32, i32) {
    %c0_i32 = arith.constant 0 : i32
    %c0_i32_0 = arith.constant 0 : i32
    %c0_i32_1 = arith.constant 0 : i32
    return %c0_i32, %c0_i32_0 : i32, i32
  }
  func.func @transform_1(%arg0: i32) -> (i32, i32) {
    %c0_i32 = arith.constant 0 : i32
    %c0_i32_0 = arith.constant 0 : i32
    %c0_i32_1 = arith.constant 0 : i32
    return %c0_i32, %c0_i32_0 : i32, i32
  }
  func.func @transform_2(%arg0: i32) -> (i32, i32) {
    %c0_i32 = arith.constant 0 : i32
    %c0_i32_0 = arith.constant 0 : i32
    %c0_i32_1 = arith.constant 0 : i32
    return %c0_i32, %c0_i32_0 : i32, i32
  }
  func.func @transform_3(%arg0: i32) -> (i32, i32) {
    %c0_i32 = arith.constant 0 : i32
    %c0_i32_0 = arith.constant 0 : i32
    %c0_i32_1 = arith.constant 0 : i32
    return %c0_i32, %c0_i32_0 : i32, i32
  }
  func.func @transform_4(%arg0: i32) -> (i32, i32) {
    %c0_i32 = arith.constant 0 : i32
    %c0_i32_0 = arith.constant 0 : i32
    %c0_i32_1 = arith.constant 0 : i32
    return %c0_i32, %c0_i32_0 : i32, i32
  }
  func.func @transform_5(%arg0: i32) -> (i32, i32) {
    %c0_i32 = arith.constant 0 : i32
    %c0_i32_0 = arith.constant 0 : i32
    %c0_i32_1 = arith.constant 0 : i32
    return %c0_i32, %c0_i32_0 : i32, i32
  }
  func.func @transform_6(%arg0: i32) -> (i32, i32) {
    %c0_i32 = arith.constant 0 : i32
    %c0_i32_0 = arith.constant 0 : i32
    %c0_i32_1 = arith.constant 0 : i32
    return %c0_i32, %c0_i32_0 : i32, i32
  }
  func.func @transform_7(%arg0: i32) -> (i32, i32) {
    %c0_i32 = arith.constant 0 : i32
    %c0_i32_0 = arith.constant 0 : i32
    %c0_i32_1 = arith.constant 0 : i32
    return %c0_i32, %c0_i32_0 : i32, i32
  }
  func.func @transform_8(%arg0: i32) -> (i32, i32) {
    %c0_i32 = arith.constant 0 : i32
    %c0_i32_0 = arith.constant 0 : i32
    %c0_i32_1 = arith.constant 0 : i32
    return %c0_i32, %c0_i32_0 : i32, i32
  }
  func.func @transform_9(%arg0: i32) -> (i32, i32) {
    %c0_i32 = arith.constant 0 : i32
    %c0_i32_0 = arith.constant 0 : i32
    %c0_i32_1 = arith.constant 0 : i32
    return %c0_i32, %c0_i32_0 : i32, i32
  }
  func.func @transform_10(%arg0: i32) -> (i32, i32) {
    %c0_i32 = arith.constant 0 : i32
    %c0_i32_0 = arith.constant 0 : i32
    %c0_i32_1 = arith.constant 0 : i32
    return %c0_i32, %c0_i32_0 : i32, i32
  }
  func.func @transform_11(%arg0: i32) -> (i32, i32) {
    %c0_i32 = arith.constant 0 : i32
    %c0_i32_0 = arith.constant 0 : i32
    %c0_i32_1 = arith.constant 0 : i32
    return %c0_i32, %c0_i32_0 : i32, i32
  }
  func.func @transform_12(%arg0: i32) -> (i32, i32) {
    %c0_i32 = arith.constant 0 : i32
    %c0_i32_0 = arith.constant 0 : i32
    %c0_i32_1 = arith.constant 0 : i32
    return %c0_i32, %c0_i32_0 : i32, i32
  }
  func.func @transform_13(%arg0: i32) -> (i32, i32) {
    %c0_i32 = arith.constant 0 : i32
    %c0_i32_0 = arith.constant 0 : i32
    %c0_i32_1 = arith.constant 0 : i32
    return %c0_i32, %c0_i32_0 : i32, i32
  }
  func.func @transform_14(%arg0: i32) -> (i32, i32) {
    %c0_i32 = arith.constant 0 : i32
    %c0_i32_0 = arith.constant 0 : i32
    %c0_i32_1 = arith.constant 0 : i32
    return %c0_i32, %c0_i32_0 : i32, i32
  }
  func.func @transform_15(%arg0: i32) -> (i32, i32) {
    %c0_i32 = arith.constant 0 : i32
    %c0_i32_0 = arith.constant 0 : i32
    %c0_i32_1 = arith.constant 0 : i32
    return %c0_i32, %c0_i32_0 : i32, i32
  }
  func.func @transform_16(%arg0: i32) -> (i32, i32) {
    %c0_i32 = arith.constant 0 : i32
    %c0_i32_0 = arith.constant 0 : i32
    %c0_i32_1 = arith.constant 0 : i32
    return %c0_i32, %c0_i32_0 : i32, i32
  }
  func.func @transform_17(%arg0: i32) -> (i32, i32) {
    %c0_i32 = arith.constant 0 : i32
    %c0_i32_0 = arith.constant 0 : i32
    %c0_i32_1 = arith.constant 0 : i32
    return %c0_i32, %c0_i32_0 : i32, i32
  }
  func.func @transform_18(%arg0: i32) -> (i32, i32) {
    %c0_i32 = arith.constant 0 : i32
    %c0_i32_0 = arith.constant 0 : i32
    %c0_i32_1 = arith.constant 0 : i32
    return %c0_i32, %c0_i32_0 : i32, i32
  }
  func.func @transform_19(%arg0: i32) -> (i32, i32) {
    %c0_i32 = arith.constant 0 : i32
    %c0_i32_0 = arith.constant 0 : i32
    %c0_i32_1 = arith.constant 0 : i32
    return %c0_i32, %c0_i32_0 : i32, i32
  }
  func.func @transform_20(%arg0: i32) -> (i32, i32) {
    %c0_i32 = arith.constant 0 : i32
    %c0_i32_0 = arith.constant 0 : i32
    %c0_i32_1 = arith.constant 0 : i32
    return %c0_i32, %c0_i32_0 : i32, i32
  }
  func.func @transform_21(%arg0: i32) -> (i32, i32) {
    %c0_i32 = arith.constant 0 : i32
    %c0_i32_0 = arith.constant 0 : i32
    %c0_i32_1 = arith.constant 0 : i32
    return %c0_i32, %c0_i32_0 : i32, i32
  }
  func.func @transform_22(%arg0: i32) -> (i32, i32) {
    %c0_i32 = arith.constant 0 : i32
    %c0_i32_0 = arith.constant 0 : i32
    %c0_i32_1 = arith.constant 0 : i32
    return %c0_i32, %c0_i32_0 : i32, i32
  }
  func.func @transform_23(%arg0: i32) -> (i32, i32) {
    %c0_i32 = arith.constant 0 : i32
    %c0_i32_0 = arith.constant 0 : i32
    %c0_i32_1 = arith.constant 0 : i32
    return %c0_i32, %c0_i32_0 : i32, i32
  }
}

</mosaic_0001>

<bundles_post_ra>
// kernel: tile.7
= control target key start
LH: loop header
LB: loop body
LE: loop exit
PB: predicated region body
PF: predicated region fallthrough
CT: control target
= control target key end

     0   :  { %vm22_vm0 = vcmask 523264   ;;  %s78_s0 = inlined_call_operand.vmem [shape: f32[2,3,192], index: 0, kind: input, shape index: {}]   ;;  %s79_s1 = inlined_call_operand.vmem [shape: f32[6,192], index: 1, kind: output, shape index: {}]  }
   0x1   :  { %v38_v0 = vld [vmem:[%s78_s0 + $0xc] sm:$0xf]  ;;  %v39_v1 = vld [vmem:[%s78_s0 + $0x8] sm:$0xf]  ;;  %v40_v2 = vld [vmem:[%s78_s0 + $0x4] sm:$0xf] }
   0x2   :  { %8 = vst [vmem:[#allocation0 + $0x18] sm:$0xf] %v38_v0  ;;  %13 = vst [vmem:[#allocation0 + $0x10] sm:$0xf] %v39_v1  ;;  %v18_v3 = vld [vmem:[%s78_s0] sm:$0xf] }
   0x3   :  { %17 = vst [vmem:[#allocation0 + $0x8] sm:$0xf] %v40_v2  ;;  %19 = vst [vmem:[#allocation0] sm:$0xf] %v18_v3 }
   0x9   :  { %v26_v5 = vld [vmem:[#allocation0 + $0x18] sm:$0x7]   ;;  %v33_v6 = vld [vmem:[#allocation0 + $0x10] sm:$0x7]  }
   0xa   :  { %v21_v4 = vld [vmem:[#allocation0 + $0x8] sm:$0x7]   ;;  %42 = vst.msk [vmem:[%s79_s1 + $0xb] sm:$0x7] %vm22_vm0, %v26_v5   ;;  %v30_v7 = vld [vmem:[#allocation0] sm:$0x7]  }
   0xb   :  { %41 = vst.msk [vmem:[%s79_s1 + $0x8] sm:$0x7] %vm22_vm0, %v21_v4   ;;  %43 = vst [vmem:[%s79_s1 + $0x3] sm:$0x7] %v33_v6  }
   0xc   :  { %31 = vst [vmem:[%s79_s1] sm:$0x7] %v30_v7  }

// kernel: discriminator_forward.1
= control target key start
LH: loop header
LB: loop body
LE: loop exit
PB: predicated region body
PF: predicated region fallthrough
CT: control target
= control target key end

     0   :  { %vm92_vm0 = vcmask 523264   ;;  %vm446_vm1 = vcmask 326656   ;;  %vm1511_vm2 = vcmask 195584   ;;  %vm2502_vm3 = vcmask 130048   ;;  %s8067_s0 = inlined_call_operand.vmem [shape: f32[64,128], index: 0, kind: input, shape index: {}]   ;;  %s8068_s1 = inlined_call_operand.vmem [shape: f32[80,64], index: 1, kind: input, shape index: {}]   ;;  %s8069_s5 = inlined_call_operand.vmem [shape: f32[256,256], index: 5, kind: input, shape index: {}]   ;;  %s8070_s6 = inlined_call_operand.vmem [shape: f32[768,256], index: 6, kind: input, shape index: {}]   ;;  %s8071_s2 = inlined_call_operand.vmem [shape: f32[72,40], index: 2, kind: input, shape index: {}]   ;;  %s8072_s15 = inlined_call_operand.vmem [shape: f32[256,128], index: 15, kind: input, shape index: {}]   ;;  %s8073_s16 = inlined_call_operand.vmem [shape: f32[128,256], index: 16, kind: input, shape index: {}]   ;;  %s8074_s9 = inlined_call_operand.vmem [shape: f32[1,128], index: 9, kind: input, shape index: {}]   ;;  %s8075_s10 = inlined_call_operand.vmem [shape: f32[1,128], index: 10, kind: input, shape index: {}]   ;;  %s8076_s7 = inlined_call_operand.vmem [shape: f32[768,256], index: 7, kind: input, shape index: {}]   ;;  %s8077_s3 = inlined_call_operand.vmem [shape: f32[48,24], index: 3, kind: input, shape index: {}]   ;;  %s8078_s17 = inlined_call_operand.vmem [shape: f32[256,128], index: 17, kind: input, shape index: {}]   ;;  %s8079_s18 = inlined_call_operand.vmem [shape: f32[128,256], index: 18, kind: input, shape index: {}]   ;;  %s8080_s11 = inlined_call_operand.vmem [shape: f32[1,128], index: 11, kind: input, shape index: {}]   ;;  %s8081_s12 = inlined_call_operand.vmem [shape: f32[1,128], index: 12, kind: input, shape index: {}]   ;;  %s8082_s8 = inlined_call_operand.vmem [shape: f32[768,256], index: 8, kind: input, shape index: {}]   ;;  %s8083_s4 = inlined_call_operand.vmem [shape: f32[24,16], index: 4, kind: input, shape index: {}]   ;;  %s8084_s19 = inlined_call_operand.vmem [shape: f32[256,128], index: 19, kind: input, shape index: {}]   ;;  %s8085_s20 = inlined_call_operand.vmem [shape: f32[128,256], index: 20, kind: input, shape index: {}]   ;;  %s8086_s13 = inlined_call_operand.vmem [shape: f32[1,128], index: 13, kind: input, shape index: {}]   ;;  %s8087_s14 = inlined_call_operand.vmem [shape: f32[1,128], index: 14, kind: input, shape index: {}]   ;;  %s8088_s21 = inlined_call_operand.vmem [shape: f32[8,256], index: 21, kind: input, shape index: {}]   ;;  %s8089_s22 = inlined_call_operand.vmem [shape: f32[2,8], index: 22, kind: input, shape index: {}]   ;;  %s8090_s23 = inlined_call_operand.vmem [shape: f32[2,1], index: 23, kind: output, shape index: {}]  }
   0x1   :  { %8098 = sst [smem:[#allocation6_spill]] %s8067_s0  ;;  %vm3424_vm4 = vcmask 64512   ;;  %vm3499_vm5 = vcmask 1041408   ;;  %vm3511_vm6 = vcmask 1024  }
   0x2   :  { %8099 = sst [smem:[#allocation7_spill]] %s8068_s1  ;;  %s8106_s24 = sld [smem:[#allocation6_spill]] }
   0x3   :  { %8100 = sst [smem:[#allocation8_spill]] %s8069_s5 }
   0x4   :  { %8101 = sst [smem:[#allocation9_spill]] %s8070_s6 }
   0x5   :  { %8102 = sst [smem:[#allocation10_spill]] %s8071_s2  ;;  %s8107_s2 = sld [smem:[#allocation7_spill]] }
   0x6   :  { %8103 = sst [smem:[#allocation11_spill]] %s8072_s15  ;;  %s8109_s15 = sld [smem:[#allocation9_spill]] }
   0x7   :  { %8104 = sst [smem:[#allocation12_spill]] %s8073_s16  ;;  %s8108_s16 = sld [smem:[#allocation8_spill]] }
   0x8   :  { %8105 = sst [smem:[#allocation13_spill]] %s8074_s9  ;;  %v74_v0 = vld [vmem:[%s8106_s24] sm:$0xff]  ;;  %v75_v1 = vld [vmem:[%s8106_s24 + $0x8] sm:$0xff]  ;;  %v76_v2 = vld [vmem:[%s8106_s24 + $0x10] sm:$0xff]  ;;  %s8111_s25 = sld [smem:[#allocation11_spill]] }
   0x9   :  { %v3805_v3 = vpack.c.bf16 %v75_v1, %v74_v0  ;;  %v77_v4 = vld [vmem:[%s8106_s24 + $0x18] sm:$0xff]  ;;  %v78_v6 = vld [vmem:[%s8106_s24 + $0x20] sm:$0xff]  ;;  %v79_v7 = vld [vmem:[%s8106_s24 + $0x28] sm:$0xff]  ;;  %s8112_s1 = sld [smem:[#allocation12_spill]]  ;;  %s8113_s6 = sld [smem:[#allocation13_spill]] }
   0xa   :  { %v3809_v5 = vpack.c.bf16 %v77_v4, %v76_v2  ;;  %v3813_v9 = vpack.c.bf16 %v79_v7, %v78_v6  ;;  %v80_v10 = vld [vmem:[%s8106_s24 + $0x30] sm:$0xff]  ;;  %v81_v11 = vld [vmem:[%s8106_s24 + $0x38] sm:$0xff] }
   0xb   :  { %v82_v8 = vld [vmem:[%s8107_s2] sm:$0xff]  ;;  %3806 = vmatprep.subr.bf16.mxu1 %v3805_v3  ;;  %v3817_v12 = vpack.c.bf16 %v81_v11, %v80_v10  ;;  %v83_v20 = vld [vmem:[%s8107_s2 + $0x8] sm:$0xff]  ;;  %v84_v22 = vld [vmem:[%s8107_s2 + $0x10] sm:$0xff] }
   0xc   :  { %3790 = vmatprep.mubr.msk.f32.mxu1 %vm92_vm0, %v82_v8  ;;  %3808 = vmatpush3.bf16.msra.mxu1 %v3805_v3  ;;  %v85_v28 = vld [vmem:[%s8107_s2 + $0x18] sm:$0xff]  ;;  %v86_v30 = vld [vmem:[%s8107_s2 + $0x20] sm:$0xff]  ;;  %v87_v36 = vld [vmem:[%s8107_s2 + $0x28] sm:$0xff] }
   0xd   :  { %3810 = vmatprep.subr.bf16.mxu1 %v3809_v5  ;;  %v259_v13 = vld [vmem:[%s8108_s16 + $0x8] sm:$0xff]  ;;  %v261_v14 = vld [vmem:[%s8108_s16 + $0x18] sm:$0xff]  ;;  %v258_v16 = vld [vmem:[%s8108_s16] sm:$0xff] }
   0xe   :  { %v3821_v15 = vpack.c.bf16 %v261_v14, %v259_v13  ;;  %v260_v17 = vld [vmem:[%s8108_s16 + $0x10] sm:$0xff]  ;;  %v263_v18 = vld [vmem:[%s8108_s16 + $0x28] sm:$0xff]  ;;  %v265_v19 = vld [vmem:[%s8108_s16 + $0x38] sm:$0xff] }
   0xf   :  { %v3823_v21 = vpack.c.bf16 %v260_v17, %v258_v16  ;;  %v3825_v23 = vpack.c.bf16 %v265_v19, %v263_v18  ;;  %v262_v24 = vld [vmem:[%s8108_s16 + $0x20] sm:$0xff]  ;;  %v264_v25 = vld [vmem:[%s8108_s16 + $0x30] sm:$0xff]  ;;  %v267_v26 = vld [vmem:[%s8108_s16 + $0x48] sm:$0xff] }
  0x10   :  { %3812 = vmatpush3.bf16.msra.mxu1 %v3809_v5  ;;  %v269_v27 = vld [vmem:[%s8108_s16 + $0x58] sm:$0xff]  ;;  %v3827_v29 = vpack.c.bf16 %v264_v25, %v262_v24  ;;  %v266_v32 = vld [vmem:[%s8108_s16 + $0x40] sm:$0xff]  ;;  %v268_v33 = vld [vmem:[%s8108_s16 + $0x50] sm:$0xff] }
  0x11   :  { %3814 = vmatprep.subr.bf16.mxu1 %v3813_v9  ;;  %v3829_v31 = vpack.c.bf16 %v269_v27, %v267_v26  ;;  %v271_v34 = vld [vmem:[%s8108_s16 + $0x68] sm:$0xff]  ;;  %v273_v35 = vld [vmem:[%s8108_s16 + $0x78] sm:$0xff]  ;;  %v3831_v37 = vpack.c.bf16 %v268_v33, %v266_v32  ;;  %v88_v38 = vld [vmem:[%s8107_s2 + $0x30] sm:$0xff] }
  0x12   :  { %v3833_v39 = vpack.c.bf16 %v273_v35, %v271_v34  ;;  %v270_v40 = vld [vmem:[%s8108_s16 + $0x60] sm:$0xff]  ;;  %v272_v41 = vld [vmem:[%s8108_s16 + $0x70] sm:$0xff]  ;;  %v275_v42 = vld [vmem:[%s8108_s16 + $0x88] sm:$0xff] }
  0x13   :  { %v277_v43 = vld [vmem:[%s8108_s16 + $0x98] sm:$0xff]  ;;  %v3835_v45 = vpack.c.bf16 %v272_v41, %v270_v40  ;;  %v90_v46 = vld [vmem:[%s8107_s2 + $0x40] sm:$0xff]  ;;  %v276_v49 = vld [vmem:[%s8108_s16 + $0x90] sm:$0xff] }
  0x14   :  { %3816 = vmatpush3.bf16.msra.mxu1 %v3813_v9  ;;  %v89_v44 = vld [vmem:[%s8107_s2 + $0x38] sm:$0xff]  ;;  %v3837_v47 = vpack.c.bf16 %v277_v43, %v275_v42  ;;  %v274_v48 = vld [vmem:[%s8108_s16 + $0x80] sm:$0xff]  ;;  %v279_v50 = vld [vmem:[%s8108_s16 + $0xa8] sm:$0xff] }
  0x15   :  { %3818 = vmatprep.subr.bf16.mxu1 %v3817_v12  ;;  %v281_v51 = vld [vmem:[%s8108_s16 + $0xb8] sm:$0xff]  ;;  %v91_v52 = vld [vmem:[%s8107_s2 + $0x48] sm:$0xff]  ;;  %v3839_v53 = vpack.c.bf16 %v276_v49, %v274_v48  ;;  %v278_v55 = vld [vmem:[%s8108_s16 + $0xa0] sm:$0xff] }
  0x16   :  { %v3841_v54 = vpack.c.bf16 %v281_v51, %v279_v50  ;;  %v280_v56 = vld [vmem:[%s8108_s16 + $0xb0] sm:$0xff]  ;;  %v283_v57 = vld [vmem:[%s8108_s16 + $0xc8] sm:$0xff]  ;;  %v285_v58 = vld [vmem:[%s8108_s16 + $0xd8] sm:$0xff] }
  0x17   :  { %v3843_v59 = vpack.c.bf16 %v280_v56, %v278_v55  ;;  %v3845_v60 = vpack.c.bf16 %v285_v58, %v283_v57  ;;  %v282_v61 = vld [vmem:[%s8108_s16 + $0xc0] sm:$0xff]  ;;  %v284_v62 = vld [vmem:[%s8108_s16 + $0xd0] sm:$0xff]  ;;  %v287_v63 = vld [vmem:[%s8108_s16 + $0xe8] sm:$0xff] }
  0x18   :  { %3820 = vmatpush3.bf16.msra.mxu1 %v3817_v12  ;;  %v289_v0 = vld [vmem:[%s8108_s16 + $0xf8] sm:$0xff]  ;;  %v3847_v1 = vpack.c.bf16 %v284_v62, %v282_v61  ;;  %v286_v3 = vld [vmem:[%s8108_s16 + $0xe0] sm:$0xff]  ;;  %v288_v4 = vld [vmem:[%s8108_s16 + $0xf0] sm:$0xff] }
  0x19   :  { %3822 = vmatprep.subr.bf16.mxu1 %v3821_v15  ;;  %v3849_v2 = vpack.c.bf16 %v289_v0, %v287_v63  ;;  %v291_v5 = vld [vmem:[%s8108_s16 + $0x108] sm:$0xff]  ;;  %v293_v6 = vld [vmem:[%s8108_s16 + $0x118] sm:$0xff]  ;;  %v3851_v7 = vpack.c.bf16 %v288_v4, %v286_v3  ;;  %v290_v9 = vld [vmem:[%s8108_s16 + $0x100] sm:$0xff]  ;;  %v4896_v0 = vmov 0.0  }
  0x1a   :  { %v3853_v8 = vpack.c.bf16 %v293_v6, %v291_v5  ;;  %v292_v10 = vld [vmem:[%s8108_s16 + $0x110] sm:$0xff]  ;;  %v295_v11 = vld [vmem:[%s8108_s16 + $0x128] sm:$0xff]  ;;  %v297_v12 = vld [vmem:[%s8108_s16 + $0x138] sm:$0xff]  ;;  %538 = vmatprep.mubr.f32.mxu0 %v4896_v0 }
  0x1b   :  { %3791 = vmatmul.mubr.msk.f32.vlgmr.msra.gmra.mrb[0].mxu1 %vm92_vm0, %v83_v20  ;;  %v3855_v13 = vpack.c.bf16 %v292_v10, %v290_v9  ;;  %v3857_v14 = vpack.c.bf16 %v297_v12, %v295_v11  ;;  %v294_v15 = vld [vmem:[%s8108_s16 + $0x120] sm:$0xff]  ;;  %v296_v16 = vld [vmem:[%s8108_s16 + $0x130] sm:$0xff]  ;;  %v299_v17 = vld [vmem:[%s8108_s16 + $0x148] sm:$0xff] }
  0x1c   :  { %3793 = vmatprep.mubr.msk.f32.mxu1 %vm92_vm0, %v84_v22  ;;  %3824 = vmatpush1.bf16.msra.mxu1 %v3823_v21  ;;  %v301_v18 = vld [vmem:[%s8108_s16 + $0x158] sm:$0xff]  ;;  %v3859_v19 = vpack.c.bf16 %v296_v16, %v294_v15  ;;  %v298_v21 = vld [vmem:[%s8108_s16 + $0x140] sm:$0xff]  ;;  %v300_v22 = vld [vmem:[%s8108_s16 + $0x150] sm:$0xff] }
  0x1d   :  { %3826 = vmatprep.subr.bf16.mxu1 %v3825_v23  ;;  %v3861_v20 = vpack.c.bf16 %v301_v18, %v299_v17  ;;  %v303_v23 = vld [vmem:[%s8108_s16 + $0x168] sm:$0xff]  ;;  %v305_v24 = vld [vmem:[%s8108_s16 + $0x178] sm:$0xff]  ;;  %v3863_v25 = vpack.c.bf16 %v300_v22, %v298_v21  ;;  %v302_v27 = vld [vmem:[%s8108_s16 + $0x160] sm:$0xff] }
  0x1e   :  { %v3865_v26 = vpack.c.bf16 %v305_v24, %v303_v23  ;;  %v306_v33 = vld [vmem:[%s8108_s16 + $0x180] sm:$0xff]  ;;  %v308_v34 = vld [vmem:[%s8108_s16 + $0x190] sm:$0xff]  ;;  %v311_v35 = vld [vmem:[%s8108_s16 + $0x1a8] sm:$0xff] }
  0x1f   :  { %3794 = vmatmul.mubr.msk.f32.gmra.mrb[2].mxu1 %vm92_vm0, %v85_v28  ;;  %v304_v28 = vld [vmem:[%s8108_s16 + $0x170] sm:$0xff]  ;;  %v315_v42 = vld [vmem:[%s8108_s16 + $0x1c8] sm:$0xff]  ;;  %v317_v43 = vld [vmem:[%s8108_s16 + $0x1d8] sm:$0xff] }
  0x20   :  { %3796 = vmatprep.mubr.msk.f32.mxu1 %vm92_vm0, %v86_v30  ;;  %3828 = vmatpush1.bf16.msra.mxu1 %v3827_v29  ;;  %v307_v29 = vld [vmem:[%s8108_s16 + $0x188] sm:$0xff]  ;;  %v309_v30 = vld [vmem:[%s8108_s16 + $0x198] sm:$0xff]  ;;  %v312_v40 = vld [vmem:[%s8108_s16 + $0x1b0] sm:$0xff] }
  0x21   :  { %3830 = vmatprep.subr.bf16.mxu1 %v3829_v31  ;;  %v3867_v31 = vpack.c.bf16 %v304_v28, %v302_v27  ;;  %v3869_v32 = vpack.c.bf16 %v309_v30, %v307_v29  ;;  %v319_v48 = vld [vmem:[%s8108_s16 + $0x1e8] sm:$0xff]  ;;  %v321_v49 = vld [vmem:[%s8108_s16 + $0x1f8] sm:$0xff]  ;;  %v318_v51 = vld [vmem:[%s8108_s16 + $0x1e0] sm:$0xff] }
  0x22   :  { %v3881_v50 = vpack.c.bf16 %v321_v49, %v319_v48  ;;  %v640_v48 = vld [vmem:[%s8109_s15 + $0x58] sm:$0xff] }
  0x23   :  { %3797 = vmatmul.mubr.msk.f32.gmra.mrb[4].mxu1 %vm92_vm0, %v87_v36  ;;  %v313_v36 = vld [vmem:[%s8108_s16 + $0x1b8] sm:$0xff] }
  0x24   :  { %3799 = vmatprep.mubr.msk.f32.mxu1 %vm92_vm0, %v88_v38  ;;  %3832 = vmatpush1.bf16.msra.mxu1 %v3831_v37  ;;  %v3871_v37 = vpack.c.bf16 %v308_v34, %v306_v33  ;;  %v3873_v38 = vpack.c.bf16 %v313_v36, %v311_v35  ;;  %v630_v33 = vld [vmem:[%s8109_s15 + $0x8] sm:$0xff]  ;;  %v632_v34 = vld [vmem:[%s8109_s15 + $0x18] sm:$0xff]  ;;  %v629_v36 = vld [vmem:[%s8109_s15] sm:$0xff] }
  0x25   :  { %3834 = vmatprep.subr.bf16.mxu1 %v3833_v39  ;;  %v310_v39 = vld [vmem:[%s8108_s16 + $0x1a0] sm:$0xff] }
  0x26   :  { %v3875_v41 = vpack.c.bf16 %v312_v40, %v310_v39  ;;  %v636_v39 = vld [vmem:[%s8109_s15 + $0x38] sm:$0xff]  ;;  %v3893_v40 = vpack.c.bf16 %v632_v34, %v630_v33  ;;  %v666_v33 = vld [vmem:[%s8109_s15 + $0x128] sm:$0xff] }
  0x27   :  { %3800 = vmatmul.mubr.msk.f32.gmra.mrb[6].mxu1 %vm92_vm0, %v89_v44  ;;  %v3877_v44 = vpack.c.bf16 %v317_v43, %v315_v42  ;;  %v668_v34 = vld [vmem:[%s8109_s15 + $0x138] sm:$0xff] }
  0x28   :  { %3802 = vmatprep.mubr.msk.f32.mxu1 %vm92_vm0, %v90_v46  ;;  %3836 = vmatpush1.bf16.msra.mxu1 %v3835_v45  ;;  %v314_v45 = vld [vmem:[%s8108_s16 + $0x1c0] sm:$0xff]  ;;  %v316_v46 = vld [vmem:[%s8108_s16 + $0x1d0] sm:$0xff] }
  0x29   :  { %3838 = vmatprep.subr.bf16.mxu1 %v3837_v47  ;;  %v3879_v47 = vpack.c.bf16 %v316_v46, %v314_v45  ;;  %v633_v45 = vld [vmem:[%s8109_s15 + $0x20] sm:$0xff]  ;;  %v635_v46 = vld [vmem:[%s8109_s15 + $0x30] sm:$0xff] }
  0x2b   :  { %3803 = vmatmul.mubr.msk.f32.gmra.mrb[8].mxu1 %vm92_vm0, %v91_v52  ;;  %v320_v52 = vld [vmem:[%s8108_s16 + $0x1f0] sm:$0xff]  ;;  %s8110_s16 = sld [smem:[#allocation10_spill]] }
  0x2c   :  { %3840 = vmatpush1.bf16.msra.mxu1 %v3839_v53  ;;  %v3883_v53 = vpack.c.bf16 %v320_v52, %v318_v51  ;;  %v637_v52 = vld [vmem:[%s8109_s15 + $0x40] sm:$0xff] }
  0x2d   :  { %3842 = vmatprep.subr.bf16.mxu1 %v3841_v54 }
  0x30   :  { %3844 = vmatpush1.bf16.msra.mxu1 %v3843_v59 }
  0x31   :  { %3846 = vmatprep.subr.bf16.mxu1 %v3845_v60  ;;  %v437_v42 = vld [vmem:[%s8110_s16] sm:$0xff]  ;;  %v438_v49 = vld [vmem:[%s8110_s16 + $0x8] sm:$0xff] }
  0x34   :  { %3848 = vmatpush1.bf16.msra.mxu1 %v3847_v1 }
  0x35   :  { %3850 = vmatprep.subr.bf16.mxu1 %v3849_v2 }
  0x38   :  { %3852 = vmatpush1.bf16.msra.mxu1 %v3851_v7 }
  0x39   :  { %3854 = vmatprep.subr.bf16.mxu1 %v3853_v8 }
  0x3c   :  { %3856 = vmatpush1.bf16.msra.mxu1 %v3855_v13 }
  0x3d   :  { %3858 = vmatprep.subr.bf16.mxu1 %v3857_v14 }
  0x40   :  { %3860 = vmatpush1.bf16.msra.mxu1 %v3859_v19 }
  0x41   :  { %3862 = vmatprep.subr.bf16.mxu1 %v3861_v20 }
  0x44   :  { %3864 = vmatpush1.bf16.msra.mxu1 %v3863_v25 }
  0x45   :  { %3866 = vmatprep.subr.bf16.mxu1 %v3865_v26 }
  0x48   :  { %3868 = vmatpush1.bf16.msra.mxu1 %v3867_v31 }
  0x49   :  { %3870 = vmatprep.subr.bf16.mxu1 %v3869_v32 }
  0x4c   :  { %3872 = vmatpush1.bf16.msra.mxu1 %v3871_v37  ;;  %v631_v37 = vld [vmem:[%s8109_s15 + $0x10] sm:$0xff] }
  0x4d   :  { %3874 = vmatprep.subr.bf16.mxu1 %v3873_v38  ;;  %v634_v38 = vld [vmem:[%s8109_s15 + $0x28] sm:$0xff]  ;;  %v3895_v43 = vpack.c.bf16 %v631_v37, %v629_v36  ;;  %v3929_v37 = vpack.c.bf16 %v668_v34, %v666_v33  ;;  %v703_v33 = vld [vmem:[%s8109_s15 + $0x250] sm:$0xff] }
  0x50   :  { %3876 = vmatpush1.bf16.msra.mxu1 %v3875_v41 }
  0x51   :  { %3878 = vmatprep.subr.bf16.mxu1 %v3877_v44  ;;  %v3897_v44 = vpack.c.bf16 %v636_v39, %v634_v38  ;;  %v665_v38 = vld [vmem:[%s8109_s15 + $0x120] sm:$0xff]  ;;  %v667_v39 = vld [vmem:[%s8109_s15 + $0x130] sm:$0xff] }
  0x54   :  { %3880 = vmatpush1.bf16.msra.mxu1 %v3879_v47  ;;  %v638_v47 = vld [vmem:[%s8109_s15 + $0x48] sm:$0xff] }
  0x55   :  { %3882 = vmatprep.subr.bf16.mxu1 %v3881_v50  ;;  %v3899_v50 = vpack.c.bf16 %v635_v46, %v633_v45  ;;  %v3901_v51 = vpack.c.bf16 %v640_v48, %v638_v47  ;;  %v671_v45 = vld [vmem:[%s8109_s15 + $0x150] sm:$0xff]  ;;  %v674_v46 = vld [vmem:[%s8109_s15 + $0x168] sm:$0xff]  ;;  %v676_v47 = vld [vmem:[%s8109_s15 + $0x178] sm:$0xff] }
  0x58   :  { %3884 = vmatpush1.bf16.msra.mxu1 %v3883_v53  ;;  %v639_v53 = vld [vmem:[%s8109_s15 + $0x50] sm:$0xff] }
  0xee   :  { %v3792_v54 = vpop.f32.mrb[0].mxu1 }
  0xef   :  { %v189_v55 = vpop.f32.mrb[1].mxu1 }
  0xf2   :  { %v3795_v56 = vpop.f32.mrb[2].mxu1 }
  0xf3   :  { %v199_v57 = vpop.f32.mrb[3].mxu1 }
  0xf6   :  { %v3798_v58 = vpop.f32.mrb[4].mxu1 }
  0xf7   :  { %v209_v59 = vpop.f32.mrb[5].mxu1  ;;  %386 = vmatprep.mubr.f32.mxu1 %v3798_v58 }
  0xf8   :  { %387 = vmatmul.mubr.f32.vlgmr.msra.gmra.mrb[10].mxu1 %v189_v55  ;;  %v644_v55 = vld [vmem:[%s8109_s15 + $0x78] sm:$0xff] }
  0xfa   :  { %v3801_v60 = vpop.f32.mrb[6].mxu1 }
  0xfb   :  { %v219_v61 = vpop.f32.mrb[7].mxu1 }
  0xfc   :  { %392 = vmatprep.mubr.f32.mxu1 %v219_v61  ;;  %v646_v61 = vld [vmem:[%s8109_s15 + $0x88] sm:$0xff] }
  0xfd   :  { %393 = vmatmul.mubr.f32.gmra.mrb[12].mxu1 %v3792_v54  ;;  %v642_v54 = vld [vmem:[%s8109_s15 + $0x68] sm:$0xff] }
  0xfe   :  { %398 = vmatprep.mubr.f32.mxu1 %v3801_v60  ;;  %v3804_v62 = vpop.f32.mrb[8].mxu1  ;;  %v3905_v58 = vpack.c.bf16 %v644_v55, %v642_v54  ;;  %v643_v60 = vld [vmem:[%s8109_s15 + $0x70] sm:$0xff] }
  0xff   :  { %v229_v63 = vpop.f32.mrb[9].mxu1 }
 0x101   :  { %399 = vmatmul.mubr.f32.gmra.mrb[14].mxu1 %v199_v57  ;;  %v3903_v57 = vpack.c.bf16 %v639_v53, %v637_v52  ;;  %v678_v52 = vld [vmem:[%s8109_s15 + $0x188] sm:$0xff]  ;;  %v680_v53 = vld [vmem:[%s8109_s15 + $0x198] sm:$0xff] }
 0x102   :  { %404 = vmatprep.mubr.f32.mxu1 %v229_v63  ;;  %v440_v63 = vld [vmem:[%s8110_s16 + $0x18] sm:$0xff]  ;;  %v3941_v55 = vpack.c.bf16 %v680_v53, %v678_v52  ;;  %v1108_v52 = vld [vmem:[%s8111_s25] sm:$0xff] }
 0x105   :  { %405 = vmatmul.mubr.f32.gmra.mrb[16].mxu1 %v3795_v56  ;;  %v439_v56 = vld [vmem:[%s8110_s16 + $0x10] sm:$0xff] }
 0x106   :  { %410 = vmatprep.mubr.f32.mxu1 %v3804_v62  ;;  %v648_v62 = vld [vmem:[%s8109_s15 + $0x98] sm:$0xff] }
 0x109   :  { %411 = vmatmul.mubr.f32.gmra.mrb[18].mxu1 %v209_v59  ;;  %v641_v59 = vld [vmem:[%s8109_s15 + $0x60] sm:$0xff] }
 0x1cb   :  { %v388_v1 = vpop.f32.mrb[10].mxu1 }
 0x1cc   :  { %v390_v2 = vpop.f32.mrb[11].mxu1  ;;  %v417_v3 = vmul.f32 0.2, %v388_v1 }
 0x1cd   :  { %v418_v4 = vmul.f32 0.2, %v390_v2 }
 0x1ce   :  { %v427_v9 = vmax.f32 %v388_v1, %v417_v3  ;;  %v3907_v1 = vpack.c.bf16 %v643_v60, %v641_v59  ;;  %v645_v3 = vld [vmem:[%s8109_s15 + $0x80] sm:$0xff]  ;;  %v684_v59 = vld [vmem:[%s8109_s15 + $0x1b8] sm:$0xff] }
 0x1cf   :  { %v428_v11 = vmax.f32 %v390_v2, %v418_v4  ;;  %v3909_v2 = vpack.c.bf16 %v648_v62, %v646_v61  ;;  %v647_v4 = vld [vmem:[%s8109_s15 + $0x90] sm:$0xff]  ;;  %v681_v62 = vld [vmem:[%s8109_s15 + $0x1a0] sm:$0xff] }
 0x1d0   :  { %v394_v5 = vpop.f32.mrb[12].mxu1 }
 0x1d1   :  { %v419_v6 = vmul.f32 0.2, %v394_v5  ;;  %v396_v7 = vpop.f32.mrb[13].mxu1 }
 0x1d2   :  { %v420_v8 = vmul.f32 0.2, %v396_v7 }
 0x1d3   :  { %v429_v10 = vmax.f32 %v394_v5, %v419_v6  ;;  %v650_v5 = vld [vmem:[%s8109_s15 + $0xa8] sm:$0xff]  ;;  %v652_v6 = vld [vmem:[%s8109_s15 + $0xb8] sm:$0xff] }
 0x1d4   :  { %v430_v12 = vmax.f32 %v396_v7, %v420_v8  ;;  %v400_v13 = vpop.f32.mrb[14].mxu1  ;;  %v441_v7 = vld [vmem:[%s8110_s16 + $0x20] sm:$0xff]  ;;  %v3911_v8 = vpack.c.bf16 %v647_v4, %v645_v3 }
 0x1d5   :  { %v402_v14 = vpop.f32.mrb[15].mxu1  ;;  %v3887_v15 = vpack.c.bf16 %v429_v10, %v427_v9  ;;  %v421_v17 = vmul.f32 0.2, %v400_v13  ;;  %v3913_v9 = vpack.c.bf16 %v652_v6, %v650_v5  ;;  %v649_v10 = vld [vmem:[%s8109_s15 + $0xa0] sm:$0xff]  ;;  %v687_v6 = vld [vmem:[%s8109_s15 + $0x1d0] sm:$0xff] }
 0x1d6   :  { %v3885_v16 = vpack.c.bf16 %v430_v12, %v428_v11  ;;  %v422_v18 = vmul.f32 0.2, %v402_v14  ;;  %v651_v11 = vld [vmem:[%s8109_s15 + $0xb0] sm:$0xff]  ;;  %v654_v12 = vld [vmem:[%s8109_s15 + $0xc8] sm:$0xff]  ;;  %v685_v5 = vld [vmem:[%s8109_s15 + $0x1c0] sm:$0xff] }
 0x1d7   :  { %v431_v23 = vmax.f32 %v400_v13, %v421_v17  ;;  %v656_v13 = vld [vmem:[%s8109_s15 + $0xd8] sm:$0xff]  ;;  %v653_v17 = vld [vmem:[%s8109_s15 + $0xc0] sm:$0xff] }
 0x1d8   :  { %v406_v19 = vpop.f32.mrb[16].mxu1  ;;  %3886 = vmatprep.subr.bf16.mxu0 %v3885_v16  ;;  %v432_v25 = vmax.f32 %v402_v14, %v422_v18  ;;  %v442_v14 = vld [vmem:[%s8110_s16 + $0x28] sm:$0xff]  ;;  %v3917_v16 = vpack.c.bf16 %v656_v13, %v654_v12  ;;  %v655_v18 = vld [vmem:[%s8109_s15 + $0xd0] sm:$0xff] }
 0x1d9   :  { %v423_v20 = vmul.f32 0.2, %v406_v19  ;;  %v408_v21 = vpop.f32.mrb[17].mxu1  ;;  %3888 = vmatpush1.bf16.msra.mxu0 %v3887_v15  ;;  %v3915_v15 = vpack.c.bf16 %v651_v11, %v649_v10  ;;  %v689_v11 = vld [vmem:[%s8109_s15 + $0x1e0] sm:$0xff]  ;;  %v691_v12 = vld [vmem:[%s8109_s15 + $0x1f0] sm:$0xff] }
 0x1da   :  { %v424_v22 = vmul.f32 0.2, %v408_v21  ;;  %v3955_v13 = vpack.c.bf16 %v691_v12, %v689_v11 }
 0x1db   :  { %v433_v24 = vmax.f32 %v406_v19, %v423_v20  ;;  %v658_v19 = vld [vmem:[%s8109_s15 + $0xe8] sm:$0xff]  ;;  %v660_v20 = vld [vmem:[%s8109_s15 + $0xf8] sm:$0xff] }
 0x1dc   :  { %v434_v26 = vmax.f32 %v408_v21, %v424_v22  ;;  %v412_v27 = vpop.f32.mrb[18].mxu1  ;;  %v443_v21 = vld [vmem:[%s8110_s16 + $0x30] sm:$0xff]  ;;  %v3919_v22 = vpack.c.bf16 %v655_v18, %v653_v17  ;;  %v693_v17 = vld [vmem:[%s8109_s15 + $0x200] sm:$0xff] }
 0x1dd   :  { %v3891_v28 = vpack.c.bf16 %v433_v24, %v431_v23  ;;  %v414_v29 = vpop.f32.mrb[19].mxu1  ;;  %v425_v32 = vmul.f32 0.2, %v412_v27  ;;  %v3921_v23 = vpack.c.bf16 %v660_v20, %v658_v19  ;;  %v657_v24 = vld [vmem:[%s8109_s15 + $0xe0] sm:$0xff]  ;;  %v695_v18 = vld [vmem:[%s8109_s15 + $0x210] sm:$0xff]  ;;  %v698_v19 = vld [vmem:[%s8109_s15 + $0x228] sm:$0xff] }
 0x1de   :  { %v3889_v30 = vpack.c.bf16 %v434_v26, %v432_v25  ;;  %v426_v31 = vmul.f32 0.2, %v414_v29  ;;  %v659_v25 = vld [vmem:[%s8109_s15 + $0xf0] sm:$0xff]  ;;  %v662_v26 = vld [vmem:[%s8109_s15 + $0x108] sm:$0xff]  ;;  %v700_v20 = vld [vmem:[%s8109_s15 + $0x238] sm:$0xff] }
 0x1df   :  { %v435_v41 = vmax.f32 %v412_v27, %v425_v32  ;;  %v664_v27 = vld [vmem:[%s8109_s15 + $0x118] sm:$0xff]  ;;  %v663_v32 = vld [vmem:[%s8109_s15 + $0x110] sm:$0xff] }
 0x1e0   :  { %v436_v35 = vmax.f32 %v414_v29, %v426_v31  ;;  %3890 = vmatprep.subr.bf16.mxu0 %v3889_v30  ;;  %v3923_v29 = vpack.c.bf16 %v659_v25, %v657_v24  ;;  %v3925_v30 = vpack.c.bf16 %v664_v27, %v662_v26  ;;  %v661_v31 = vld [vmem:[%s8109_s15 + $0x100] sm:$0xff]  ;;  %v3961_v24 = vpack.c.bf16 %v700_v20, %v698_v19  ;;  %v699_v26 = vld [vmem:[%s8109_s15 + $0x230] sm:$0xff]  ;;  %v702_v27 = vld [vmem:[%s8109_s15 + $0x248] sm:$0xff] }
 0x1e1   :  { %3892 = vmatpush1.bf16.msra.mxu0 %v3891_v28  ;;  %v444_v28 = vld [vmem:[%s8110_s16 + $0x38] sm:$0xff]  ;;  %v3927_v36 = vpack.c.bf16 %v663_v32, %v661_v31  ;;  %v697_v25 = vld [vmem:[%s8109_s15 + $0x220] sm:$0xff] }
 0x1e2   :  { %482 = vmatprep.subr.mxu0 %v436_v35  ;;  %v445_v35 = vld [vmem:[%s8110_s16 + $0x40] sm:$0xff] }
 0x1e3   :  { %v701_v32 = vld [vmem:[%s8109_s15 + $0x240] sm:$0xff] }
 0x1e5   :  { %483 = vmatpush1.msra.mxu0 %v435_v41  ;;  %v672_v41 = vld [vmem:[%s8109_s15 + $0x158] sm:$0xff] }
 0x1e6   :  { %3527 = vmatmul.mubr.msk.f32.vlgmr.msra.gmra.mrb[0].mxu0 %vm446_vm1, %v437_v42  ;;  %3894 = vmatprep.subr.bf16.mxu0 %v3893_v40  ;;  %v670_v40 = vld [vmem:[%s8109_s15 + $0x148] sm:$0xff]  ;;  %v3931_v42 = vpack.c.bf16 %v667_v39, %v665_v38 }
 0x1e7   :  { %544 = vmatprep.mubr.f32.mxu0 %v4896_v0  ;;  %3896 = vmatpush1.bf16.msra.mxu0 %v3895_v43  ;;  %v3933_v43 = vpack.c.bf16 %v672_v41, %v670_v40  ;;  %v705_v40 = vld [vmem:[%s8109_s15 + $0x260] sm:$0xff]  ;;  %v707_v41 = vld [vmem:[%s8109_s15 + $0x270] sm:$0xff] }
 0x1e8   :  { %3898 = vmatprep.subr.bf16.mxu0 %v3897_v44  ;;  %v669_v44 = vld [vmem:[%s8109_s15 + $0x140] sm:$0xff] }
 0x1e9   :  { %v3935_v48 = vpack.c.bf16 %v671_v45, %v669_v44  ;;  %v712_v44 = vld [vmem:[%s8109_s15 + $0x298] sm:$0xff]  ;;  %v709_v45 = vld [vmem:[%s8109_s15 + $0x280] sm:$0xff] }
 0x1ea   :  { %3528 = vmatmul.mubr.msk.f32.gmra.mrb[2].mxu0 %vm446_vm1, %v438_v49  ;;  %v3937_v49 = vpack.c.bf16 %v676_v47, %v674_v46  ;;  %v711_v46 = vld [vmem:[%s8109_s15 + $0x290] sm:$0xff]  ;;  %v3971_v47 = vpack.c.bf16 %v707_v41, %v705_v40  ;;  %v734_v40 = vld [vmem:[%s8109_s15 + $0x348] sm:$0xff]  ;;  %v736_v41 = vld [vmem:[%s8109_s15 + $0x358] sm:$0xff] }
 0x1eb   :  { %550 = vmatprep.mubr.f32.mxu0 %v4896_v0  ;;  %3900 = vmatpush1.bf16.msra.mxu0 %v3899_v50  ;;  %v673_v50 = vld [vmem:[%s8109_s15 + $0x160] sm:$0xff] }
 0x1ec   :  { %3902 = vmatprep.subr.bf16.mxu0 %v3901_v51  ;;  %v675_v51 = vld [vmem:[%s8109_s15 + $0x170] sm:$0xff] }
 0x1ed   :  { %v3939_v54 = vpack.c.bf16 %v675_v51, %v673_v50  ;;  %v1124_v50 = vld [vmem:[%s8111_s25 + $0x80] sm:$0xff]  ;;  %v1125_v51 = vld [vmem:[%s8111_s25 + $0x88] sm:$0xff] }
 0x1ee   :  { %3529 = vmatmul.mubr.msk.f32.gmra.mrb[4].mxu0 %vm446_vm1, %v439_v56  ;;  %v677_v56 = vld [vmem:[%s8109_s15 + $0x180] sm:$0xff] }
 0x1ef   :  { %556 = vmatprep.mubr.f32.mxu0 %v4896_v0  ;;  %3904 = vmatpush1.bf16.msra.mxu0 %v3903_v57  ;;  %v679_v57 = vld [vmem:[%s8109_s15 + $0x190] sm:$0xff] }
 0x1f0   :  { %3906 = vmatprep.subr.bf16.mxu0 %v3905_v58  ;;  %v682_v58 = vld [vmem:[%s8109_s15 + $0x1a8] sm:$0xff]  ;;  %v3943_v60 = vpack.c.bf16 %v679_v57, %v677_v56  ;;  %v1126_v57 = vld [vmem:[%s8111_s25 + $0x90] sm:$0xff] }
 0x1f1   :  { %v3945_v61 = vpack.c.bf16 %v684_v59, %v682_v58  ;;  %v1109_v56 = vld [vmem:[%s8111_s25 + $0x8] sm:$0xff]  ;;  %v1127_v58 = vld [vmem:[%s8111_s25 + $0x98] sm:$0xff] }
 0x1f2   :  { %3530 = vmatmul.mubr.msk.f32.gmra.mrb[6].mxu0 %vm446_vm1, %v440_v63  ;;  %v683_v63 = vld [vmem:[%s8109_s15 + $0x1b0] sm:$0xff]  ;;  %v716_v59 = vld [vmem:[%s8109_s15 + $0x2b8] sm:$0xff] }
 0x1f3   :  { %562 = vmatprep.mubr.f32.mxu0 %v4896_v0  ;;  %3908 = vmatpush1.bf16.msra.mxu0 %v3907_v1  ;;  %v686_v1 = vld [vmem:[%s8109_s15 + $0x1c8] sm:$0xff]  ;;  %v3947_v3 = vpack.c.bf16 %v683_v63, %v681_v62  ;;  %v1110_v62 = vld [vmem:[%s8111_s25 + $0x10] sm:$0xff]  ;;  %v1111_v63 = vld [vmem:[%s8111_s25 + $0x18] sm:$0xff] }
 0x1f4   :  { %3910 = vmatprep.subr.bf16.mxu0 %v3909_v2  ;;  %v688_v2 = vld [vmem:[%s8109_s15 + $0x1d8] sm:$0xff] }
 0x1f5   :  { %v3949_v4 = vpack.c.bf16 %v688_v2, %v686_v1  ;;  %v3975_v1 = vpack.c.bf16 %v711_v46, %v709_v45  ;;  %v735_v45 = vld [vmem:[%s8109_s15 + $0x350] sm:$0xff]  ;;  %v738_v46 = vld [vmem:[%s8109_s15 + $0x368] sm:$0xff] }
 0x1f6   :  { %3531 = vmatmul.mubr.msk.f32.gmra.mrb[8].mxu0 %vm446_vm1, %v441_v7  ;;  %v690_v7 = vld [vmem:[%s8109_s15 + $0x1e8] sm:$0xff] }
 0x1f7   :  { %568 = vmatprep.mubr.f32.mxu0 %v4896_v0  ;;  %3912 = vmatpush1.bf16.msra.mxu0 %v3911_v8  ;;  %v692_v8 = vld [vmem:[%s8109_s15 + $0x1f8] sm:$0xff] }
 0x1f8   :  { %3914 = vmatprep.subr.bf16.mxu0 %v3913_v9  ;;  %v3951_v9 = vpack.c.bf16 %v687_v6, %v685_v5  ;;  %v3953_v10 = vpack.c.bf16 %v692_v8, %v690_v7  ;;  %v713_v5 = vld [vmem:[%s8109_s15 + $0x2a0] sm:$0xff]  ;;  %v715_v6 = vld [vmem:[%s8109_s15 + $0x2b0] sm:$0xff]  ;;  %v718_v8 = vld [vmem:[%s8109_s15 + $0x2c8] sm:$0xff] }
 0x1fa   :  { %3532 = vmatmul.mubr.msk.f32.gmra.mrb[10].mxu0 %vm446_vm1, %v442_v14  ;;  %v694_v14 = vld [vmem:[%s8109_s15 + $0x208] sm:$0xff] }
 0x1fb   :  { %574 = vmatprep.mubr.f32.mxu0 %v4896_v0  ;;  %3916 = vmatpush1.bf16.msra.mxu0 %v3915_v15  ;;  %v696_v15 = vld [vmem:[%s8109_s15 + $0x218] sm:$0xff] }
 0x1fc   :  { %3918 = vmatprep.subr.bf16.mxu0 %v3917_v16  ;;  %v3957_v16 = vpack.c.bf16 %v696_v15, %v694_v14  ;;  %v719_v14 = vld [vmem:[%s8109_s15 + $0x2d0] sm:$0xff] }
 0x1fe   :  { %3533 = vmatmul.mubr.msk.f32.gmra.mrb[12].mxu0 %vm446_vm1, %v443_v21 }
 0x1ff   :  { %580 = vmatprep.mubr.f32.mxu0 %v4896_v0  ;;  %3920 = vmatpush1.bf16.msra.mxu0 %v3919_v22  ;;  %v3959_v22 = vpack.c.bf16 %v695_v18, %v693_v17  ;;  %v724_v17 = vld [vmem:[%s8109_s15 + $0x2f8] sm:$0xff] }
 0x200   :  { %3922 = vmatprep.subr.bf16.mxu0 %v3921_v23 }
 0x202   :  { %3534 = vmatmul.mubr.msk.f32.gmra.mrb[14].mxu0 %vm446_vm1, %v444_v28  ;;  %v704_v28 = vld [vmem:[%s8109_s15 + $0x258] sm:$0xff] }
 0x203   :  { %586 = vmatprep.mubr.f32.mxu0 %v4896_v0  ;;  %3924 = vmatpush1.bf16.msra.mxu0 %v3923_v29  ;;  %v3963_v29 = vpack.c.bf16 %v699_v26, %v697_v25  ;;  %v3965_v31 = vpack.c.bf16 %v704_v28, %v702_v27  ;;  %v728_v25 = vld [vmem:[%s8109_s15 + $0x318] sm:$0xff] }
 0x204   :  { %3926 = vmatprep.subr.bf16.mxu0 %v3925_v30 }
 0x206   :  { %3535 = vmatmul.mubr.msk.f32.gmra.mrb[16].mxu0 %vm446_vm1, %v445_v35  ;;  %v706_v35 = vld [vmem:[%s8109_s15 + $0x268] sm:$0xff] }
 0x207   :  { %3928 = vmatpush1.bf16.msra.mxu0 %v3927_v36  ;;  %v708_v36 = vld [vmem:[%s8109_s15 + $0x278] sm:$0xff] }
 0x208   :  { %3930 = vmatprep.subr.bf16.mxu0 %v3929_v37  ;;  %v3967_v37 = vpack.c.bf16 %v703_v33, %v701_v32  ;;  %v3969_v39 = vpack.c.bf16 %v708_v36, %v706_v35  ;;  %v730_v32 = vld [vmem:[%s8109_s15 + $0x328] sm:$0xff]  ;;  %v732_v33 = vld [vmem:[%s8109_s15 + $0x338] sm:$0xff] }
 0x209   :  { %v3993_v36 = vpack.c.bf16 %v732_v33, %v730_v32  ;;  %v762_v32 = vld [vmem:[%s8109_s15 + $0x428] sm:$0xff]  ;;  %v764_v33 = vld [vmem:[%s8109_s15 + $0x438] sm:$0xff] }
 0x20b   :  { %3932 = vmatpush1.bf16.msra.mxu0 %v3931_v42 }
 0x20c   :  { %3934 = vmatprep.subr.bf16.mxu0 %v3933_v43  ;;  %v710_v43 = vld [vmem:[%s8109_s15 + $0x288] sm:$0xff] }
 0x20d   :  { %v3973_v53 = vpack.c.bf16 %v712_v44, %v710_v43  ;;  %v3997_v43 = vpack.c.bf16 %v736_v41, %v734_v40  ;;  %v733_v44 = vld [vmem:[%s8109_s15 + $0x340] sm:$0xff]  ;;  %v766_v40 = vld [vmem:[%s8109_s15 + $0x448] sm:$0xff]  ;;  %v768_v41 = vld [vmem:[%s8109_s15 + $0x458] sm:$0xff] }
 0x20f   :  { %3936 = vmatpush1.bf16.msra.mxu0 %v3935_v48  ;;  %v714_v48 = vld [vmem:[%s8109_s15 + $0x2a8] sm:$0xff] }
 0x210   :  { %3938 = vmatprep.subr.bf16.mxu0 %v3937_v49 }
 0x213   :  { %3940 = vmatpush1.bf16.msra.mxu0 %v3939_v54 }
 0x214   :  { %3942 = vmatprep.subr.bf16.mxu0 %v3941_v55  ;;  %v5584_v55 = vpack.c.bf16 %v1125_v51, %v1124_v50  ;;  %v737_v51 = vld [vmem:[%s8109_s15 + $0x360] sm:$0xff] }
 0x216   :  { %4086 = vmatprep.subr.bf16.mxu1 %v5584_v55 }
 0x217   :  { %3944 = vmatpush1.bf16.msra.mxu0 %v3943_v60  ;;  %v5598_v60 = vpack.c.bf16 %v1109_v56, %v1108_v52  ;;  %v739_v52 = vld [vmem:[%s8109_s15 + $0x370] sm:$0xff] }
 0x218   :  { %3946 = vmatprep.subr.bf16.mxu0 %v3945_v61  ;;  %v5600_v61 = vpack.c.bf16 %v1127_v58, %v1126_v57  ;;  %v4003_v56 = vpack.c.bf16 %v739_v52, %v737_v51  ;;  %v741_v58 = vld [vmem:[%s8109_s15 + $0x380] sm:$0xff]  ;;  %v774_v51 = vld [vmem:[%s8109_s15 + $0x488] sm:$0xff] }
 0x219   :  { %4088 = vmatpush3.bf16.msra.mxu1 %v5598_v60 }
 0x21a   :  { %4090 = vmatprep.subr.bf16.mxu1 %v5600_v61 }
 0x21b   :  { %3948 = vmatpush1.bf16.msra.mxu0 %v3947_v3  ;;  %v5612_v3 = vpack.c.bf16 %v1111_v63, %v1110_v62  ;;  %v746_v62 = vld [vmem:[%s8109_s15 + $0x3a8] sm:$0xff]  ;;  %v748_v63 = vld [vmem:[%s8109_s15 + $0x3b8] sm:$0xff] }
 0x21c   :  { %3950 = vmatprep.subr.bf16.mxu0 %v3949_v4  ;;  %v3977_v4 = vpack.c.bf16 %v716_v59, %v714_v48  ;;  %v3999_v48 = vpack.c.bf16 %v735_v45, %v733_v44  ;;  %v743_v59 = vld [vmem:[%s8109_s15 + $0x390] sm:$0xff]  ;;  %v765_v44 = vld [vmem:[%s8109_s15 + $0x440] sm:$0xff] }
 0x21d   :  { %4092 = vmatpush3.bf16.msra.mxu1 %v5612_v3  ;;  %v767_v45 = vld [vmem:[%s8109_s15 + $0x450] sm:$0xff] }
 0x21f   :  { %3952 = vmatpush1.bf16.msra.mxu0 %v3951_v9  ;;  %v720_v9 = vld [vmem:[%s8109_s15 + $0x2d8] sm:$0xff] }
 0x220   :  { %3954 = vmatprep.subr.bf16.mxu0 %v3953_v10  ;;  %v3979_v10 = vpack.c.bf16 %v715_v6, %v713_v5  ;;  %v3981_v12 = vpack.c.bf16 %v720_v9, %v718_v8  ;;  %v745_v5 = vld [vmem:[%s8109_s15 + $0x3a0] sm:$0xff]  ;;  %v747_v6 = vld [vmem:[%s8109_s15 + $0x3b0] sm:$0xff]  ;;  %v750_v8 = vld [vmem:[%s8109_s15 + $0x3c8] sm:$0xff] }
 0x221   :  { %v752_v9 = vld [vmem:[%s8109_s15 + $0x3d8] sm:$0xff] }
 0x223   :  { %3956 = vmatpush1.bf16.msra.mxu0 %v3955_v13  ;;  %v717_v13 = vld [vmem:[%s8109_s15 + $0x2c0] sm:$0xff] }
 0x224   :  { %3958 = vmatprep.subr.bf16.mxu0 %v3957_v16  ;;  %v722_v16 = vld [vmem:[%s8109_s15 + $0x2e8] sm:$0xff]  ;;  %v3983_v18 = vpack.c.bf16 %v719_v14, %v717_v13  ;;  %v749_v13 = vld [vmem:[%s8109_s15 + $0x3c0] sm:$0xff]  ;;  %v751_v14 = vld [vmem:[%s8109_s15 + $0x3d0] sm:$0xff] }
 0x225   :  { %v3985_v20 = vpack.c.bf16 %v724_v17, %v722_v16  ;;  %v754_v16 = vld [vmem:[%s8109_s15 + $0x3e8] sm:$0xff]  ;;  %v756_v17 = vld [vmem:[%s8109_s15 + $0x3f8] sm:$0xff] }
 0x2b9   :  { %v540_v21 = vpop.f32.mrb[0].mxu0 }
 0x2ba   :  { %v542_v23 = vpop.f32.mrb[1].mxu0 }
 0x2bb   :  { %885 = vmatprep.mubr.f32.mxu0 %v542_v23 }
 0x2bc   :  { %886 = vmatmul.mubr.f32.vlgmr.msra.gmra.mrb[18].mxu0 %v540_v21  ;;  %v721_v21 = vld [vmem:[%s8109_s15 + $0x2e0] sm:$0xff] }
 0x2bd   :  { %3960 = vmatpush1.bf16.msra.mxu0 %v3959_v22  ;;  %v546_v30 = vpop.f32.mrb[2].mxu0  ;;  %v723_v22 = vld [vmem:[%s8109_s15 + $0x2f0] sm:$0xff] }
 0x2be   :  { %3962 = vmatprep.subr.bf16.mxu0 %v3961_v24  ;;  %v548_v34 = vpop.f32.mrb[3].mxu0  ;;  %v726_v24 = vld [vmem:[%s8109_s15 + $0x308] sm:$0xff]  ;;  %v3987_v26 = vpack.c.bf16 %v723_v22, %v721_v21  ;;  %v753_v21 = vld [vmem:[%s8109_s15 + $0x3e0] sm:$0xff]  ;;  %v755_v22 = vld [vmem:[%s8109_s15 + $0x3f0] sm:$0xff] }
 0x2bf   :  { %891 = vmatprep.mubr.f32.mxu0 %v548_v34  ;;  %v3989_v28 = vpack.c.bf16 %v728_v25, %v726_v24  ;;  %v758_v24 = vld [vmem:[%s8109_s15 + $0x408] sm:$0xff]  ;;  %v760_v25 = vld [vmem:[%s8109_s15 + $0x418] sm:$0xff] }
 0x2c0   :  { %892 = vmatmul.mubr.f32.gmra.mrb[20].mxu0 %v546_v30  ;;  %v727_v30 = vld [vmem:[%s8109_s15 + $0x310] sm:$0xff] }
 0x2c1   :  { %3964 = vmatpush1.bf16.msra.mxu0 %v3963_v29  ;;  %v552_v38 = vpop.f32.mrb[4].mxu0  ;;  %v725_v29 = vld [vmem:[%s8109_s15 + $0x300] sm:$0xff] }
 0x2c2   :  { %3966 = vmatprep.subr.bf16.mxu0 %v3965_v31  ;;  %v554_v42 = vpop.f32.mrb[5].mxu0  ;;  %v3991_v34 = vpack.c.bf16 %v727_v30, %v725_v29  ;;  %v757_v29 = vld [vmem:[%s8109_s15 + $0x400] sm:$0xff]  ;;  %v759_v30 = vld [vmem:[%s8109_s15 + $0x410] sm:$0xff] }
 0x2c3   :  { %897 = vmatprep.mubr.f32.mxu0 %v554_v42 }
 0x2c4   :  { %898 = vmatmul.mubr.f32.gmra.mrb[22].mxu0 %v552_v38  ;;  %v731_v38 = vld [vmem:[%s8109_s15 + $0x330] sm:$0xff] }
 0x2c5   :  { %3968 = vmatpush1.bf16.msra.mxu0 %v3967_v37  ;;  %v5573_v49 = vpop.f32.mrb[6].mxu0  ;;  %v729_v37 = vld [vmem:[%s8109_s15 + $0x320] sm:$0xff] }
 0x2c6   :  { %3970 = vmatprep.subr.bf16.mxu0 %v3969_v39  ;;  %v560_v54 = vpop.f32.mrb[7].mxu0  ;;  %v3995_v42 = vpack.c.bf16 %v731_v38, %v729_v37  ;;  %v761_v37 = vld [vmem:[%s8109_s15 + $0x420] sm:$0xff]  ;;  %v763_v38 = vld [vmem:[%s8109_s15 + $0x430] sm:$0xff] }
 0x2c7   :  { %968 = vmatprep.mubr.f32.mxu0 %v560_v54  ;;  %v744_v54 = vld [vmem:[%s8109_s15 + $0x398] sm:$0xff] }
 0x2c9   :  { %3972 = vmatpush1.bf16.msra.mxu0 %v3971_v47  ;;  %v5609_v2 = vpop.f32.mrb[8].mxu0  ;;  %v740_v47 = vld [vmem:[%s8109_s15 + $0x378] sm:$0xff] }
 0x2ca   :  { %3974 = vmatprep.subr.bf16.mxu0 %v3973_v53  ;;  %v5620_v7 = vpop.f32.mrb[9].mxu0  ;;  %v4001_v50 = vpack.c.bf16 %v740_v47, %v738_v46  ;;  %v742_v53 = vld [vmem:[%s8109_s15 + $0x388] sm:$0xff] }
 0x2cb   :  { %v4005_v57 = vpack.c.bf16 %v744_v54, %v742_v53  ;;  %v770_v46 = vld [vmem:[%s8109_s15 + $0x468] sm:$0xff]  ;;  %v773_v53 = vld [vmem:[%s8109_s15 + $0x480] sm:$0xff]  ;;  %v775_v54 = vld [vmem:[%s8109_s15 + $0x490] sm:$0xff] }
 0x2cd   :  { %3976 = vmatpush1.bf16.msra.mxu0 %v3975_v1  ;;  %v5629_v11 = vpop.f32.mrb[10].mxu0  ;;  %v4007_v1 = vpack.c.bf16 %v743_v59, %v741_v58  ;;  %v777_v58 = vld [vmem:[%s8109_s15 + $0x4a0] sm:$0xff]  ;;  %v779_v59 = vld [vmem:[%s8109_s15 + $0x4b0] sm:$0xff] }
 0x2ce   :  { %3978 = vmatprep.subr.bf16.mxu0 %v3977_v4  ;;  %v5638_v15 = vpop.f32.mrb[11].mxu0  ;;  %v4009_v4 = vpack.c.bf16 %v748_v63, %v746_v62  ;;  %v782_v62 = vld [vmem:[%s8109_s15 + $0x4c8] sm:$0xff]  ;;  %v784_v63 = vld [vmem:[%s8109_s15 + $0x4d8] sm:$0xff] }
 0x2d1   :  { %3980 = vmatpush1.bf16.msra.mxu0 %v3979_v10  ;;  %v5646_v19 = vpop.f32.mrb[12].mxu0  ;;  %v4011_v10 = vpack.c.bf16 %v747_v6, %v745_v5  ;;  %v781_v5 = vld [vmem:[%s8109_s15 + $0x4c0] sm:$0xff]  ;;  %v783_v6 = vld [vmem:[%s8109_s15 + $0x4d0] sm:$0xff] }
 0x2d2   :  { %3982 = vmatprep.subr.bf16.mxu0 %v3981_v12  ;;  %v5654_v23 = vpop.f32.mrb[13].mxu0  ;;  %v4013_v12 = vpack.c.bf16 %v752_v9, %v750_v8  ;;  %v786_v8 = vld [vmem:[%s8109_s15 + $0x4e8] sm:$0xff]  ;;  %v788_v9 = vld [vmem:[%s8109_s15 + $0x4f8] sm:$0xff] }
 0x2d5   :  { %3984 = vmatpush1.bf16.msra.mxu0 %v3983_v18  ;;  %v5662_v27 = vpop.f32.mrb[14].mxu0  ;;  %v4015_v18 = vpack.c.bf16 %v751_v14, %v749_v13  ;;  %v785_v13 = vld [vmem:[%s8109_s15 + $0x4e0] sm:$0xff]  ;;  %v787_v14 = vld [vmem:[%s8109_s15 + $0x4f0] sm:$0xff] }
 0x2d6   :  { %3986 = vmatprep.subr.bf16.mxu0 %v3985_v20  ;;  %v5670_v31 = vpop.f32.mrb[15].mxu0  ;;  %v4017_v20 = vpack.c.bf16 %v756_v17, %v754_v16  ;;  %v790_v16 = vld [vmem:[%s8109_s15 + $0x508] sm:$0xff]  ;;  %v792_v17 = vld [vmem:[%s8109_s15 + $0x518] sm:$0xff] }
 0x2d9   :  { %3988 = vmatpush1.bf16.msra.mxu0 %v3987_v26  ;;  %v5678_v35 = vpop.f32.mrb[16].mxu0  ;;  %v4019_v26 = vpack.c.bf16 %v755_v22, %v753_v21  ;;  %v789_v21 = vld [vmem:[%s8109_s15 + $0x500] sm:$0xff]  ;;  %v791_v22 = vld [vmem:[%s8109_s15 + $0x510] sm:$0xff] }
 0x2da   :  { %3990 = vmatprep.subr.bf16.mxu0 %v3989_v28  ;;  %v5686_v39 = vpop.f32.mrb[17].mxu0  ;;  %v4021_v28 = vpack.c.bf16 %v760_v25, %v758_v24  ;;  %v794_v24 = vld [vmem:[%s8109_s15 + $0x528] sm:$0xff]  ;;  %v796_v25 = vld [vmem:[%s8109_s15 + $0x538] sm:$0xff] }
 0x2dd   :  { %3992 = vmatpush1.bf16.msra.mxu0 %v3991_v34  ;;  %v4023_v34 = vpack.c.bf16 %v759_v30, %v757_v29  ;;  %v793_v29 = vld [vmem:[%s8109_s15 + $0x520] sm:$0xff]  ;;  %v795_v30 = vld [vmem:[%s8109_s15 + $0x530] sm:$0xff] }
 0x2de   :  { %3994 = vmatprep.subr.bf16.mxu0 %v3993_v36  ;;  %v4025_v36 = vpack.c.bf16 %v764_v33, %v762_v32  ;;  %v798_v32 = vld [vmem:[%s8109_s15 + $0x548] sm:$0xff]  ;;  %v800_v33 = vld [vmem:[%s8109_s15 + $0x558] sm:$0xff] }
 0x2e1   :  { %3996 = vmatpush1.bf16.msra.mxu0 %v3995_v42  ;;  %v4027_v42 = vpack.c.bf16 %v763_v38, %v761_v37  ;;  %v797_v37 = vld [vmem:[%s8109_s15 + $0x540] sm:$0xff]  ;;  %v799_v38 = vld [vmem:[%s8109_s15 + $0x550] sm:$0xff] }
 0x2e2   :  { %3998 = vmatprep.subr.bf16.mxu0 %v3997_v43  ;;  %v4029_v43 = vpack.c.bf16 %v768_v41, %v766_v40  ;;  %v802_v40 = vld [vmem:[%s8109_s15 + $0x568] sm:$0xff]  ;;  %v804_v41 = vld [vmem:[%s8109_s15 + $0x578] sm:$0xff] }
 0x2e5   :  { %4000 = vmatpush1.bf16.msra.mxu0 %v3999_v48  ;;  %v769_v48 = vld [vmem:[%s8109_s15 + $0x460] sm:$0xff] }
 0x2e6   :  { %4002 = vmatprep.subr.bf16.mxu0 %v4001_v50  ;;  %v771_v50 = vld [vmem:[%s8109_s15 + $0x470] sm:$0xff] }
 0x2e9   :  { %4004 = vmatpush1.bf16.msra.mxu0 %v4003_v56  ;;  %v778_v56 = vld [vmem:[%s8109_s15 + $0x4a8] sm:$0xff] }
 0x2ea   :  { %4006 = vmatprep.subr.bf16.mxu0 %v4005_v57 }
 0x2ed   :  { %4008 = vmatpush1.bf16.msra.mxu0 %v4007_v1  ;;  %v4043_v1 = vpack.c.bf16 %v779_v59, %v777_v58  ;;  %v813_v58 = vld [vmem:[%s8109_s15 + $0x5c0] sm:$0xff]  ;;  %v815_v59 = vld [vmem:[%s8109_s15 + $0x5d0] sm:$0xff] }
 0x2ee   :  { %4010 = vmatprep.subr.bf16.mxu0 %v4009_v4  ;;  %v4045_v4 = vpack.c.bf16 %v784_v63, %v782_v62  ;;  %v818_v62 = vld [vmem:[%s8109_s15 + $0x5e8] sm:$0xff]  ;;  %v820_v63 = vld [vmem:[%s8109_s15 + $0x5f8] sm:$0xff] }
 0x2f1   :  { %4012 = vmatpush1.bf16.msra.mxu0 %v4011_v10  ;;  %v4047_v10 = vpack.c.bf16 %v783_v6, %v781_v5  ;;  %v817_v5 = vld [vmem:[%s8109_s15 + $0x5e0] sm:$0xff]  ;;  %v819_v6 = vld [vmem:[%s8109_s15 + $0x5f0] sm:$0xff] }
 0x2f2   :  { %4014 = vmatprep.subr.bf16.mxu0 %v4013_v12  ;;  %v4049_v12 = vpack.c.bf16 %v788_v9, %v786_v8  ;;  %v4083_v8 = vpack.c.bf16 %v819_v6, %v817_v5  ;;  %v1128_v9 = vld [vmem:[%s8111_s25 + $0xa0] sm:$0xff] }
 0x2f5   :  { %4016 = vmatpush1.bf16.msra.mxu0 %v4015_v18  ;;  %v4051_v18 = vpack.c.bf16 %v787_v14, %v785_v13  ;;  %v1114_v14 = vld [vmem:[%s8111_s25 + $0x30] sm:$0xff] }
 0x2f6   :  { %4018 = vmatprep.subr.bf16.mxu0 %v4017_v20  ;;  %v4053_v20 = vpack.c.bf16 %v792_v17, %v790_v16  ;;  %v1115_v16 = vld [vmem:[%s8111_s25 + $0x38] sm:$0xff] }
 0x2f7   :  { %v5995_v17 = vpack.c.bf16 %v1115_v16, %v1114_v14 }
 0x2f9   :  { %4020 = vmatpush1.bf16.msra.mxu0 %v4019_v26  ;;  %v4055_v26 = vpack.c.bf16 %v791_v22, %v789_v21  ;;  %v1116_v22 = vld [vmem:[%s8111_s25 + $0x40] sm:$0xff] }
 0x2fa   :  { %4022 = vmatprep.subr.bf16.mxu0 %v4021_v28  ;;  %v4057_v28 = vpack.c.bf16 %v796_v25, %v794_v24  ;;  %v1117_v24 = vld [vmem:[%s8111_s25 + $0x48] sm:$0xff] }
 0x2fb   :  { %v6013_v25 = vpack.c.bf16 %v1117_v24, %v1116_v22 }
 0x2fc   :  { %969 = vmatmul.mubr.f32.vlgmr.msra.gmra.mrb[18].mxu0 %v5573_v49  ;;  %v772_v49 = vld [vmem:[%s8109_s15 + $0x478] sm:$0xff] }
 0x2fd   :  { %4024 = vmatpush1.bf16.msra.mxu0 %v4023_v34  ;;  %974 = vmatprep.mubr.f32.mxu0 %v5620_v7  ;;  %v4031_v7 = vpack.c.bf16 %v767_v45, %v765_v44  ;;  %v4033_v47 = vpack.c.bf16 %v772_v49, %v770_v46  ;;  %v4059_v34 = vpack.c.bf16 %v795_v30, %v793_v29  ;;  %v801_v44 = vld [vmem:[%s8109_s15 + $0x560] sm:$0xff]  ;;  %v803_v45 = vld [vmem:[%s8109_s15 + $0x570] sm:$0xff]  ;;  %v806_v46 = vld [vmem:[%s8109_s15 + $0x588] sm:$0xff] }
 0x2fe   :  { %4026 = vmatprep.subr.bf16.mxu0 %v4025_v36  ;;  %v4061_v36 = vpack.c.bf16 %v800_v33, %v798_v32  ;;  %v808_v49 = vld [vmem:[%s8109_s15 + $0x598] sm:$0xff]  ;;  %v1118_v30 = vld [vmem:[%s8111_s25 + $0x50] sm:$0xff] }
 0x2ff   :  { %v1119_v32 = vld [vmem:[%s8111_s25 + $0x58] sm:$0xff] }
 0x300   :  { %975 = vmatmul.mubr.f32.gmra.mrb[20].mxu0 %v5609_v2  ;;  %v776_v2 = vld [vmem:[%s8109_s15 + $0x498] sm:$0xff]  ;;  %v6031_v33 = vpack.c.bf16 %v1119_v32, %v1118_v30 }
 0x301   :  { %4028 = vmatpush1.bf16.msra.mxu0 %v4027_v42  ;;  %980 = vmatprep.mubr.f32.mxu0 %v5638_v15  ;;  %v4035_v15 = vpack.c.bf16 %v771_v50, %v769_v48  ;;  %v4037_v52 = vpack.c.bf16 %v776_v2, %v774_v51  ;;  %v4063_v42 = vpack.c.bf16 %v799_v38, %v797_v37  ;;  %v805_v48 = vld [vmem:[%s8109_s15 + $0x580] sm:$0xff]  ;;  %v807_v50 = vld [vmem:[%s8109_s15 + $0x590] sm:$0xff]  ;;  %v810_v51 = vld [vmem:[%s8109_s15 + $0x5a8] sm:$0xff] }
 0x302   :  { %4030 = vmatprep.subr.bf16.mxu0 %v4029_v43  ;;  %v4065_v43 = vpack.c.bf16 %v804_v41, %v802_v40  ;;  %v812_v2 = vld [vmem:[%s8109_s15 + $0x5b8] sm:$0xff]  ;;  %v1120_v38 = vld [vmem:[%s8111_s25 + $0x60] sm:$0xff]  ;;  %v1121_v40 = vld [vmem:[%s8111_s25 + $0x68] sm:$0xff] }
 0x303   :  { %v6049_v41 = vpack.c.bf16 %v1121_v40, %v1120_v38  ;;  %v1297_v38 = vld [vmem:[%s8112_s1 + $0x30] sm:$0xff]  ;;  %v1300_v40 = vld [vmem:[%s8112_s1 + $0x48] sm:$0xff] }
 0x304   :  { %981 = vmatmul.mubr.f32.gmra.mrb[22].mxu0 %v5629_v11  ;;  %v780_v11 = vld [vmem:[%s8109_s15 + $0x4b8] sm:$0xff] }
 0x305   :  { %4032 = vmatpush1.bf16.msra.mxu0 %v4031_v7  ;;  %1051 = vmatprep.mubr.f32.mxu0 %v5654_v23  ;;  %v4039_v23 = vpack.c.bf16 %v775_v54, %v773_v53  ;;  %v4041_v57 = vpack.c.bf16 %v780_v11, %v778_v56  ;;  %v4067_v7 = vpack.c.bf16 %v803_v45, %v801_v44  ;;  %v809_v53 = vld [vmem:[%s8109_s15 + $0x5a0] sm:$0xff]  ;;  %v811_v54 = vld [vmem:[%s8109_s15 + $0x5b0] sm:$0xff]  ;;  %v814_v56 = vld [vmem:[%s8109_s15 + $0x5c8] sm:$0xff] }
 0x306   :  { %4034 = vmatprep.subr.bf16.mxu0 %v4033_v47  ;;  %v4069_v47 = vpack.c.bf16 %v808_v49, %v806_v46  ;;  %v816_v11 = vld [vmem:[%s8109_s15 + $0x5d8] sm:$0xff]  ;;  %v1122_v45 = vld [vmem:[%s8111_s25 + $0x70] sm:$0xff] }
 0x307   :  { %v1123_v46 = vld [vmem:[%s8111_s25 + $0x78] sm:$0xff] }
 0x308   :  { %v6067_v49 = vpack.c.bf16 %v1123_v46, %v1122_v45  ;;  %v1301_v45 = vld [vmem:[%s8112_s1 + $0x50] sm:$0xff] }
 0x309   :  { %4036 = vmatpush1.bf16.msra.mxu0 %v4035_v15  ;;  %v4071_v15 = vpack.c.bf16 %v807_v50, %v805_v48 }
 0x30a   :  { %4038 = vmatprep.subr.bf16.mxu0 %v4037_v52  ;;  %v4073_v52 = vpack.c.bf16 %v812_v2, %v810_v51 }
 0x30d   :  { %4040 = vmatpush1.bf16.msra.mxu0 %v4039_v23  ;;  %v4075_v23 = vpack.c.bf16 %v811_v54, %v809_v53 }
 0x30e   :  { %4042 = vmatprep.subr.bf16.mxu0 %v4041_v57  ;;  %v4077_v57 = vpack.c.bf16 %v816_v11, %v814_v56 }
 0x311   :  { %4044 = vmatpush1.bf16.msra.mxu0 %v4043_v1  ;;  %v4079_v1 = vpack.c.bf16 %v815_v59, %v813_v58 }
 0x312   :  { %4046 = vmatprep.subr.bf16.mxu0 %v4045_v4  ;;  %v4081_v4 = vpack.c.bf16 %v820_v63, %v818_v62 }
 0x315   :  { %4048 = vmatpush1.bf16.msra.mxu0 %v4047_v10  ;;  %v1129_v10 = vld [vmem:[%s8111_s25 + $0xa8] sm:$0xff] }
 0x316   :  { %4050 = vmatprep.subr.bf16.mxu0 %v4049_v12  ;;  %v5969_v12 = vpack.c.bf16 %v1129_v10, %v1128_v9 }
 0x318   :  { %4094 = vmatprep.subr.bf16.mxu1 %v5969_v12 }
 0x319   :  { %4052 = vmatpush1.bf16.msra.mxu0 %v4051_v18  ;;  %v1132_v18 = vld [vmem:[%s8111_s25 + $0xc0] sm:$0xff] }
 0x31a   :  { %4054 = vmatprep.subr.bf16.mxu0 %v4053_v20  ;;  %v1133_v20 = vld [vmem:[%s8111_s25 + $0xc8] sm:$0xff] }
 0x31b   :  { %v6005_v21 = vpack.c.bf16 %v1133_v20, %v1132_v18 }
 0x31d   :  { %4056 = vmatpush1.bf16.msra.mxu0 %v4055_v26  ;;  %v1134_v26 = vld [vmem:[%s8111_s25 + $0xd0] sm:$0xff] }
 0x31e   :  { %4058 = vmatprep.subr.bf16.mxu0 %v4057_v28  ;;  %v1135_v28 = vld [vmem:[%s8111_s25 + $0xd8] sm:$0xff] }
 0x31f   :  { %v6023_v29 = vpack.c.bf16 %v1135_v28, %v1134_v26 }
 0x321   :  { %4060 = vmatpush1.bf16.msra.mxu0 %v4059_v34  ;;  %v1136_v34 = vld [vmem:[%s8111_s25 + $0xe0] sm:$0xff] }
 0x322   :  { %4062 = vmatprep.subr.bf16.mxu0 %v4061_v36  ;;  %v1137_v36 = vld [vmem:[%s8111_s25 + $0xe8] sm:$0xff] }
 0x323   :  { %v6041_v37 = vpack.c.bf16 %v1137_v36, %v1136_v34 }
 0x325   :  { %4064 = vmatpush1.bf16.msra.mxu0 %v4063_v42  ;;  %v1138_v42 = vld [vmem:[%s8111_s25 + $0xf0] sm:$0xff] }
 0x326   :  { %4066 = vmatprep.subr.bf16.mxu0 %v4065_v43  ;;  %v1139_v43 = vld [vmem:[%s8111_s25 + $0xf8] sm:$0xff] }
 0x327   :  { %v6059_v44 = vpack.c.bf16 %v1139_v43, %v1138_v42 }
 0x329   :  { %4068 = vmatpush1.bf16.msra.mxu0 %v4067_v7 }
 0x32a   :  { %4070 = vmatprep.subr.bf16.mxu0 %v4069_v47 }
 0x32d   :  { %4072 = vmatpush1.bf16.msra.mxu0 %v4071_v15 }
 0x32e   :  { %4074 = vmatprep.subr.bf16.mxu0 %v4073_v52 }
 0x331   :  { %4076 = vmatpush1.bf16.msra.mxu0 %v4075_v23 }
 0x332   :  { %4078 = vmatprep.subr.bf16.mxu0 %v4077_v57 }
 0x335   :  { %4080 = vmatpush1.bf16.msra.mxu0 %v4079_v1 }
 0x336   :  { %4082 = vmatprep.subr.bf16.mxu0 %v4081_v4 }
 0x339   :  { %4084 = vmatpush1.bf16.msra.mxu0 %v4083_v8 }
 0x33c   :  { %1052 = vmatmul.mubr.f32.vlgmr.msra.gmra.mrb[18].mxu0 %v5646_v19  ;;  %v1112_v19 = vld [vmem:[%s8111_s25 + $0x20] sm:$0xff] }
 0x33d   :  { %1057 = vmatprep.mubr.f32.mxu0 %v5670_v31 }
 0x340   :  { %1058 = vmatmul.mubr.f32.gmra.mrb[20].mxu0 %v5662_v27  ;;  %v1113_v27 = vld [vmem:[%s8111_s25 + $0x28] sm:$0xff] }
 0x341   :  { %1063 = vmatprep.mubr.f32.mxu0 %v5686_v39  ;;  %v5977_v31 = vpack.c.bf16 %v1113_v27, %v1112_v19  ;;  %v1131_v39 = vld [vmem:[%s8111_s25 + $0xb8] sm:$0xff] }
 0x343   :  { %4096 = vmatpush3.bf16.msra.mxu1 %v5977_v31 }
 0x344   :  { %1064 = vmatmul.mubr.f32.gmra.mrb[22].mxu0 %v5678_v35  ;;  %v1130_v35 = vld [vmem:[%s8111_s25 + $0xb0] sm:$0xff] }
 0x345   :  { %v5987_v13 = vpack.c.bf16 %v1131_v39, %v1130_v35 }
 0x347   :  { %4098 = vmatprep.subr.bf16.mxu1 %v5987_v13 }
 0x348   :  { %4100 = vmatpush3.bf16.msra.mxu1 %v5995_v17 }
 0x349   :  { %4102 = vmatprep.subr.bf16.mxu1 %v6005_v21 }
 0x34c   :  { %4104 = vmatpush3.bf16.msra.mxu1 %v6013_v25 }
 0x34d   :  { %4106 = vmatprep.subr.bf16.mxu1 %v6023_v29 }
 0x350   :  { %4108 = vmatpush3.bf16.msra.mxu1 %v6031_v33 }
 0x351   :  { %4110 = vmatprep.subr.bf16.mxu1 %v6041_v37 }
 0x354   :  { %4112 = vmatpush3.bf16.msra.mxu1 %v6049_v41 }
 0x355   :  { %4114 = vmatprep.subr.bf16.mxu1 %v6059_v44 }
 0x358   :  { %4116 = vmatpush3.bf16.msra.mxu1 %v6067_v49 }
 0x359   :  { %4118 = vmatprep.subr.bf16.mxu1 %v5584_v55 }
 0x40f   :  { %v6072_v7 = vpop.f32.mrb[18].mxu0 }
 0x410   :  { %v6074_v47 = vpop.f32.mrb[19].mxu0  ;;  %v1086_v50 = vmul.f32 %v6072_v7, %v6072_v7 }
 0x411   :  { %v1087_v55 = vmul.f32 %v6074_v47, %v6074_v47 }
 0x413   :  { %v6076_v48 = vpop.f32.mrb[20].mxu0 }
 0x414   :  { %v1070_v51 = vadd.f32 %v6076_v48, %v6072_v7  ;;  %v1088_v2 = vmul.f32 %v6076_v48, %v6076_v48  ;;  %v6084_v15 = vpop.f32.mrb[21].mxu0 }
 0x415   :  { %v1078_v52 = vadd.f32 %v6084_v15, %v6074_v47  ;;  %v1089_v53 = vmul.f32 %v6084_v15, %v6084_v15 }
 0x416   :  { %v1092_v54 = vadd.f32 %v1088_v2, %v1086_v50  ;;  %v1306_v50 = vld [vmem:[%s8112_s1 + $0x78] sm:$0xff]  ;;  %v1303_v2 = vld [vmem:[%s8112_s1 + $0x60] sm:$0xff] }
 0x417   :  { %v1100_v56 = vadd.f32 %v1089_v53, %v1087_v55  ;;  %v6092_v11 = vpop.f32.mrb[22].mxu0  ;;  %v1305_v55 = vld [vmem:[%s8112_s1 + $0x70] sm:$0xff]  ;;  %v1308_v53 = vld [vmem:[%s8112_s1 + $0x88] sm:$0xff] }
 0x418   :  { %v1071_v23 = vadd.f32 %v1070_v51, %v6092_v11  ;;  %v1090_v57 = vmul.f32 %v6092_v11, %v6092_v11  ;;  %v6097_v58 = vpop.f32.mrb[23].mxu0 }
 0x419   :  { %v1079_v59 = vadd.f32 %v1078_v52, %v6097_v58  ;;  %v1091_v62 = vmul.f32 %v6097_v58, %v6097_v58  ;;  %v4163_v52 = vpack.c.bf16 %v1305_v55, %v1303_v2 }
 0x41a   :  { %v1072_v63 = vrot.slane %v1071_v23, 4  ;;  %v1093_v1 = vadd.f32 %v1092_v54, %v1090_v57  ;;  %v1310_v54 = vld [vmem:[%s8112_s1 + $0x98] sm:$0xff]  ;;  %v1309_v57 = vld [vmem:[%s8112_s1 + $0x90] sm:$0xff] }
 0x41b   :  { %v1080_v4 = vrot.slane %v1079_v59, 4  ;;  %v1101_v5 = vadd.f32 %v1100_v56, %v1091_v62  ;;  %v4165_v56 = vpack.c.bf16 %v1310_v54, %v1308_v53  ;;  %v1312_v62 = vld [vmem:[%s8112_s1 + $0xa8] sm:$0xff] }
 0x41c   :  { %v1073_v6 = vadd.f32 %v1072_v63, %v1071_v23  ;;  %v1094_v30 = vrot.slane %v1093_v1, 4  ;;  %v1307_v23 = vld [vmem:[%s8112_s1 + $0x80] sm:$0xff]  ;;  %v1314_v63 = vld [vmem:[%s8112_s1 + $0xb8] sm:$0xff] }
 0x41d   :  { %v1081_v8 = vadd.f32 %v1080_v4, %v1079_v59  ;;  %v1102_v9 = vrot.slane %v1101_v5, 4  ;;  %v4167_v59 = vpack.c.bf16 %v1309_v57, %v1307_v23  ;;  %v1311_v4 = vld [vmem:[%s8112_s1 + $0xa0] sm:$0xff] }
 0x41e   :  { %v1074_v10 = vrot.slane %v1073_v6, 2  ;;  %v1095_v32 = vadd.f32 %v1094_v30, %v1093_v1  ;;  %v4169_v1 = vpack.c.bf16 %v1314_v63, %v1312_v62 }
 0x41f   :  { %v1082_v19 = vrot.slane %v1081_v8, 2  ;;  %v1103_v27 = vadd.f32 %v1102_v9, %v1101_v5  ;;  %v1313_v5 = vld [vmem:[%s8112_s1 + $0xb0] sm:$0xff]  ;;  %v1318_v9 = vld [vmem:[%s8112_s1 + $0xd8] sm:$0xff] }
 0x420   :  { %v1075_v35 = vadd.f32 %v1074_v10, %v1073_v6  ;;  %v4171_v6 = vpack.c.bf16 %v1313_v5, %v1311_v4  ;;  %v1315_v10 = vld [vmem:[%s8112_s1 + $0xc0] sm:$0xff] }
 0x421   :  { %v1083_v39 = vadd.f32 %v1082_v19, %v1081_v8  ;;  %v1104_v14 = vrot.slane %v1103_v27, 2  ;;  %v1316_v8 = vld [vmem:[%s8112_s1 + $0xc8] sm:$0xff] }
 0x422   :  { %v1076_v16 = vrot.slane %v1075_v35, 1  ;;  %v4173_v19 = vpack.c.bf16 %v1318_v9, %v1316_v8  ;;  %v1656_v9 = vld [vmem:[%s8076_s7 + $0x8] sm:$0xff] }
 0x423   :  { %v1084_v18 = vrot.slane %v1083_v39, 1  ;;  %v1105_v20 = vadd.f32 %v1104_v14, %v1103_v27  ;;  %v1317_v27 = vld [vmem:[%s8112_s1 + $0xd0] sm:$0xff] }
 0x424   :  { %v1077_v26 = vadd.f32 %v1076_v16, %v1075_v35  ;;  %v1320_v35 = vld [vmem:[%s8112_s1 + $0xe8] sm:$0xff]  ;;  %v4175_v14 = vpack.c.bf16 %v1317_v27, %v1315_v10  ;;  %v1658_v10 = vld [vmem:[%s8076_s7 + $0x18] sm:$0xff]  ;;  %v1655_v27 = vld [vmem:[%s8076_s7] sm:$0xff] }
 0x425   :  { %v1085_v22 = vadd.f32 %v1084_v18, %v1083_v39  ;;  %v1106_v24 = vrot.slane %v1105_v20, 1  ;;  %v1322_v39 = vld [vmem:[%s8112_s1 + $0xf8] sm:$0xff]  ;;  %v1319_v18 = vld [vmem:[%s8112_s1 + $0xe0] sm:$0xff] }
 0x426   :  { %v4177_v16 = vpack.c.bf16 %v1322_v39, %v1320_v35  ;;  %v1657_v35 = vld [vmem:[%s8076_s7 + $0x10] sm:$0xff]  ;;  %v1660_v39 = vld [vmem:[%s8076_s7 + $0x28] sm:$0xff] }
 0x427   :  { %1204 = vmatprep.mubr.f32.mxu1 %v1085_v22  ;;  %v1107_v28 = vadd.f32 %v1106_v24, %v1105_v20  ;;  %v1321_v20 = vld [vmem:[%s8112_s1 + $0xf0] sm:$0xff] }
 0x428   :  { %1205 = vmatmul.mubr.f32.vlgmr.msra.gmra.mrb[20].mxu1 %v1077_v26  ;;  %v4179_v22 = vpack.c.bf16 %v1321_v20, %v1319_v18  ;;  %v1505_v20 = vld [vmem:[%s8077_s3] sm:$0xff] }
 0x429   :  { %4120 = vmatpush3.bf16.msra.mxu1 %v5598_v60  ;;  %1274 = vmatprep.mubr.f32.mxu1 %v1107_v28  ;;  %v1096_v60 = vrot.slane %v1095_v32, 2 }
 0x42a   :  { %4122 = vmatprep.subr.bf16.mxu1 %v5600_v61 }
 0x42b   :  { %v1097_v61 = vadd.f32 %v1096_v60, %v1095_v32 }
 0x42d   :  { %4124 = vmatpush3.bf16.msra.mxu1 %v5612_v3  ;;  %v1098_v3 = vrot.slane %v1097_v61, 1 }
 0x42e   :  { %4126 = vmatprep.subr.bf16.mxu1 %v5969_v12 }
 0x42f   :  { %v1099_v12 = vadd.f32 %v1098_v3, %v1097_v61 }
 0x431   :  { %4128 = vmatpush3.bf16.msra.mxu1 %v5977_v31  ;;  %v1292_v31 = vld [vmem:[%s8112_s1 + $0x8] sm:$0xff] }
 0x432   :  { %4130 = vmatprep.subr.bf16.mxu1 %v5987_v13  ;;  %v1294_v13 = vld [vmem:[%s8112_s1 + $0x18] sm:$0xff] }
 0x435   :  { %4132 = vmatpush3.bf16.msra.mxu1 %v5995_v17  ;;  %v1291_v17 = vld [vmem:[%s8112_s1] sm:$0xff] }
 0x436   :  { %4134 = vmatprep.subr.bf16.mxu1 %v6005_v21  ;;  %v4149_v21 = vpack.c.bf16 %v1294_v13, %v1292_v31 }
 0x439   :  { %4136 = vmatpush3.bf16.msra.mxu1 %v6013_v25  ;;  %v1293_v25 = vld [vmem:[%s8112_s1 + $0x10] sm:$0xff] }
 0x43a   :  { %4138 = vmatprep.subr.bf16.mxu1 %v6023_v29  ;;  %v1296_v29 = vld [vmem:[%s8112_s1 + $0x28] sm:$0xff]  ;;  %v6136_v34 = vpack.c.bf16 %v1293_v25, %v1291_v17  ;;  %v1284_v17 = vld [vmem:[%s8113_s6] sm:$0x1] }
 0x43d   :  { %4140 = vmatpush3.bf16.msra.mxu1 %v6031_v33  ;;  %v1298_v33 = vld [vmem:[%s8112_s1 + $0x38] sm:$0xff] }
 0x43e   :  { %4142 = vmatprep.subr.bf16.mxu1 %v6041_v37  ;;  %v6138_v36 = vpack.c.bf16 %v1298_v33, %v1296_v29  ;;  %v1295_v37 = vld [vmem:[%s8112_s1 + $0x20] sm:$0xff] }
 0x43f   :  { %v6153_v42 = vpack.c.bf16 %v1297_v38, %v1295_v37  ;;  %v1288_v33 = vld [vmem:[%s8075_s10] sm:$0x1] }
 0x441   :  { %4144 = vmatpush3.bf16.msra.mxu1 %v6049_v41  ;;  %v1302_v41 = vld [vmem:[%s8112_s1 + $0x58] sm:$0xff] }
 0x442   :  { %4146 = vmatprep.subr.bf16.mxu1 %v6059_v44  ;;  %v6156_v43 = vpack.c.bf16 %v1302_v41, %v1300_v40  ;;  %v1299_v44 = vld [vmem:[%s8112_s1 + $0x40] sm:$0xff] }
 0x443   :  { %v6165_v46 = vpack.c.bf16 %v1301_v45, %v1299_v44 }
 0x445   :  { %4148 = vmatpush3.bf16.msra.mxu1 %v6067_v49  ;;  %v1304_v49 = vld [vmem:[%s8112_s1 + $0x68] sm:$0xff] }
 0x446   :  { %4150 = vmatprep.subr.bf16.mxu1 %v4149_v21  ;;  %v4161_v51 = vpack.c.bf16 %v1306_v50, %v1304_v49 }
 0x448   :  { %1275 = vmatmul.mubr.f32.vlgmr.msra.gmra.mrb[22].mxu1 %v1099_v12 }
 0x449   :  { %1387 = vmatprep.mubr.f32.mxu1 %v4896_v0  ;;  %4152 = vmatpush1.bf16.msra.mxu1 %v6136_v34 }
 0x44a   :  { %4154 = vmatprep.subr.bf16.mxu1 %v6138_v36 }
 0x44d   :  { %4156 = vmatpush1.bf16.msra.mxu1 %v6153_v42 }
 0x44e   :  { %4158 = vmatprep.subr.bf16.mxu1 %v6156_v43 }
 0x451   :  { %4160 = vmatpush1.bf16.msra.mxu1 %v6165_v46 }
 0x452   :  { %4162 = vmatprep.subr.bf16.mxu1 %v4161_v51 }
 0x455   :  { %4164 = vmatpush1.bf16.msra.mxu1 %v4163_v52 }
 0x456   :  { %4166 = vmatprep.subr.bf16.mxu1 %v4165_v56 }
 0x459   :  { %4168 = vmatpush1.bf16.msra.mxu1 %v4167_v59 }
 0x45a   :  { %4170 = vmatprep.subr.bf16.mxu1 %v4169_v1 }
 0x45d   :  { %4172 = vmatpush1.bf16.msra.mxu1 %v4171_v6 }
 0x45e   :  { %4174 = vmatprep.subr.bf16.mxu1 %v4173_v19 }
 0x461   :  { %4176 = vmatpush1.bf16.msra.mxu1 %v4175_v14 }
 0x462   :  { %4178 = vmatprep.subr.bf16.mxu1 %v4177_v16 }
 0x465   :  { %4180 = vmatpush1.bf16.msra.mxu1 %v4179_v22 }
 0x466   :  { %4182 = vmatprep.subr.bf16.mxu1 %v4149_v21 }
 0x4fb   :  { %v3596_v24 = vpop.f32.mrb[20].mxu1 }
 0x4fc   :  { %v3597_v26 = vpop.f32.mrb[21].mxu1 }
 0x4fd   :  { %v3598_v28 = vadd.f32 %v3597_v26, %v3596_v24  ;;  %v1659_v26 = vld [vmem:[%s8076_s7 + $0x20] sm:$0xff] }
 0x4ff   :  { %v1280_v30 = vmul.f32 0.0061728396, %v3598_v28  ;;  %v1661_v28 = vld [vmem:[%s8076_s7 + $0x30] sm:$0xff] }
 0x501   :  { %v1282_v3 = vmul.f32 %v1280_v30, %v1280_v30 }
 0x51b   :  { %v3631_v32 = vpop.f32.mrb[22].mxu1 }
 0x51c   :  { %v3632_v60 = vpop.f32.mrb[23].mxu1 }
 0x51d   :  { %v3633_v61 = vadd.f32 %v3632_v60, %v3631_v32  ;;  %v1666_v32 = vld [vmem:[%s8076_s7 + $0x58] sm:$0xff]  ;;  %v1506_v60 = vld [vmem:[%s8077_s3 + $0x8] sm:$0xff] }
 0x51f   :  { %v1281_v12 = vmul.f32 0.0061728396, %v3633_v61  ;;  %v4223_v61 = vpack.c.bf16 %v1661_v28, %v1659_v26  ;;  %v1702_v26 = vld [vmem:[%s8076_s7 + $0x178] sm:$0xff] }
 0x521   :  { %v1283_v31 = vsub.f32 %v1281_v12, %v1282_v3  ;;  %v1663_v12 = vld [vmem:[%s8076_s7 + $0x40] sm:$0xff] }
 0x523   :  { %v1285_v13 = vadd.f32 1e-05, %v1283_v31  ;;  %v1665_v31 = vld [vmem:[%s8076_s7 + $0x50] sm:$0xff] }
 0x525   :  { %4886 = vrsqrt.f32 %v1285_v13  ;;  %v1668_v13 = vld [vmem:[%s8076_s7 + $0x68] sm:$0xff] }
 0x52f   :  { %v4887_v25 = vpop.eup %4886 }
 0x530   :  { %v1287_v29 = vmul.f32 %v4887_v25, %v1284_v17  ;;  %v1670_v17 = vld [vmem:[%s8076_s7 + $0x78] sm:$0xff]  ;;  %v1507_v25 = vld [vmem:[%s8077_s3 + $0x10] sm:$0xff] }
 0x532   :  { %1388 = vmatmul.mubr.f32.vlgmr.msra.gmra.mrb[24].mxu1 %v1287_v29  ;;  %v1289_v21 = vmul.f32 %v1287_v29, %v1280_v30  ;;  %v1664_v30 = vld [vmem:[%s8076_s7 + $0x48] sm:$0xff]  ;;  %v4227_v29 = vpack.c.bf16 %v1665_v31, %v1663_v12 }
 0x533   :  { %4184 = vmatpush1.bf16.msra.mxu1 %v6136_v34  ;;  %1458 = vmatprep.mubr.f32.mxu1 %v4896_v0  ;;  %v4225_v3 = vpack.c.bf16 %v1666_v32, %v1664_v30  ;;  %v1699_v32 = vld [vmem:[%s8076_s7 + $0x160] sm:$0xff] }
 0x534   :  { %4186 = vmatprep.subr.bf16.mxu1 %v6138_v36  ;;  %v1290_v34 = vsub.f32 %v1288_v33, %v1289_v21  ;;  %v1465_v36 = vlaneseq  ;;  %v4229_v21 = vpack.c.bf16 %v1670_v17, %v1668_v13  ;;  %v1667_v33 = vld [vmem:[%s8076_s7 + $0x60] sm:$0xff]  ;;  %v1705_v17 = vld [vmem:[%s8076_s7 + $0x190] sm:$0xff] }
 0x535   :  { %v1703_v13 = vld [vmem:[%s8076_s7 + $0x180] sm:$0xff] }
 0x536   :  { %v1466_v37 = vshrl.u32 %v1465_v36, 7  ;;  %v1672_v36 = vld [vmem:[%s8076_s7 + $0x88] sm:$0xff] }
 0x537   :  { %4188 = vmatpush1.bf16.msra.mxu1 %v6153_v42 }
 0x538   :  { %4190 = vmatprep.subr.bf16.mxu1 %v6156_v43  ;;  %v6242_v38 = vsub.s32 0, %v1466_v37  ;;  %v1674_v37 = vld [vmem:[%s8076_s7 + $0x98] sm:$0xff] }
 0x53b   :  { %4192 = vmatpush1.bf16.msra.mxu1 %v6165_v46 }
 0x53c   :  { %4194 = vmatprep.subr.bf16.mxu1 %v4161_v51 }
 0x53f   :  { %4196 = vmatpush1.bf16.msra.mxu1 %v4163_v52 }
 0x540   :  { %4198 = vmatprep.subr.bf16.mxu1 %v4165_v56 }
 0x543   :  { %4200 = vmatpush1.bf16.msra.mxu1 %v4167_v59 }
 0x544   :  { %4202 = vmatprep.subr.bf16.mxu1 %v4169_v1 }
 0x547   :  { %4204 = vmatpush1.bf16.msra.mxu1 %v4171_v6 }
 0x548   :  { %4206 = vmatprep.subr.bf16.mxu1 %v4173_v19 }
 0x54b   :  { %4208 = vmatpush1.bf16.msra.mxu1 %v4175_v14  ;;  %v1662_v14 = vld [vmem:[%s8076_s7 + $0x38] sm:$0xff] }
 0x54c   :  { %4210 = vmatprep.subr.bf16.mxu1 %v4177_v16  ;;  %v4217_v16 = vpack.c.bf16 %v1658_v10, %v1656_v9  ;;  %v4221_v24 = vpack.c.bf16 %v1662_v14, %v1660_v39  ;;  %v1694_v9 = vld [vmem:[%s8076_s7 + $0x138] sm:$0xff]  ;;  %v1696_v39 = vld [vmem:[%s8076_s7 + $0x148] sm:$0xff] }
 0x54d   :  { %v1698_v14 = vld [vmem:[%s8076_s7 + $0x158] sm:$0xff] }
 0x54f   :  { %4212 = vmatpush1.bf16.msra.mxu1 %v4179_v22  ;;  %v4219_v22 = vpack.c.bf16 %v1657_v35, %v1655_v27  ;;  %v1691_v27 = vld [vmem:[%s8076_s7 + $0x120] sm:$0xff]  ;;  %v1693_v35 = vld [vmem:[%s8076_s7 + $0x130] sm:$0xff] }
 0x552   :  { %1459 = vmatmul.mubr.f32.vlgmr.msra.gmra.mrb[26].mxu1 %v1290_v34  ;;  %v1669_v34 = vld [vmem:[%s8076_s7 + $0x70] sm:$0xff] }
 0x553   :  { %1594 = vmatprep.mubr.f32.mxu1 %v4896_v0 }
 0x605   :  { %v1389_v40 = vpop.f32.mrb[24].mxu1 }
 0x606   :  { %v1468_v41 = vrot.slane %v1389_v40, %v6242_v38  ;;  %v1391_v42 = vpop.f32.mrb[25].mxu1  ;;  %v1508_v40 = vld [vmem:[%s8077_s3 + $0x18] sm:$0xff] }
 0x607   :  { %v1472_v43 = vrot.slane %v1391_v42, %v6242_v38  ;;  %v4233_v42 = vpack.c.bf16 %v1674_v37, %v1672_v36  ;;  %v1709_v36 = vld [vmem:[%s8076_s7 + $0x1b0] sm:$0xff]  ;;  %v1712_v37 = vld [vmem:[%s8076_s7 + $0x1c8] sm:$0xff] }
 0x608   :  { %v1473_v44 = vmul.f32 %v1468_v41, %v6072_v7  ;;  %v1475_v45 = vmul.f32 %v1468_v41, %v6076_v48  ;;  %v1477_v46 = vmul.f32 %v1468_v41, %v6092_v11  ;;  %v4231_v41 = vpack.c.bf16 %v1669_v34, %v1667_v33  ;;  %v1707_v34 = vld [vmem:[%s8076_s7 + $0x1a0] sm:$0xff] }
 0x609   :  { %v1474_v49 = vmul.f32 %v1472_v43, %v6074_v47  ;;  %v1476_v50 = vmul.f32 %v1472_v43, %v6084_v15  ;;  %v1478_v51 = vmul.f32 %v1472_v43, %v6097_v58  ;;  %v1671_v43 = vld [vmem:[%s8076_s7 + $0x80] sm:$0xff] }
 0x625   :  { %v1460_v2 = vpop.f32.mrb[26].mxu1 }
 0x626   :  { %v1482_v55 = vrot.slane %v1460_v2, %v6242_v38  ;;  %v1462_v52 = vpop.f32.mrb[27].mxu1  ;;  %v1675_v2 = vld [vmem:[%s8076_s7 + $0xa0] sm:$0xff] }
 0x627   :  { %v1486_v53 = vrot.slane %v1462_v52, %v6242_v38  ;;  %v1680_v52 = vld [vmem:[%s8076_s7 + $0xc8] sm:$0xff] }
 0x628   :  { %v1487_v54 = vadd.f32 %v1482_v55, %v1473_v44  ;;  %v1489_v56 = vadd.f32 %v1482_v55, %v1475_v45  ;;  %v1491_v23 = vadd.f32 %v1482_v55, %v1477_v46  ;;  %v1673_v44 = vld [vmem:[%s8076_s7 + $0x90] sm:$0xff]  ;;  %v1676_v45 = vld [vmem:[%s8076_s7 + $0xa8] sm:$0xff]  ;;  %v1678_v46 = vld [vmem:[%s8076_s7 + $0xb8] sm:$0xff] }
 0x629   :  { %v1488_v7 = vadd.f32 %v1486_v53, %v1474_v49  ;;  %v1490_v57 = vadd.f32 %v1486_v53, %v1476_v50  ;;  %v1492_v48 = vadd.f32 %v1486_v53, %v1478_v51  ;;  %v1509_v49 = vld [vmem:[%s8077_s3 + $0x20] sm:$0xff]  ;;  %v4235_v50 = vpack.c.bf16 %v1673_v44, %v1671_v43  ;;  %v1677_v55 = vld [vmem:[%s8076_s7 + $0xb0] sm:$0xff]  ;;  %v1682_v53 = vld [vmem:[%s8076_s7 + $0xd8] sm:$0xff] }
 0x62a   :  { %v1493_v59 = vmul.f32 0.2, %v1487_v54  ;;  %v1495_v11 = vmul.f32 0.2, %v1489_v56  ;;  %v1497_v8 = vmul.f32 0.2, %v1491_v23  ;;  %v4237_v51 = vpack.c.bf16 %v1678_v46, %v1676_v45 }
 0x62b   :  { %v1494_v62 = vmul.f32 0.2, %v1488_v7  ;;  %v1496_v47 = vmul.f32 0.2, %v1490_v57  ;;  %v1498_v4 = vmul.f32 0.2, %v1492_v48 }
 0x62c   :  { %v1499_v63 = vmax.f32 %v1487_v54, %v1493_v59  ;;  %v1501_v15 = vmax.f32 %v1489_v56, %v1495_v11  ;;  %v1503_v18 = vmax.f32 %v1491_v23, %v1497_v8  ;;  %v1510_v54 = vld [vmem:[%s8077_s3 + $0x28] sm:$0xff]  ;;  %v4239_v56 = vpack.c.bf16 %v1677_v55, %v1675_v2  ;;  %v1686_v59 = vld [vmem:[%s8076_s7 + $0xf8] sm:$0xff]  ;;  %v1711_v43 = vld [vmem:[%s8076_s7 + $0x1c0] sm:$0xff] }
 0x62d   :  { %v1500_v1 = vmax.f32 %v1488_v7, %v1494_v62  ;;  %v1502_v58 = vmax.f32 %v1490_v57, %v1496_v47  ;;  %v1504_v19 = vmax.f32 %v1492_v48, %v1498_v4  ;;  %v4241_v23 = vpack.c.bf16 %v1682_v53, %v1680_v52  ;;  %v1679_v7 = vld [vmem:[%s8076_s7 + $0xc0] sm:$0xff]  ;;  %v1681_v57 = vld [vmem:[%s8076_s7 + $0xd0] sm:$0xff]  ;;  %v1684_v48 = vld [vmem:[%s8076_s7 + $0xe8] sm:$0xff] }
 0x62e   :  { %v4215_v5 = vpack.c.bf16 %v1501_v15, %v1499_v63  ;;  %v4243_v11 = vpack.c.bf16 %v1681_v57, %v1679_v7  ;;  %v4245_v62 = vpack.c.bf16 %v1686_v59, %v1684_v48  ;;  %v1683_v47 = vld [vmem:[%s8076_s7 + $0xe0] sm:$0xff]  ;;  %v1685_v63 = vld [vmem:[%s8076_s7 + $0xf0] sm:$0xff]  ;;  %v1688_v15 = vld [vmem:[%s8076_s7 + $0x108] sm:$0xff] }
 0x62f   :  { %v4213_v6 = vpack.c.bf16 %v1502_v58, %v1500_v1  ;;  %v1690_v1 = vld [vmem:[%s8076_s7 + $0x118] sm:$0xff]  ;;  %v4247_v58 = vpack.c.bf16 %v1685_v63, %v1683_v47  ;;  %v1692_v8 = vld [vmem:[%s8076_s7 + $0x128] sm:$0xff]  ;;  %v1713_v44 = vld [vmem:[%s8076_s7 + $0x1d0] sm:$0xff] }
 0x630   :  { %v4249_v4 = vpack.c.bf16 %v1690_v1, %v1688_v15  ;;  %v1716_v45 = vld [vmem:[%s8076_s7 + $0x1e8] sm:$0xff]  ;;  %v1718_v46 = vld [vmem:[%s8076_s7 + $0x1f8] sm:$0xff]  ;;  %v1717_v2 = vld [vmem:[%s8076_s7 + $0x1f0] sm:$0xff] }
 0x631   :  { %4214 = vmatprep.subr.bf16.mxu1 %v4213_v6  ;;  %v1689_v6 = vld [vmem:[%s8076_s7 + $0x110] sm:$0xff]  ;;  %v1720_v52 = vld [vmem:[%s8076_s7 + $0x208] sm:$0xff]  ;;  %v1722_v53 = vld [vmem:[%s8076_s7 + $0x218] sm:$0xff] }
 0x632   :  { %4216 = vmatpush1.bf16.msra.mxu1 %v4215_v5  ;;  %v1687_v5 = vld [vmem:[%s8076_s7 + $0x100] sm:$0xff]  ;;  %v1724_v7 = vld [vmem:[%s8076_s7 + $0x228] sm:$0xff]  ;;  %v1726_v57 = vld [vmem:[%s8076_s7 + $0x238] sm:$0xff] }
 0x633   :  { %1534 = vmatprep.subr.mxu1 %v1504_v19  ;;  %v4251_v10 = vpack.c.bf16 %v1689_v6, %v1687_v5  ;;  %v4253_v19 = vpack.c.bf16 %v1694_v9, %v1692_v8  ;;  %v1723_v47 = vld [vmem:[%s8076_s7 + $0x220] sm:$0xff]  ;;  %v1725_v63 = vld [vmem:[%s8076_s7 + $0x230] sm:$0xff]  ;;  %v1728_v15 = vld [vmem:[%s8076_s7 + $0x248] sm:$0xff] }
 0x634   :  { %v1730_v1 = vld [vmem:[%s8076_s7 + $0x258] sm:$0xff]  ;;  %v1727_v6 = vld [vmem:[%s8076_s7 + $0x240] sm:$0xff]  ;;  %v1729_v8 = vld [vmem:[%s8076_s7 + $0x250] sm:$0xff] }
 0x635   :  { %v4289_v5 = vpack.c.bf16 %v1730_v1, %v1728_v15  ;;  %v1747_v15 = vld [vmem:[%s8076_s7 + $0x2e0] sm:$0xff]  ;;  %v1749_v1 = vld [vmem:[%s8076_s7 + $0x2f0] sm:$0xff] }
 0x636   :  { %1535 = vmatpush1.msra.mxu1 %v1503_v18  ;;  %v4257_v18 = vpack.c.bf16 %v1698_v14, %v1696_v39  ;;  %v4291_v39 = vpack.c.bf16 %v1729_v8, %v1727_v6  ;;  %v1736_v14 = vld [vmem:[%s8076_s7 + $0x288] sm:$0xff]  ;;  %v1751_v8 = vld [vmem:[%s8076_s7 + $0x300] sm:$0xff] }
 0x637   :  { %3536 = vmatmul.mubr.msk.f32.vlgmr.msra.gmra.mrb[28].mxu1 %vm1511_vm2, %v1505_v20  ;;  %4218 = vmatprep.subr.bf16.mxu1 %v4217_v16  ;;  %v4255_v16 = vpack.c.bf16 %v1693_v35, %v1691_v27  ;;  %v1695_v20 = vld [vmem:[%s8076_s7 + $0x140] sm:$0xff]  ;;  %v1733_v35 = vld [vmem:[%s8076_s7 + $0x270] sm:$0xff] }
 0x638   :  { %1600 = vmatprep.mubr.f32.mxu1 %v4896_v0  ;;  %4220 = vmatpush1.bf16.msra.mxu1 %v4219_v22  ;;  %v1697_v22 = vld [vmem:[%s8076_s7 + $0x150] sm:$0xff]  ;;  %v1731_v27 = vld [vmem:[%s8076_s7 + $0x260] sm:$0xff] }
 0x639   :  { %4222 = vmatprep.subr.bf16.mxu1 %v4221_v24  ;;  %v1700_v24 = vld [vmem:[%s8076_s7 + $0x168] sm:$0xff]  ;;  %v4259_v28 = vpack.c.bf16 %v1697_v22, %v1695_v20  ;;  %v2126_v20 = vld [vmem:[%s8078_s17 + $0x80] sm:$0xff] }
 0x63a   :  { %v4261_v30 = vpack.c.bf16 %v1702_v26, %v1700_v24  ;;  %v2127_v22 = vld [vmem:[%s8078_s17 + $0x88] sm:$0xff]  ;;  %v2110_v24 = vld [vmem:[%s8078_s17] sm:$0xff] }
 0x63b   :  { %3537 = vmatmul.mubr.msk.f32.gmra.mrb[30].mxu1 %vm1511_vm2, %v1506_v60  ;;  %v1701_v60 = vld [vmem:[%s8076_s7 + $0x170] sm:$0xff] }
 0x63c   :  { %1606 = vmatprep.mubr.f32.mxu1 %v4896_v0  ;;  %4224 = vmatpush1.bf16.msra.mxu1 %v4223_v61  ;;  %v1704_v61 = vld [vmem:[%s8076_s7 + $0x188] sm:$0xff]  ;;  %v4263_v12 = vpack.c.bf16 %v1701_v60, %v1699_v32  ;;  %v2128_v60 = vld [vmem:[%s8078_s17 + $0x90] sm:$0xff] }
 0x63d   :  { %4226 = vmatprep.subr.bf16.mxu1 %v4225_v3  ;;  %v1706_v3 = vld [vmem:[%s8076_s7 + $0x198] sm:$0xff]  ;;  %v2111_v32 = vld [vmem:[%s8078_s17 + $0x8] sm:$0xff] }
 0x63e   :  { %v4265_v31 = vpack.c.bf16 %v1706_v3, %v1704_v61  ;;  %v2129_v61 = vld [vmem:[%s8078_s17 + $0x98] sm:$0xff]  ;;  %v6551_v3 = vpack.c.bf16 %v2111_v32, %v2110_v24  ;;  %v1764_v32 = vld [vmem:[%s8076_s7 + $0x368] sm:$0xff] }
 0x63f   :  { %3538 = vmatmul.mubr.msk.f32.gmra.mrb[32].mxu1 %vm1511_vm2, %v1507_v25  ;;  %v1708_v25 = vld [vmem:[%s8076_s7 + $0x1a8] sm:$0xff] }
 0x640   :  { %1612 = vmatprep.mubr.f32.mxu1 %v4896_v0  ;;  %4228 = vmatpush1.bf16.msra.mxu1 %v4227_v29  ;;  %v1710_v29 = vld [vmem:[%s8076_s7 + $0x1b8] sm:$0xff] }
 0x641   :  { %4230 = vmatprep.subr.bf16.mxu1 %v4229_v21  ;;  %v4267_v21 = vpack.c.bf16 %v1705_v17, %v1703_v13  ;;  %v4269_v33 = vpack.c.bf16 %v1710_v29, %v1708_v25  ;;  %v2113_v13 = vld [vmem:[%s8078_s17 + $0x18] sm:$0xff]  ;;  %v2130_v17 = vld [vmem:[%s8078_s17 + $0xa0] sm:$0xff]  ;;  %v2131_v25 = vld [vmem:[%s8078_s17 + $0xa8] sm:$0xff]  ;;  %v4295_v29 = vpack.c.bf16 %v1733_v35, %v1731_v27 }
 0x643   :  { %3539 = vmatmul.mubr.msk.f32.gmra.mrb[34].mxu1 %vm1511_vm2, %v1508_v40  ;;  %v1714_v40 = vld [vmem:[%s8076_s7 + $0x1d8] sm:$0xff] }
 0x644   :  { %1618 = vmatprep.mubr.f32.mxu1 %v4896_v0  ;;  %4232 = vmatpush1.bf16.msra.mxu1 %v4231_v41  ;;  %v4271_v41 = vpack.c.bf16 %v1709_v36, %v1707_v34 }
 0x645   :  { %4234 = vmatprep.subr.bf16.mxu1 %v4233_v42  ;;  %v4273_v42 = vpack.c.bf16 %v1714_v40, %v1712_v37  ;;  %v1737_v37 = vld [vmem:[%s8076_s7 + $0x290] sm:$0xff] }
 0x647   :  { %3540 = vmatmul.mubr.msk.f32.gmra.mrb[36].mxu1 %vm1511_vm2, %v1509_v49  ;;  %v4275_v49 = vpack.c.bf16 %v1713_v44, %v1711_v43  ;;  %v2115_v43 = vld [vmem:[%s8078_s17 + $0x28] sm:$0xff] }
 0x648   :  { %1624 = vmatprep.mubr.f32.mxu1 %v4896_v0  ;;  %4236 = vmatpush1.bf16.msra.mxu1 %v4235_v50  ;;  %v4277_v50 = vpack.c.bf16 %v1718_v46, %v1716_v45  ;;  %v1740_v44 = vld [vmem:[%s8076_s7 + $0x2a8] sm:$0xff]  ;;  %v1742_v45 = vld [vmem:[%s8076_s7 + $0x2b8] sm:$0xff] }
 0x649   :  { %4238 = vmatprep.subr.bf16.mxu1 %v4237_v51  ;;  %v1715_v51 = vld [vmem:[%s8076_s7 + $0x1e0] sm:$0xff] }
 0x64a   :  { %v4279_v55 = vpack.c.bf16 %v1717_v2, %v1715_v51  ;;  %v4301_v51 = vpack.c.bf16 %v1742_v45, %v1740_v44  ;;  %v1739_v2 = vld [vmem:[%s8076_s7 + $0x2a0] sm:$0xff]  ;;  %v1774_v44 = vld [vmem:[%s8076_s7 + $0x3b8] sm:$0xff] }
 0x64b   :  { %3541 = vmatmul.mubr.msk.f32.gmra.mrb[38].mxu1 %vm1511_vm2, %v1510_v54  ;;  %v4281_v54 = vpack.c.bf16 %v1722_v53, %v1720_v52  ;;  %v1744_v53 = vld [vmem:[%s8076_s7 + $0x2c8] sm:$0xff] }
 0x64c   :  { %4240 = vmatpush1.bf16.msra.mxu1 %v4239_v56  ;;  %v1719_v56 = vld [vmem:[%s8076_s7 + $0x200] sm:$0xff] }
 0x64d   :  { %4242 = vmatprep.subr.bf16.mxu1 %v4241_v23  ;;  %v1721_v23 = vld [vmem:[%s8076_s7 + $0x210] sm:$0xff] }
 0x64e   :  { %v4283_v59 = vpack.c.bf16 %v1721_v23, %v1719_v56 }
 0x650   :  { %4244 = vmatpush1.bf16.msra.mxu1 %v4243_v11 }
 0x651   :  { %4246 = vmatprep.subr.bf16.mxu1 %v4245_v62  ;;  %v4285_v62 = vpack.c.bf16 %v1726_v57, %v1724_v7  ;;  %v1743_v57 = vld [vmem:[%s8076_s7 + $0x2c0] sm:$0xff] }
 0x654   :  { %4248 = vmatpush1.bf16.msra.mxu1 %v4247_v58  ;;  %v4287_v58 = vpack.c.bf16 %v1725_v63, %v1723_v47 }
 0x655   :  { %4250 = vmatprep.subr.bf16.mxu1 %v4249_v4 }
 0x658   :  { %4252 = vmatpush1.bf16.msra.mxu1 %v4251_v10  ;;  %v1732_v10 = vld [vmem:[%s8076_s7 + $0x268] sm:$0xff] }
 0x659   :  { %4254 = vmatprep.subr.bf16.mxu1 %v4253_v19  ;;  %v1734_v19 = vld [vmem:[%s8076_s7 + $0x278] sm:$0xff] }
 0x65a   :  { %v4293_v26 = vpack.c.bf16 %v1734_v19, %v1732_v10  ;;  %v1756_v10 = vld [vmem:[%s8076_s7 + $0x328] sm:$0xff]  ;;  %v1758_v19 = vld [vmem:[%s8076_s7 + $0x338] sm:$0xff] }
 0x65b   :  { %v4317_v35 = vpack.c.bf16 %v1758_v19, %v1756_v10  ;;  %v1790_v10 = vld [vmem:[%s8076_s7 + $0x438] sm:$0xff] }
 0x65c   :  { %4256 = vmatpush1.bf16.msra.mxu1 %v4255_v16  ;;  %v1738_v16 = vld [vmem:[%s8076_s7 + $0x298] sm:$0xff] }
 0x65d   :  { %4258 = vmatprep.subr.bf16.mxu1 %v4257_v18  ;;  %v4297_v36 = vpack.c.bf16 %v1738_v16, %v1736_v14  ;;  %v1757_v14 = vld [vmem:[%s8076_s7 + $0x330] sm:$0xff]  ;;  %v1760_v16 = vld [vmem:[%s8076_s7 + $0x348] sm:$0xff] }
 0x660   :  { %4260 = vmatpush1.bf16.msra.mxu1 %v4259_v28 }
 0x661   :  { %4262 = vmatprep.subr.bf16.mxu1 %v4261_v30  ;;  %v6540_v30 = vpack.c.bf16 %v2127_v22, %v2126_v20  ;;  %v1762_v20 = vld [vmem:[%s8076_s7 + $0x358] sm:$0xff] }
 0x662   :  { %v4321_v24 = vpack.c.bf16 %v1762_v20, %v1760_v16  ;;  %v1794_v16 = vld [vmem:[%s8076_s7 + $0x458] sm:$0xff] }
 0x663   :  { %4410 = vmatprep.subr.bf16.mxu0 %v6540_v30 }
 0x664   :  { %4264 = vmatpush1.bf16.msra.mxu1 %v4263_v12  ;;  %v6553_v12 = vpack.c.bf16 %v2129_v61, %v2128_v60  ;;  %4412 = vmatpush3.bf16.msra.mxu0 %v6551_v3  ;;  %v1766_v60 = vld [vmem:[%s8076_s7 + $0x378] sm:$0xff] }
 0x665   :  { %4266 = vmatprep.subr.bf16.mxu1 %v4265_v31  ;;  %v2112_v31 = vld [vmem:[%s8078_s17 + $0x10] sm:$0xff] }
 0x666   :  { %v6574_v34 = vpack.c.bf16 %v2113_v13, %v2112_v31  ;;  %4414 = vmatprep.subr.bf16.mxu0 %v6553_v12  ;;  %v4325_v31 = vpack.c.bf16 %v1766_v60, %v1764_v32  ;;  %v1763_v13 = vld [vmem:[%s8076_s7 + $0x360] sm:$0xff] }
 0x667   :  { %v1795_v60 = vld [vmem:[%s8076_s7 + $0x460] sm:$0xff] }
 0x668   :  { %4268 = vmatpush1.bf16.msra.mxu1 %v4267_v21  ;;  %v1735_v21 = vld [vmem:[%s8076_s7 + $0x280] sm:$0xff]  ;;  %4416 = vmatpush3.bf16.msra.mxu0 %v6574_v34 }
 0x669   :  { %4270 = vmatprep.subr.bf16.mxu1 %v4269_v33  ;;  %v4299_v46 = vpack.c.bf16 %v1737_v37, %v1735_v21  ;;  %v1767_v37 = vld [vmem:[%s8076_s7 + $0x380] sm:$0xff] }
 0x66c   :  { %4272 = vmatpush1.bf16.msra.mxu1 %v4271_v41  ;;  %v6582_v41 = vpack.c.bf16 %v2131_v25, %v2130_v17  ;;  %v1765_v17 = vld [vmem:[%s8076_s7 + $0x370] sm:$0xff]  ;;  %v1768_v25 = vld [vmem:[%s8076_s7 + $0x388] sm:$0xff] }
 0x66d   :  { %4274 = vmatprep.subr.bf16.mxu1 %v4273_v42  ;;  %v2114_v42 = vld [vmem:[%s8078_s17 + $0x20] sm:$0xff]  ;;  %v4327_v21 = vpack.c.bf16 %v1765_v17, %v1763_v13 }
 0x66e   :  { %4418 = vmatprep.subr.bf16.mxu0 %v6582_v41  ;;  %v1799_v17 = vld [vmem:[%s8076_s7 + $0x480] sm:$0xff] }
 0x670   :  { %4276 = vmatpush1.bf16.msra.mxu1 %v4275_v49 }
 0x671   :  { %4278 = vmatprep.subr.bf16.mxu1 %v4277_v50  ;;  %v6599_v50 = vpack.c.bf16 %v2115_v43, %v2114_v42  ;;  %v1769_v42 = vld [vmem:[%s8076_s7 + $0x390] sm:$0xff]  ;;  %v1772_v43 = vld [vmem:[%s8076_s7 + $0x3a8] sm:$0xff] }
 0x672   :  { %v4331_v45 = vpack.c.bf16 %v1769_v42, %v1767_v37  ;;  %v1803_v42 = vld [vmem:[%s8076_s7 + $0x4a0] sm:$0xff] }
 0x673   :  { %4420 = vmatpush3.bf16.msra.mxu0 %v6599_v50 }
 0x674   :  { %4280 = vmatpush1.bf16.msra.mxu1 %v4279_v55  ;;  %v1741_v55 = vld [vmem:[%s8076_s7 + $0x2b0] sm:$0xff] }
 0x675   :  { %4282 = vmatprep.subr.bf16.mxu1 %v4281_v54  ;;  %v1746_v54 = vld [vmem:[%s8076_s7 + $0x2d8] sm:$0xff]  ;;  %v4303_v56 = vpack.c.bf16 %v1741_v55, %v1739_v2  ;;  %v1773_v2 = vld [vmem:[%s8076_s7 + $0x3b0] sm:$0xff]  ;;  %v1776_v55 = vld [vmem:[%s8076_s7 + $0x3c8] sm:$0xff] }
 0x676   :  { %v4305_v7 = vpack.c.bf16 %v1746_v54, %v1744_v53  ;;  %v1778_v53 = vld [vmem:[%s8076_s7 + $0x3d8] sm:$0xff] }
 0x70a   :  { %v1596_v48 = vpop.f32.mrb[28].mxu1 }
 0x70b   :  { %v1598_v11 = vpop.f32.mrb[29].mxu1 }
 0x70c   :  { %1911 = vmatprep.mubr.f32.mxu1 %v1598_v11  ;;  %v1748_v11 = vld [vmem:[%s8076_s7 + $0x2e8] sm:$0xff] }
 0x70d   :  { %1912 = vmatmul.mubr.f32.vlgmr.msra.gmra.mrb[40].mxu1 %v1596_v48  ;;  %v1745_v48 = vld [vmem:[%s8076_s7 + $0x2d0] sm:$0xff] }
 0x70e   :  { %4284 = vmatpush1.bf16.msra.mxu1 %v4283_v59  ;;  %v1602_v4 = vpop.f32.mrb[30].mxu1  ;;  %v4307_v47 = vpack.c.bf16 %v1745_v48, %v1743_v57  ;;  %v1777_v57 = vld [vmem:[%s8076_s7 + $0x3d0] sm:$0xff]  ;;  %v1780_v48 = vld [vmem:[%s8076_s7 + $0x3e8] sm:$0xff] }
 0x70f   :  { %4286 = vmatprep.subr.bf16.mxu1 %v4285_v62  ;;  %v1604_v9 = vpop.f32.mrb[31].mxu1  ;;  %v1750_v62 = vld [vmem:[%s8076_s7 + $0x2f8] sm:$0xff] }
 0x710   :  { %1917 = vmatprep.mubr.f32.mxu1 %v1604_v9  ;;  %v4309_v63 = vpack.c.bf16 %v1750_v62, %v1748_v11  ;;  %v1753_v9 = vld [vmem:[%s8076_s7 + $0x310] sm:$0xff]  ;;  %v1782_v11 = vld [vmem:[%s8076_s7 + $0x3f8] sm:$0xff] }
 0x711   :  { %1918 = vmatmul.mubr.f32.gmra.mrb[42].mxu1 %v1602_v4  ;;  %v1754_v4 = vld [vmem:[%s8076_s7 + $0x318] sm:$0xff]  ;;  %v4315_v27 = vpack.c.bf16 %v1753_v9, %v1751_v8  ;;  %v1785_v8 = vld [vmem:[%s8076_s7 + $0x410] sm:$0xff]  ;;  %v1788_v9 = vld [vmem:[%s8076_s7 + $0x428] sm:$0xff] }
 0x712   :  { %4288 = vmatpush1.bf16.msra.mxu1 %v4287_v58  ;;  %v6529_v18 = vpop.f32.mrb[32].mxu1  ;;  %v1752_v58 = vld [vmem:[%s8076_s7 + $0x308] sm:$0xff] }
 0x713   :  { %4290 = vmatprep.subr.bf16.mxu1 %v4289_v5  ;;  %v1610_v28 = vpop.f32.mrb[33].mxu1  ;;  %v4311_v5 = vpack.c.bf16 %v1749_v1, %v1747_v15  ;;  %v4313_v6 = vpack.c.bf16 %v1754_v4, %v1752_v58  ;;  %v1781_v15 = vld [vmem:[%s8076_s7 + $0x3f0] sm:$0xff]  ;;  %v1784_v1 = vld [vmem:[%s8076_s7 + $0x408] sm:$0xff]  ;;  %v1786_v58 = vld [vmem:[%s8076_s7 + $0x418] sm:$0xff] }
 0x714   :  { %1988 = vmatprep.mubr.f32.mxu1 %v1610_v28  ;;  %v1761_v28 = vld [vmem:[%s8076_s7 + $0x350] sm:$0xff] }
 0x716   :  { %4292 = vmatpush1.bf16.msra.mxu1 %v4291_v39  ;;  %v6571_v33 = vpop.f32.mrb[34].mxu1  ;;  %v1755_v39 = vld [vmem:[%s8076_s7 + $0x320] sm:$0xff] }
 0x717   :  { %4294 = vmatprep.subr.bf16.mxu1 %v4293_v26  ;;  %v6579_v40 = vpop.f32.mrb[35].mxu1  ;;  %v4319_v22 = vpack.c.bf16 %v1757_v14, %v1755_v39  ;;  %v1759_v26 = vld [vmem:[%s8076_s7 + $0x340] sm:$0xff]  ;;  %v1789_v39 = vld [vmem:[%s8076_s7 + $0x430] sm:$0xff]  ;;  %v1792_v14 = vld [vmem:[%s8076_s7 + $0x448] sm:$0xff] }
 0x718   :  { %v4323_v61 = vpack.c.bf16 %v1761_v28, %v1759_v26  ;;  %v1793_v26 = vld [vmem:[%s8076_s7 + $0x450] sm:$0xff]  ;;  %v1796_v28 = vld [vmem:[%s8076_s7 + $0x468] sm:$0xff] }
 0x71a   :  { %4296 = vmatpush1.bf16.msra.mxu1 %v4295_v29  ;;  %v6596_v49 = vpop.f32.mrb[36].mxu1  ;;  %v1770_v29 = vld [vmem:[%s8076_s7 + $0x398] sm:$0xff] }
 0x71b   :  { %4298 = vmatprep.subr.bf16.mxu1 %v4297_v36  ;;  %v6607_v52 = vpop.f32.mrb[37].mxu1  ;;  %v4329_v36 = vpack.c.bf16 %v1770_v29, %v1768_v25  ;;  %v1801_v25 = vld [vmem:[%s8076_s7 + $0x490] sm:$0xff]  ;;  %v1804_v29 = vld [vmem:[%s8076_s7 + $0x4a8] sm:$0xff] }
 0x71e   :  { %4300 = vmatpush1.bf16.msra.mxu1 %v4299_v46  ;;  %v6616_v23 = vpop.f32.mrb[38].mxu1  ;;  %v4333_v46 = vpack.c.bf16 %v1774_v44, %v1772_v43  ;;  %v1805_v43 = vld [vmem:[%s8076_s7 + $0x4b0] sm:$0xff]  ;;  %v1808_v44 = vld [vmem:[%s8076_s7 + $0x4c8] sm:$0xff] }
 0x71f   :  { %4302 = vmatprep.subr.bf16.mxu1 %v4301_v51  ;;  %v6625_v59 = vpop.f32.mrb[39].mxu1  ;;  %v1771_v51 = vld [vmem:[%s8076_s7 + $0x3a0] sm:$0xff] }
 0x720   :  { %v4335_v54 = vpack.c.bf16 %v1773_v2, %v1771_v51  ;;  %v1807_v2 = vld [vmem:[%s8076_s7 + $0x4c0] sm:$0xff] }
 0x722   :  { %4304 = vmatpush1.bf16.msra.mxu1 %v4303_v56  ;;  %v4337_v56 = vpack.c.bf16 %v1778_v53, %v1776_v55  ;;  %v1809_v55 = vld [vmem:[%s8076_s7 + $0x4d0] sm:$0xff]  ;;  %v1812_v53 = vld [vmem:[%s8076_s7 + $0x4e8] sm:$0xff] }
 0x723   :  { %4306 = vmatprep.subr.bf16.mxu1 %v4305_v7  ;;  %v1775_v7 = vld [vmem:[%s8076_s7 + $0x3c0] sm:$0xff] }
 0x724   :  { %v4339_v62 = vpack.c.bf16 %v1777_v57, %v1775_v7  ;;  %v1811_v57 = vld [vmem:[%s8076_s7 + $0x4e0] sm:$0xff] }
 0x726   :  { %4308 = vmatpush1.bf16.msra.mxu1 %v4307_v47  ;;  %v4341_v47 = vpack.c.bf16 %v1782_v11, %v1780_v48  ;;  %v1813_v48 = vld [vmem:[%s8076_s7 + $0x4f0] sm:$0xff]  ;;  %v1816_v11 = vld [vmem:[%s8076_s7 + $0x508] sm:$0xff] }
 0x727   :  { %4310 = vmatprep.subr.bf16.mxu1 %v4309_v63  ;;  %v1779_v63 = vld [vmem:[%s8076_s7 + $0x3e0] sm:$0xff] }
 0x728   :  { %v4343_v4 = vpack.c.bf16 %v1781_v15, %v1779_v63  ;;  %v1815_v15 = vld [vmem:[%s8076_s7 + $0x500] sm:$0xff] }
 0x72a   :  { %4312 = vmatpush1.bf16.msra.mxu1 %v4311_v5  ;;  %v4345_v5 = vpack.c.bf16 %v1786_v58, %v1784_v1  ;;  %v1817_v1 = vld [vmem:[%s8076_s7 + $0x510] sm:$0xff]  ;;  %v1820_v58 = vld [vmem:[%s8076_s7 + $0x528] sm:$0xff] }
 0x72b   :  { %4314 = vmatprep.subr.bf16.mxu1 %v4313_v6  ;;  %v1783_v6 = vld [vmem:[%s8076_s7 + $0x400] sm:$0xff] }
 0x72c   :  { %v4347_v19 = vpack.c.bf16 %v1785_v8, %v1783_v6  ;;  %v1819_v8 = vld [vmem:[%s8076_s7 + $0x520] sm:$0xff] }
 0x72e   :  { %4316 = vmatpush1.bf16.msra.mxu1 %v4315_v27  ;;  %v4349_v27 = vpack.c.bf16 %v1790_v10, %v1788_v9  ;;  %v1821_v9 = vld [vmem:[%s8076_s7 + $0x530] sm:$0xff]  ;;  %v1824_v10 = vld [vmem:[%s8076_s7 + $0x548] sm:$0xff] }
 0x72f   :  { %4318 = vmatprep.subr.bf16.mxu1 %v4317_v35  ;;  %v1787_v35 = vld [vmem:[%s8076_s7 + $0x420] sm:$0xff] }
 0x730   :  { %v4351_v20 = vpack.c.bf16 %v1789_v39, %v1787_v35  ;;  %v1823_v39 = vld [vmem:[%s8076_s7 + $0x540] sm:$0xff] }
 0x732   :  { %4320 = vmatpush1.bf16.msra.mxu1 %v4319_v22  ;;  %v4353_v22 = vpack.c.bf16 %v1794_v16, %v1792_v14  ;;  %v1825_v14 = vld [vmem:[%s8076_s7 + $0x550] sm:$0xff]  ;;  %v1828_v16 = vld [vmem:[%s8076_s7 + $0x568] sm:$0xff] }
 0x733   :  { %4322 = vmatprep.subr.bf16.mxu1 %v4321_v24  ;;  %v1791_v24 = vld [vmem:[%s8076_s7 + $0x440] sm:$0xff] }
 0x736   :  { %4324 = vmatpush1.bf16.msra.mxu1 %v4323_v61  ;;  %v1797_v61 = vld [vmem:[%s8076_s7 + $0x470] sm:$0xff] }
 0x737   :  { %4326 = vmatprep.subr.bf16.mxu1 %v4325_v31  ;;  %v1800_v31 = vld [vmem:[%s8076_s7 + $0x488] sm:$0xff] }
 0x73a   :  { %4328 = vmatpush1.bf16.msra.mxu1 %v4327_v21  ;;  %v1806_v21 = vld [vmem:[%s8076_s7 + $0x4b8] sm:$0xff] }
 0x73b   :  { %4330 = vmatprep.subr.bf16.mxu1 %v4329_v36  ;;  %v4363_v36 = vpack.c.bf16 %v1801_v25, %v1799_v17  ;;  %v4365_v37 = vpack.c.bf16 %v1806_v21, %v1804_v29  ;;  %v1835_v25 = vld [vmem:[%s8076_s7 + $0x5a0] sm:$0xff]  ;;  %v1837_v29 = vld [vmem:[%s8076_s7 + $0x5b0] sm:$0xff]  ;;  %v1840_v21 = vld [vmem:[%s8076_s7 + $0x5c8] sm:$0xff] }
 0x73e   :  { %4332 = vmatpush1.bf16.msra.mxu1 %v4331_v45  ;;  %v1810_v45 = vld [vmem:[%s8076_s7 + $0x4d8] sm:$0xff] }
 0x73f   :  { %4334 = vmatprep.subr.bf16.mxu1 %v4333_v46  ;;  %v4367_v46 = vpack.c.bf16 %v1805_v43, %v1803_v42  ;;  %v4369_v51 = vpack.c.bf16 %v1810_v45, %v1808_v44  ;;  %v1839_v43 = vld [vmem:[%s8076_s7 + $0x5c0] sm:$0xff]  ;;  %v1841_v44 = vld [vmem:[%s8076_s7 + $0x5d0] sm:$0xff]  ;;  %v1844_v45 = vld [vmem:[%s8076_s7 + $0x5e8] sm:$0xff] }
 0x742   :  { %4336 = vmatpush1.bf16.msra.mxu1 %v4335_v54  ;;  %v1814_v54 = vld [vmem:[%s8076_s7 + $0x4f8] sm:$0xff] }
 0x743   :  { %4338 = vmatprep.subr.bf16.mxu1 %v4337_v56  ;;  %v4371_v56 = vpack.c.bf16 %v1809_v55, %v1807_v2  ;;  %v4373_v7 = vpack.c.bf16 %v1814_v54, %v1812_v53  ;;  %v1843_v55 = vld [vmem:[%s8076_s7 + $0x5e0] sm:$0xff]  ;;  %v1845_v53 = vld [vmem:[%s8076_s7 + $0x5f0] sm:$0xff] }
 0x744   :  { %v4407_v54 = vpack.c.bf16 %v1845_v53, %v1843_v55 }
 0x746   :  { %4340 = vmatpush1.bf16.msra.mxu1 %v4339_v62  ;;  %v1818_v62 = vld [vmem:[%s8076_s7 + $0x518] sm:$0xff] }
 0x747   :  { %4342 = vmatprep.subr.bf16.mxu1 %v4341_v47  ;;  %v4375_v47 = vpack.c.bf16 %v1813_v48, %v1811_v57  ;;  %v4377_v63 = vpack.c.bf16 %v1818_v62, %v1816_v11  ;;  %v2116_v48 = vld [vmem:[%s8078_s17 + $0x30] sm:$0xff]  ;;  %v2135_v11 = vld [vmem:[%s8078_s17 + $0xc8] sm:$0xff] }
 0x74a   :  { %4344 = vmatpush1.bf16.msra.mxu1 %v4343_v4  ;;  %v1822_v4 = vld [vmem:[%s8076_s7 + $0x538] sm:$0xff] }
 0x74b   :  { %4346 = vmatprep.subr.bf16.mxu1 %v4345_v5  ;;  %v4379_v5 = vpack.c.bf16 %v1817_v1, %v1815_v15  ;;  %v4381_v6 = vpack.c.bf16 %v1822_v4, %v1820_v58  ;;  %v2136_v1 = vld [vmem:[%s8078_s17 + $0xd0] sm:$0xff]  ;;  %v2137_v58 = vld [vmem:[%s8078_s17 + $0xd8] sm:$0xff] }
 0x74c   :  { %v6976_v4 = vpack.c.bf16 %v2137_v58, %v2136_v1  ;;  %v2297_v58 = vld [vmem:[%s8079_s18 + $0x20] sm:$0xff] }
 0x74d   :  { %1989 = vmatmul.mubr.f32.vlgmr.msra.gmra.mrb[40].mxu1 %v6529_v18  ;;  %v1798_v18 = vld [vmem:[%s8076_s7 + $0x478] sm:$0xff] }
 0x74e   :  { %4348 = vmatpush1.bf16.msra.mxu1 %v4347_v19  ;;  %1994 = vmatprep.mubr.f32.mxu1 %v6579_v40  ;;  %v4355_v40 = vpack.c.bf16 %v1793_v26, %v1791_v24  ;;  %v4357_v32 = vpack.c.bf16 %v1798_v18, %v1796_v28  ;;  %v1826_v19 = vld [vmem:[%s8076_s7 + $0x558] sm:$0xff]  ;;  %v1827_v26 = vld [vmem:[%s8076_s7 + $0x560] sm:$0xff]  ;;  %v1829_v28 = vld [vmem:[%s8076_s7 + $0x570] sm:$0xff] }
 0x74f   :  { %4350 = vmatprep.subr.bf16.mxu1 %v4349_v27  ;;  %v4383_v27 = vpack.c.bf16 %v1821_v9, %v1819_v8  ;;  %v4385_v35 = vpack.c.bf16 %v1826_v19, %v1824_v10  ;;  %v1832_v18 = vld [vmem:[%s8076_s7 + $0x588] sm:$0xff]  ;;  %v2138_v9 = vld [vmem:[%s8078_s17 + $0xe0] sm:$0xff] }
 0x750   :  { %v2139_v10 = vld [vmem:[%s8078_s17 + $0xe8] sm:$0xff] }
 0x751   :  { %1995 = vmatmul.mubr.f32.gmra.mrb[42].mxu1 %v6571_v33  ;;  %v1802_v33 = vld [vmem:[%s8076_s7 + $0x498] sm:$0xff]  ;;  %v4433_v19 = vpack.c.bf16 %v2139_v10, %v2138_v9  ;;  %v2301_v10 = vld [vmem:[%s8079_s18 + $0x40] sm:$0xff] }
 0x752   :  { %4352 = vmatpush1.bf16.msra.mxu1 %v4351_v20  ;;  %2065 = vmatprep.mubr.f32.mxu1 %v6607_v52  ;;  %v4359_v52 = vpack.c.bf16 %v1797_v61, %v1795_v60  ;;  %v4361_v13 = vpack.c.bf16 %v1802_v33, %v1800_v31  ;;  %v1830_v20 = vld [vmem:[%s8076_s7 + $0x578] sm:$0xff]  ;;  %v1831_v61 = vld [vmem:[%s8076_s7 + $0x580] sm:$0xff]  ;;  %v1833_v31 = vld [vmem:[%s8076_s7 + $0x590] sm:$0xff] }
 0x753   :  { %4354 = vmatprep.subr.bf16.mxu1 %v4353_v22  ;;  %v4387_v22 = vpack.c.bf16 %v1825_v14, %v1823_v39  ;;  %v4389_v24 = vpack.c.bf16 %v1830_v20, %v1828_v16  ;;  %v1836_v33 = vld [vmem:[%s8076_s7 + $0x5a8] sm:$0xff]  ;;  %v2140_v14 = vld [vmem:[%s8078_s17 + $0xf0] sm:$0xff]  ;;  %v2141_v16 = vld [vmem:[%s8078_s17 + $0xf8] sm:$0xff] }
 0x754   :  { %v4437_v20 = vpack.c.bf16 %v2141_v16, %v2140_v14  ;;  %v2305_v16 = vld [vmem:[%s8079_s18 + $0x60] sm:$0xff] }
 0x756   :  { %4356 = vmatpush1.bf16.msra.mxu1 %v4355_v40  ;;  %v1834_v40 = vld [vmem:[%s8076_s7 + $0x598] sm:$0xff] }
 0x757   :  { %4358 = vmatprep.subr.bf16.mxu1 %v4357_v32  ;;  %v4391_v32 = vpack.c.bf16 %v1829_v28, %v1827_v26  ;;  %v4393_v60 = vpack.c.bf16 %v1834_v40, %v1832_v18 }
 0x75a   :  { %4360 = vmatpush1.bf16.msra.mxu1 %v4359_v52  ;;  %v1838_v52 = vld [vmem:[%s8076_s7 + $0x5b8] sm:$0xff] }
 0x75b   :  { %4362 = vmatprep.subr.bf16.mxu1 %v4361_v13  ;;  %v4395_v13 = vpack.c.bf16 %v1833_v31, %v1831_v61  ;;  %v4397_v17 = vpack.c.bf16 %v1838_v52, %v1836_v33 }
 0x75e   :  { %4364 = vmatpush1.bf16.msra.mxu1 %v4363_v36  ;;  %v1842_v36 = vld [vmem:[%s8076_s7 + $0x5d8] sm:$0xff] }
 0x75f   :  { %4366 = vmatprep.subr.bf16.mxu1 %v4365_v37  ;;  %v4399_v37 = vpack.c.bf16 %v1837_v29, %v1835_v25  ;;  %v4401_v42 = vpack.c.bf16 %v1842_v36, %v1840_v21 }
 0x762   :  { %4368 = vmatpush1.bf16.msra.mxu1 %v4367_v46  ;;  %v1846_v46 = vld [vmem:[%s8076_s7 + $0x5f8] sm:$0xff] }
 0x763   :  { %4370 = vmatprep.subr.bf16.mxu1 %v4369_v51  ;;  %v4403_v51 = vpack.c.bf16 %v1841_v44, %v1839_v43  ;;  %v4405_v2 = vpack.c.bf16 %v1846_v46, %v1844_v45 }
 0x766   :  { %4372 = vmatpush1.bf16.msra.mxu1 %v4371_v56  ;;  %v2132_v56 = vld [vmem:[%s8078_s17 + $0xb0] sm:$0xff] }
 0x767   :  { %4374 = vmatprep.subr.bf16.mxu1 %v4373_v7  ;;  %v2133_v7 = vld [vmem:[%s8078_s17 + $0xb8] sm:$0xff] }
 0x768   :  { %v6940_v57 = vpack.c.bf16 %v2133_v7, %v2132_v56 }
 0x76a   :  { %4376 = vmatpush1.bf16.msra.mxu1 %v4375_v47  ;;  %4422 = vmatprep.subr.bf16.mxu0 %v6940_v57  ;;  %v2118_v47 = vld [vmem:[%s8078_s17 + $0x40] sm:$0xff] }
 0x76b   :  { %4378 = vmatprep.subr.bf16.mxu1 %v4377_v63  ;;  %v2119_v63 = vld [vmem:[%s8078_s17 + $0x48] sm:$0xff] }
 0x76c   :  { %v6966_v15 = vpack.c.bf16 %v2119_v63, %v2118_v47  ;;  %v2298_v47 = vld [vmem:[%s8079_s18 + $0x28] sm:$0xff]  ;;  %v2300_v63 = vld [vmem:[%s8079_s18 + $0x38] sm:$0xff] }
 0x76d   :  { %v7065_v1 = vpack.c.bf16 %v2300_v63, %v2298_v47  ;;  %v2290_v47 = vld [vmem:[%s8081_s12] sm:$0x1] }
 0x76e   :  { %4380 = vmatpush1.bf16.msra.mxu1 %v4379_v5  ;;  %v2120_v5 = vld [vmem:[%s8078_s17 + $0x50] sm:$0xff] }
 0x76f   :  { %4382 = vmatprep.subr.bf16.mxu1 %v4381_v6  ;;  %v2121_v6 = vld [vmem:[%s8078_s17 + $0x58] sm:$0xff] }
 0x770   :  { %v6984_v8 = vpack.c.bf16 %v2121_v6, %v2120_v5  ;;  %v2302_v5 = vld [vmem:[%s8079_s18 + $0x48] sm:$0xff]  ;;  %v2304_v6 = vld [vmem:[%s8079_s18 + $0x58] sm:$0xff] }
 0x771   :  { %v7083_v9 = vpack.c.bf16 %v2304_v6, %v2302_v5 }
 0x772   :  { %4384 = vmatpush1.bf16.msra.mxu1 %v4383_v27  ;;  %v2122_v27 = vld [vmem:[%s8078_s17 + $0x60] sm:$0xff] }
 0x773   :  { %4386 = vmatprep.subr.bf16.mxu1 %v4385_v35  ;;  %v2123_v35 = vld [vmem:[%s8078_s17 + $0x68] sm:$0xff] }
 0x774   :  { %v4435_v39 = vpack.c.bf16 %v2123_v35, %v2122_v27  ;;  %v2306_v35 = vld [vmem:[%s8079_s18 + $0x68] sm:$0xff] }
 0x776   :  { %4388 = vmatpush1.bf16.msra.mxu1 %v4387_v22  ;;  %v2124_v22 = vld [vmem:[%s8078_s17 + $0x70] sm:$0xff] }
 0x777   :  { %4390 = vmatprep.subr.bf16.mxu1 %v4389_v24  ;;  %v2125_v24 = vld [vmem:[%s8078_s17 + $0x78] sm:$0xff] }
 0x778   :  { %v4439_v26 = vpack.c.bf16 %v2125_v24, %v2124_v22  ;;  %v2310_v24 = vld [vmem:[%s8079_s18 + $0x88] sm:$0xff] }
 0x77a   :  { %4392 = vmatpush1.bf16.msra.mxu1 %v4391_v32 }
 0x77b   :  { %4394 = vmatprep.subr.bf16.mxu1 %v4393_v60 }
 0x77e   :  { %4396 = vmatpush1.bf16.msra.mxu1 %v4395_v13 }
 0x77f   :  { %4398 = vmatprep.subr.bf16.mxu1 %v4397_v17 }
 0x782   :  { %4400 = vmatpush1.bf16.msra.mxu1 %v4399_v37 }
 0x783   :  { %4402 = vmatprep.subr.bf16.mxu1 %v4401_v42 }
 0x786   :  { %4404 = vmatpush1.bf16.msra.mxu1 %v4403_v51 }
 0x787   :  { %4406 = vmatprep.subr.bf16.mxu1 %v4405_v2 }
 0x78a   :  { %4408 = vmatpush1.bf16.msra.mxu1 %v4407_v54 }
 0x78d   :  { %2066 = vmatmul.mubr.f32.vlgmr.msra.gmra.mrb[40].mxu1 %v6596_v49  ;;  %v2117_v49 = vld [vmem:[%s8078_s17 + $0x38] sm:$0xff] }
 0x78e   :  { %2071 = vmatprep.mubr.f32.mxu1 %v6625_v59  ;;  %v6948_v59 = vpack.c.bf16 %v2117_v49, %v2116_v48 }
 0x790   :  { %4424 = vmatpush3.bf16.msra.mxu0 %v6948_v59 }
 0x791   :  { %2072 = vmatmul.mubr.f32.gmra.mrb[42].mxu1 %v6616_v23  ;;  %v2134_v23 = vld [vmem:[%s8078_s17 + $0xc0] sm:$0xff] }
 0x792   :  { %v6958_v62 = vpack.c.bf16 %v2135_v11, %v2134_v23 }
 0x794   :  { %4426 = vmatprep.subr.bf16.mxu0 %v6958_v62 }
 0x795   :  { %4428 = vmatpush3.bf16.msra.mxu0 %v6966_v15 }
 0x796   :  { %4430 = vmatprep.subr.bf16.mxu0 %v6976_v4 }
 0x799   :  { %4432 = vmatpush3.bf16.msra.mxu0 %v6984_v8 }
 0x79a   :  { %4434 = vmatprep.subr.bf16.mxu0 %v4433_v19 }
 0x79d   :  { %4436 = vmatpush3.bf16.msra.mxu0 %v4435_v39 }
 0x79e   :  { %4438 = vmatprep.subr.bf16.mxu0 %v4437_v20 }
 0x7a1   :  { %4440 = vmatpush3.bf16.msra.mxu0 %v4439_v26 }
 0x7a2   :  { %4442 = vmatprep.subr.bf16.mxu0 %v6540_v30 }
 0x860   :  { %v7013_v28 = vpop.f32.mrb[40].mxu1 }
 0x861   :  { %v7015_v18 = vpop.f32.mrb[41].mxu1  ;;  %v2092_v32 = vmul.f32 %v7013_v28, %v7013_v28 }
 0x862   :  { %v2093_v30 = vmul.f32 %v7015_v18, %v7015_v18 }
 0x864   :  { %v7017_v40 = vpop.f32.mrb[42].mxu1 }
 0x865   :  { %v2078_v60 = vadd.f32 %v7017_v40, %v7013_v28  ;;  %v2094_v61 = vmul.f32 %v7017_v40, %v7017_v40  ;;  %v7025_v31 = vpop.f32.mrb[43].mxu1 }
 0x866   :  { %v2085_v33 = vadd.f32 %v7025_v31, %v7015_v18  ;;  %v2095_v52 = vmul.f32 %v7025_v31, %v7025_v31 }
 0x867   :  { %v2079_v13 = vrot.slane %v2078_v60, 4  ;;  %v2096_v17 = vadd.f32 %v2094_v61, %v2092_v32  ;;  %v2311_v61 = vld [vmem:[%s8079_s18 + $0x90] sm:$0xff] }
 0x868   :  { %v2086_v25 = vrot.slane %v2085_v33, 4  ;;  %v2103_v29 = vadd.f32 %v2095_v52, %v2093_v30  ;;  %v2316_v52 = vld [vmem:[%s8079_s18 + $0xb8] sm:$0xff] }
 0x869   :  { %v2080_v21 = vadd.f32 %v2079_v13, %v2078_v60  ;;  %v2097_v49 = vrot.slane %v2096_v17, 4  ;;  %v2309_v60 = vld [vmem:[%s8079_s18 + $0x80] sm:$0xff] }
 0x86a   :  { %v2087_v36 = vadd.f32 %v2086_v25, %v2085_v33  ;;  %v2104_v37 = vrot.slane %v2103_v29, 4  ;;  %v4491_v30 = vpack.c.bf16 %v2311_v61, %v2309_v60  ;;  %v2314_v33 = vld [vmem:[%s8079_s18 + $0xa8] sm:$0xff]  ;;  %v2315_v25 = vld [vmem:[%s8079_s18 + $0xb0] sm:$0xff] }
 0x86b   :  { %v2081_v42 = vrot.slane %v2080_v21, 2  ;;  %v2098_v23 = vadd.f32 %v2097_v49, %v2096_v17  ;;  %v4493_v13 = vpack.c.bf16 %v2316_v52, %v2314_v33  ;;  %v2313_v17 = vld [vmem:[%s8079_s18 + $0xa0] sm:$0xff] }
 0x86c   :  { %v2088_v43 = vrot.slane %v2087_v36, 2  ;;  %v2105_v44 = vadd.f32 %v2104_v37, %v2103_v29  ;;  %v4495_v29 = vpack.c.bf16 %v2315_v25, %v2313_v17  ;;  %v2317_v37 = vld [vmem:[%s8079_s18 + $0xc0] sm:$0xff]  ;;  %v2609_v17 = vld [vmem:[%s8082_s8 + $0x10] sm:$0xff]  ;;  %v2612_v25 = vld [vmem:[%s8082_s8 + $0x28] sm:$0xff] }
 0x86d   :  { %v2082_v45 = vadd.f32 %v2081_v42, %v2080_v21  ;;  %v2318_v21 = vld [vmem:[%s8079_s18 + $0xc8] sm:$0xff] }
 0x86e   :  { %v2089_v46 = vadd.f32 %v2088_v43, %v2087_v36  ;;  %v2106_v51 = vrot.slane %v2105_v44, 2  ;;  %v2320_v36 = vld [vmem:[%s8079_s18 + $0xd8] sm:$0xff]  ;;  %v2319_v43 = vld [vmem:[%s8079_s18 + $0xd0] sm:$0xff] }
 0x86f   :  { %v2083_v2 = vrot.slane %v2082_v45, 1  ;;  %v4497_v42 = vpack.c.bf16 %v2320_v36, %v2318_v21  ;;  %v2499_v21 = vld [vmem:[%s8083_s4] sm:$0xff] }
 0x870   :  { %v2090_v55 = vrot.slane %v2089_v46, 1  ;;  %v2107_v53 = vadd.f32 %v2106_v51, %v2105_v44  ;;  %v2322_v44 = vld [vmem:[%s8079_s18 + $0xe8] sm:$0xff] }
 0x871   :  { %v2084_v7 = vadd.f32 %v2083_v2, %v2082_v45  ;;  %v2324_v45 = vld [vmem:[%s8079_s18 + $0xf8] sm:$0xff]  ;;  %v2321_v2 = vld [vmem:[%s8079_s18 + $0xe0] sm:$0xff] }
 0x872   :  { %v2091_v54 = vadd.f32 %v2090_v55, %v2089_v46  ;;  %v2108_v56 = vrot.slane %v2107_v53, 1  ;;  %v4499_v46 = vpack.c.bf16 %v2319_v43, %v2317_v37  ;;  %v4501_v51 = vpack.c.bf16 %v2324_v45, %v2322_v44  ;;  %v2323_v55 = vld [vmem:[%s8079_s18 + $0xf0] sm:$0xff]  ;;  %v2616_v44 = vld [vmem:[%s8082_s8 + $0x48] sm:$0xff]  ;;  %v2618_v45 = vld [vmem:[%s8082_s8 + $0x58] sm:$0xff] }
 0x873   :  { %v2613_v43 = vld [vmem:[%s8082_s8 + $0x30] sm:$0xff] }
 0x874   :  { %2206 = vmatprep.mubr.f32.mxu0 %v2091_v54  ;;  %v2109_v48 = vadd.f32 %v2108_v56, %v2107_v53  ;;  %v4503_v53 = vpack.c.bf16 %v2323_v55, %v2321_v2  ;;  %v4549_v2 = vpack.c.bf16 %v2618_v45, %v2616_v44  ;;  %v2615_v55 = vld [vmem:[%s8082_s8 + $0x40] sm:$0xff]  ;;  %v2656_v44 = vld [vmem:[%s8082_s8 + $0x188] sm:$0xff]  ;;  %v2658_v45 = vld [vmem:[%s8082_s8 + $0x198] sm:$0xff] }
 0x875   :  { %2207 = vmatmul.mubr.f32.vlgmr.msra.gmra.mrb[24].mxu0 %v2084_v7 }
 0x876   :  { %4444 = vmatpush3.bf16.msra.mxu0 %v6551_v3  ;;  %2276 = vmatprep.mubr.f32.mxu0 %v2109_v48  ;;  %v2099_v3 = vrot.slane %v2098_v23, 2 }
 0x877   :  { %4446 = vmatprep.subr.bf16.mxu0 %v6553_v12 }
 0x878   :  { %v2100_v12 = vadd.f32 %v2099_v3, %v2098_v23 }
 0x87a   :  { %4448 = vmatpush3.bf16.msra.mxu0 %v6574_v34  ;;  %v2101_v34 = vrot.slane %v2100_v12, 1 }
 0x87b   :  { %4450 = vmatprep.subr.bf16.mxu0 %v6582_v41 }
 0x87c   :  { %v2102_v41 = vadd.f32 %v2101_v34, %v2100_v12 }
 0x87e   :  { %4452 = vmatpush3.bf16.msra.mxu0 %v6599_v50  ;;  %v2294_v50 = vld [vmem:[%s8079_s18 + $0x8] sm:$0xff] }
 0x87f   :  { %4454 = vmatprep.subr.bf16.mxu0 %v6940_v57  ;;  %v2296_v57 = vld [vmem:[%s8079_s18 + $0x18] sm:$0xff] }
 0x880   :  { %v4473_v11 = vpack.c.bf16 %v2296_v57, %v2294_v50  ;;  %v2286_v57 = vld [vmem:[%s8080_s11] sm:$0x1] }
 0x882   :  { %4456 = vmatpush3.bf16.msra.mxu0 %v6948_v59  ;;  %v2293_v59 = vld [vmem:[%s8079_s18] sm:$0xff] }
 0x883   :  { %4458 = vmatprep.subr.bf16.mxu0 %v6958_v62  ;;  %v2295_v62 = vld [vmem:[%s8079_s18 + $0x10] sm:$0xff] }
 0x886   :  { %4460 = vmatpush3.bf16.msra.mxu0 %v6966_v15  ;;  %v7063_v15 = vpack.c.bf16 %v2295_v62, %v2293_v59 }
 0x887   :  { %4462 = vmatprep.subr.bf16.mxu0 %v6976_v4  ;;  %v2299_v4 = vld [vmem:[%s8079_s18 + $0x30] sm:$0xff] }
 0x88a   :  { %4464 = vmatpush3.bf16.msra.mxu0 %v6984_v8  ;;  %v7080_v8 = vpack.c.bf16 %v2299_v4, %v2297_v58 }
 0x88b   :  { %4466 = vmatprep.subr.bf16.mxu0 %v4433_v19  ;;  %v2303_v19 = vld [vmem:[%s8079_s18 + $0x50] sm:$0xff] }
 0x88c   :  { %v7092_v27 = vpack.c.bf16 %v2303_v19, %v2301_v10 }
 0x88e   :  { %4468 = vmatpush3.bf16.msra.mxu0 %v4435_v39  ;;  %v2308_v39 = vld [vmem:[%s8079_s18 + $0x78] sm:$0xff] }
 0x88f   :  { %4470 = vmatprep.subr.bf16.mxu0 %v4437_v20  ;;  %v4485_v14 = vpack.c.bf16 %v2308_v39, %v2306_v35  ;;  %v2307_v20 = vld [vmem:[%s8079_s18 + $0x70] sm:$0xff] }
 0x890   :  { %v4487_v22 = vpack.c.bf16 %v2307_v20, %v2305_v16 }
 0x892   :  { %4472 = vmatpush3.bf16.msra.mxu0 %v4439_v26  ;;  %v2312_v26 = vld [vmem:[%s8079_s18 + $0x98] sm:$0xff] }
 0x893   :  { %4474 = vmatprep.subr.bf16.mxu0 %v4473_v11  ;;  %v4489_v32 = vpack.c.bf16 %v2312_v26, %v2310_v24 }
 0x895   :  { %2277 = vmatmul.mubr.f32.vlgmr.msra.gmra.mrb[26].mxu0 %v2102_v41 }
 0x896   :  { %2389 = vmatprep.mubr.f32.mxu0 %v4896_v0  ;;  %4476 = vmatpush1.bf16.msra.mxu0 %v7063_v15 }
 0x897   :  { %4478 = vmatprep.subr.bf16.mxu0 %v7065_v1 }
 0x89a   :  { %4480 = vmatpush1.bf16.msra.mxu0 %v7080_v8 }
 0x89b   :  { %4482 = vmatprep.subr.bf16.mxu0 %v7083_v9 }
 0x89e   :  { %4484 = vmatpush1.bf16.msra.mxu0 %v7092_v27 }
 0x89f   :  { %4486 = vmatprep.subr.bf16.mxu0 %v4485_v14 }
 0x8a2   :  { %4488 = vmatpush1.bf16.msra.mxu0 %v4487_v22 }
 0x8a3   :  { %4490 = vmatprep.subr.bf16.mxu0 %v4489_v32 }
 0x8a6   :  { %4492 = vmatpush1.bf16.msra.mxu0 %v4491_v30 }
 0x8a7   :  { %4494 = vmatprep.subr.bf16.mxu0 %v4493_v13 }
 0x8aa   :  { %4496 = vmatpush1.bf16.msra.mxu0 %v4495_v29 }
 0x8ab   :  { %4498 = vmatprep.subr.bf16.mxu0 %v4497_v42 }
 0x8ae   :  { %4500 = vmatpush1.bf16.msra.mxu0 %v4499_v46 }
 0x8af   :  { %4502 = vmatprep.subr.bf16.mxu0 %v4501_v51 }
 0x8b2   :  { %4504 = vmatpush1.bf16.msra.mxu0 %v4503_v53 }
 0x8b3   :  { %4506 = vmatprep.subr.bf16.mxu0 %v4473_v11 }
 0x948   :  { %v3666_v54 = vpop.f32.mrb[24].mxu0 }
 0x949   :  { %v3667_v56 = vpop.f32.mrb[25].mxu0 }
 0x94a   :  { %v3668_v7 = vadd.f32 %v3667_v56, %v3666_v54  ;;  %v2620_v54 = vld [vmem:[%s8082_s8 + $0x68] sm:$0xff]  ;;  %v2622_v56 = vld [vmem:[%s8082_s8 + $0x78] sm:$0xff] }
 0x94c   :  { %v2282_v48 = vmul.f32 0.02, %v3668_v7  ;;  %v2501_v7 = vld [vmem:[%s8083_s4 + $0x10] sm:$0xff] }
 0x94e   :  { %v2284_v12 = vmul.f32 %v2282_v48, %v2282_v48 }
 0x968   :  { %v3701_v49 = vpop.f32.mrb[26].mxu0 }
 0x969   :  { %v3702_v23 = vpop.f32.mrb[27].mxu0 }
 0x96a   :  { %v3703_v3 = vadd.f32 %v3702_v23, %v3701_v49  ;;  %v4553_v49 = vpack.c.bf16 %v2622_v56, %v2620_v54  ;;  %v2619_v23 = vld [vmem:[%s8082_s8 + $0x60] sm:$0xff]  ;;  %v2662_v54 = vld [vmem:[%s8082_s8 + $0x1b8] sm:$0xff] }
 0x96c   :  { %v2283_v34 = vmul.f32 0.02, %v3703_v3  ;;  %v2621_v3 = vld [vmem:[%s8082_s8 + $0x70] sm:$0xff] }
 0x96e   :  { %v2285_v41 = vsub.f32 %v2283_v34, %v2284_v12  ;;  %v2624_v12 = vld [vmem:[%s8082_s8 + $0x88] sm:$0xff]  ;;  %v2626_v34 = vld [vmem:[%s8082_s8 + $0x98] sm:$0xff] }
 0x970   :  { %v2287_v50 = vadd.f32 1e-05, %v2285_v41  ;;  %v4555_v41 = vpack.c.bf16 %v2621_v3, %v2619_v23  ;;  %v2664_v23 = vld [vmem:[%s8082_s8 + $0x1c8] sm:$0xff]  ;;  %v2666_v3 = vld [vmem:[%s8082_s8 + $0x1d8] sm:$0xff] }
 0x972   :  { %4888 = vrsqrt.f32 %v2287_v50  ;;  %v4557_v50 = vpack.c.bf16 %v2626_v34, %v2624_v12  ;;  %v4597_v34 = vpack.c.bf16 %v2666_v3, %v2664_v23  ;;  %v3061_v23 = vld [vmem:[%s8084_s19 + $0xb8] sm:$0xff] }
 0x97c   :  { %v4889_v59 = vpop.eup %4888 }
 0x97d   :  { %v2289_v62 = vmul.f32 %v4889_v59, %v2286_v57  ;;  %v2623_v57 = vld [vmem:[%s8082_s8 + $0x80] sm:$0xff]  ;;  %v2625_v59 = vld [vmem:[%s8082_s8 + $0x90] sm:$0xff] }
 0x97f   :  { %2390 = vmatmul.mubr.f32.vlgmr.msra.gmra.mrb[28].mxu0 %v2289_v62  ;;  %v2291_v11 = vmul.f32 %v2289_v62, %v2282_v48  ;;  %v2628_v62 = vld [vmem:[%s8082_s8 + $0xa8] sm:$0xff] }
 0x980   :  { %4508 = vmatpush1.bf16.msra.mxu0 %v7063_v15  ;;  %2460 = vmatprep.mubr.f32.mxu0 %v4896_v0 }
 0x981   :  { %4510 = vmatprep.subr.bf16.mxu0 %v7065_v1  ;;  %v2292_v63 = vsub.f32 %v2290_v47, %v2291_v11  ;;  %v2630_v11 = vld [vmem:[%s8082_s8 + $0xb8] sm:$0xff]  ;;  %v4559_v47 = vpack.c.bf16 %v2625_v59, %v2623_v57  ;;  %v2668_v57 = vld [vmem:[%s8082_s8 + $0x1e8] sm:$0xff] }
 0x982   :  { %v2670_v59 = vld [vmem:[%s8082_s8 + $0x1f8] sm:$0xff] }
 0x984   :  { %4512 = vmatpush1.bf16.msra.mxu0 %v7080_v8 }
 0x985   :  { %4514 = vmatprep.subr.bf16.mxu0 %v7083_v9 }
 0x988   :  { %4516 = vmatpush1.bf16.msra.mxu0 %v7092_v27 }
 0x989   :  { %4518 = vmatprep.subr.bf16.mxu0 %v4485_v14 }
 0x98c   :  { %4520 = vmatpush1.bf16.msra.mxu0 %v4487_v22 }
 0x98d   :  { %4522 = vmatprep.subr.bf16.mxu0 %v4489_v32 }
 0x990   :  { %4524 = vmatpush1.bf16.msra.mxu0 %v4491_v30 }
 0x991   :  { %4526 = vmatprep.subr.bf16.mxu0 %v4493_v13  ;;  %v2607_v13 = vld [vmem:[%s8082_s8] sm:$0xff] }
 0x992   :  { %v4543_v36 = vpack.c.bf16 %v2609_v17, %v2607_v13  ;;  %v2647_v17 = vld [vmem:[%s8082_s8 + $0x140] sm:$0xff] }
 0x994   :  { %4528 = vmatpush1.bf16.msra.mxu0 %v4495_v29  ;;  %v2614_v29 = vld [vmem:[%s8082_s8 + $0x38] sm:$0xff] }
 0x995   :  { %4530 = vmatprep.subr.bf16.mxu0 %v4497_v42  ;;  %v4545_v37 = vpack.c.bf16 %v2614_v29, %v2612_v25  ;;  %v2611_v42 = vld [vmem:[%s8082_s8 + $0x20] sm:$0xff]  ;;  %v2649_v25 = vld [vmem:[%s8082_s8 + $0x150] sm:$0xff]  ;;  %v2652_v29 = vld [vmem:[%s8082_s8 + $0x168] sm:$0xff] }
 0x998   :  { %4532 = vmatpush1.bf16.msra.mxu0 %v4499_v46  ;;  %v2500_v46 = vld [vmem:[%s8083_s4 + $0x8] sm:$0xff] }
 0x999   :  { %4534 = vmatprep.subr.bf16.mxu0 %v4501_v51  ;;  %v4547_v51 = vpack.c.bf16 %v2613_v43, %v2611_v42  ;;  %v2651_v42 = vld [vmem:[%s8082_s8 + $0x160] sm:$0xff]  ;;  %v2653_v43 = vld [vmem:[%s8082_s8 + $0x170] sm:$0xff] }
 0x99c   :  { %4536 = vmatpush1.bf16.msra.mxu0 %v4503_v53  ;;  %v2617_v53 = vld [vmem:[%s8082_s8 + $0x50] sm:$0xff] }
 0x99d   :  { %v4551_v48 = vpack.c.bf16 %v2617_v53, %v2615_v55  ;;  %v2657_v55 = vld [vmem:[%s8082_s8 + $0x190] sm:$0xff]  ;;  %v2660_v53 = vld [vmem:[%s8082_s8 + $0x1a8] sm:$0xff] }
 0x99f   :  { %2461 = vmatmul.mubr.f32.vlgmr.msra.gmra.mrb[30].mxu0 %v2292_v63  ;;  %v4561_v63 = vpack.c.bf16 %v2630_v11, %v2628_v62  ;;  %v4601_v11 = vpack.c.bf16 %v2670_v59, %v2668_v57  ;;  %v2692_v57 = vld [vmem:[%s8082_s8 + $0x2a8] sm:$0xff] }
 0x9a0   :  { %2576 = vmatprep.mubr.f32.mxu0 %v4896_v0 }
 0xa52   :  { %v2391_v15 = vpop.f32.mrb[28].mxu0 }
 0xa53   :  { %v2470_v1 = vrot.slane %v2391_v15, %v6242_v38  ;;  %v2393_v58 = vpop.f32.mrb[29].mxu0  ;;  %v2627_v15 = vld [vmem:[%s8082_s8 + $0xa0] sm:$0xff] }
 0xa54   :  { %v2474_v4 = vrot.slane %v2393_v58, %v6242_v38  ;;  %v2632_v58 = vld [vmem:[%s8082_s8 + $0xc8] sm:$0xff] }
 0xa55   :  { %v2475_v5 = vmul.f32 %v2470_v1, %v7013_v28  ;;  %v2477_v6 = vmul.f32 %v2470_v1, %v7017_v40  ;;  %v2629_v1 = vld [vmem:[%s8082_s8 + $0xb0] sm:$0xff] }
 0xa56   :  { %v2476_v8 = vmul.f32 %v2474_v4, %v7015_v18  ;;  %v2478_v9 = vmul.f32 %v2474_v4, %v7025_v31  ;;  %v2608_v18 = vld [vmem:[%s8082_s8 + $0x8] sm:$0xff]  ;;  %v2610_v31 = vld [vmem:[%s8082_s8 + $0x18] sm:$0xff] }
 0xa57   :  { %v4541_v52 = vpack.c.bf16 %v2610_v31, %v2608_v18  ;;  %v2634_v4 = vld [vmem:[%s8082_s8 + $0xd8] sm:$0xff] }
 0xa72   :  { %v2462_v10 = vpop.f32.mrb[30].mxu0 }
 0xa73   :  { %v2482_v19 = vrot.slane %v2462_v10, %v6242_v38  ;;  %v2464_v27 = vpop.f32.mrb[31].mxu0  ;;  %v2636_v10 = vld [vmem:[%s8082_s8 + $0xe8] sm:$0xff] }
 0xa74   :  { %v2486_v35 = vrot.slane %v2464_v27, %v6242_v38 }
 0xa75   :  { %v2487_v39 = vadd.f32 %v2482_v19, %v2475_v5  ;;  %v2489_v14 = vadd.f32 %v2482_v19, %v2477_v6  ;;  %v4563_v5 = vpack.c.bf16 %v2629_v1, %v2627_v15  ;;  %v4565_v6 = vpack.c.bf16 %v2634_v4, %v2632_v58  ;;  %v2638_v19 = vld [vmem:[%s8082_s8 + $0xf8] sm:$0xff]  ;;  %v2672_v1 = vld [vmem:[%s8082_s8 + $0x208] sm:$0xff] }
 0xa76   :  { %v2488_v16 = vadd.f32 %v2486_v35, %v2476_v8  ;;  %v2490_v20 = vadd.f32 %v2486_v35, %v2478_v9  ;;  %v2631_v8 = vld [vmem:[%s8082_s8 + $0xc0] sm:$0xff]  ;;  %v2633_v9 = vld [vmem:[%s8082_s8 + $0xd0] sm:$0xff]  ;;  %v4569_v35 = vpack.c.bf16 %v2638_v19, %v2636_v10  ;;  %v2674_v58 = vld [vmem:[%s8082_s8 + $0x218] sm:$0xff] }
 0xa77   :  { %v2491_v22 = vmul.f32 0.2, %v2487_v39  ;;  %v2493_v24 = vmul.f32 0.2, %v2489_v14  ;;  %v4567_v27 = vpack.c.bf16 %v2633_v9, %v2631_v8  ;;  %v4605_v4 = vpack.c.bf16 %v2674_v58, %v2672_v1  ;;  %v2676_v8 = vld [vmem:[%s8082_s8 + $0x228] sm:$0xff]  ;;  %v2678_v9 = vld [vmem:[%s8082_s8 + $0x238] sm:$0xff] }
 0xa78   :  { %v2492_v26 = vmul.f32 0.2, %v2488_v16  ;;  %v2494_v28 = vmul.f32 0.2, %v2490_v20  ;;  %v2691_v58 = vld [vmem:[%s8082_s8 + $0x2a0] sm:$0xff] }
 0xa79   :  { %v2495_v32 = vmax.f32 %v2487_v39, %v2491_v22  ;;  %v2497_v40 = vmax.f32 %v2489_v14, %v2493_v24  ;;  %v2635_v39 = vld [vmem:[%s8082_s8 + $0xe0] sm:$0xff]  ;;  %v2637_v14 = vld [vmem:[%s8082_s8 + $0xf0] sm:$0xff] }
 0xa7a   :  { %v2496_v60 = vmax.f32 %v2488_v16, %v2492_v26  ;;  %v2498_v61 = vmax.f32 %v2490_v20, %v2494_v28  ;;  %v2640_v16 = vld [vmem:[%s8082_s8 + $0x108] sm:$0xff]  ;;  %v2642_v20 = vld [vmem:[%s8082_s8 + $0x118] sm:$0xff]  ;;  %v4571_v22 = vpack.c.bf16 %v2637_v14, %v2635_v39  ;;  %v2639_v26 = vld [vmem:[%s8082_s8 + $0x100] sm:$0xff] }
 0xa7b   :  { %v4539_v30 = vpack.c.bf16 %v2497_v40, %v2495_v32  ;;  %v4573_v24 = vpack.c.bf16 %v2642_v20, %v2640_v16  ;;  %v2641_v28 = vld [vmem:[%s8082_s8 + $0x110] sm:$0xff]  ;;  %v2644_v32 = vld [vmem:[%s8082_s8 + $0x128] sm:$0xff]  ;;  %v2646_v40 = vld [vmem:[%s8082_s8 + $0x138] sm:$0xff] }
 0xa7c   :  { %v4537_v33 = vpack.c.bf16 %v2498_v61, %v2496_v60  ;;  %v4575_v18 = vpack.c.bf16 %v2641_v28, %v2639_v26  ;;  %v4577_v31 = vpack.c.bf16 %v2646_v40, %v2644_v32  ;;  %v2643_v60 = vld [vmem:[%s8082_s8 + $0x120] sm:$0xff]  ;;  %v2645_v61 = vld [vmem:[%s8082_s8 + $0x130] sm:$0xff]  ;;  %v2680_v16 = vld [vmem:[%s8082_s8 + $0x248] sm:$0xff] }
 0xa7d   :  { %v2675_v39 = vld [vmem:[%s8082_s8 + $0x220] sm:$0xff]  ;;  %v2677_v14 = vld [vmem:[%s8082_s8 + $0x230] sm:$0xff]  ;;  %v2682_v20 = vld [vmem:[%s8082_s8 + $0x258] sm:$0xff] }
 0xa7e   :  { %4538 = vmatprep.subr.bf16.mxu0 %v4537_v33  ;;  %v2650_v33 = vld [vmem:[%s8082_s8 + $0x158] sm:$0xff]  ;;  %v4611_v26 = vpack.c.bf16 %v2677_v14, %v2675_v39  ;;  %v2684_v28 = vld [vmem:[%s8082_s8 + $0x268] sm:$0xff] }
 0xa7f   :  { %4540 = vmatpush1.bf16.msra.mxu0 %v4539_v30  ;;  %v2648_v30 = vld [vmem:[%s8082_s8 + $0x148] sm:$0xff]  ;;  %v2686_v32 = vld [vmem:[%s8082_s8 + $0x278] sm:$0xff] }
 0xa80   :  { %4542 = vmatprep.subr.bf16.mxu0 %v4541_v52  ;;  %v4579_v52 = vpack.c.bf16 %v2645_v61, %v2643_v60  ;;  %v4581_v13 = vpack.c.bf16 %v2650_v33, %v2648_v30  ;;  %v3038_v60 = vld [vmem:[%s8084_s19] sm:$0xff]  ;;  %v4613_v61 = vpack.c.bf16 %v2682_v20, %v2680_v16  ;;  %v2697_v20 = vld [vmem:[%s8082_s8 + $0x2d0] sm:$0xff] }
 0xa81   :  { %v2695_v16 = vld [vmem:[%s8082_s8 + $0x2c0] sm:$0xff] }
 0xa82   :  { %3542 = vmatmul.mubr.msk.f32.vlgmr.msra.gmra.mrb[32].mxu0 %vm2502_vm3, %v2499_v21  ;;  %v2654_v21 = vld [vmem:[%s8082_s8 + $0x178] sm:$0xff] }
 0xa83   :  { %2582 = vmatprep.mubr.f32.mxu0 %v4896_v0  ;;  %4544 = vmatpush1.bf16.msra.mxu0 %v4543_v36  ;;  %v4583_v36 = vpack.c.bf16 %v2649_v25, %v2647_v17  ;;  %v3057_v17 = vld [vmem:[%s8084_s19 + $0x98] sm:$0xff] }
 0xa84   :  { %4546 = vmatprep.subr.bf16.mxu0 %v4545_v37  ;;  %v4585_v37 = vpack.c.bf16 %v2654_v21, %v2652_v29  ;;  %v3040_v21 = vld [vmem:[%s8084_s19 + $0x10] sm:$0xff] }
 0xa86   :  { %3543 = vmatmul.mubr.msk.f32.gmra.mrb[34].mxu0 %vm2502_vm3, %v2500_v46  ;;  %v4587_v46 = vpack.c.bf16 %v2653_v43, %v2651_v42  ;;  %v3059_v42 = vld [vmem:[%s8084_s19 + $0xa8] sm:$0xff] }
 0xa87   :  { %2588 = vmatprep.mubr.f32.mxu0 %v4896_v0  ;;  %4548 = vmatpush1.bf16.msra.mxu0 %v4547_v51  ;;  %v4589_v51 = vpack.c.bf16 %v2658_v45, %v2656_v44  ;;  %v2683_v44 = vld [vmem:[%s8082_s8 + $0x260] sm:$0xff]  ;;  %v2685_v45 = vld [vmem:[%s8082_s8 + $0x270] sm:$0xff] }
 0xa88   :  { %4550 = vmatprep.subr.bf16.mxu0 %v4549_v2  ;;  %v2655_v2 = vld [vmem:[%s8082_s8 + $0x180] sm:$0xff]  ;;  %v4619_v3 = vpack.c.bf16 %v2685_v45, %v2683_v44  ;;  %v2712_v44 = vld [vmem:[%s8082_s8 + $0x348] sm:$0xff]  ;;  %v2714_v45 = vld [vmem:[%s8082_s8 + $0x358] sm:$0xff] }
 0xa89   :  { %v4591_v56 = vpack.c.bf16 %v2657_v55, %v2655_v2  ;;  %v4617_v2 = vpack.c.bf16 %v2686_v32, %v2684_v28  ;;  %v2688_v55 = vld [vmem:[%s8082_s8 + $0x288] sm:$0xff]  ;;  %v2699_v32 = vld [vmem:[%s8082_s8 + $0x2e0] sm:$0xff] }
 0xa8a   :  { %3544 = vmatmul.mubr.msk.f32.gmra.mrb[36].mxu0 %vm2502_vm3, %v2501_v7  ;;  %v4593_v7 = vpack.c.bf16 %v2662_v54, %v2660_v53 }
 0xa8b   :  { %4552 = vmatpush1.bf16.msra.mxu0 %v4551_v48  ;;  %v2659_v48 = vld [vmem:[%s8082_s8 + $0x1a0] sm:$0xff] }
 0xa8c   :  { %4554 = vmatprep.subr.bf16.mxu0 %v4553_v49  ;;  %v2661_v49 = vld [vmem:[%s8082_s8 + $0x1b0] sm:$0xff] }
 0xa8d   :  { %v4595_v12 = vpack.c.bf16 %v2661_v49, %v2659_v48  ;;  %v2690_v48 = vld [vmem:[%s8082_s8 + $0x298] sm:$0xff]  ;;  %v3060_v49 = vld [vmem:[%s8084_s19 + $0xb0] sm:$0xff] }
 0xa8e   :  { %v7511_v59 = vpack.c.bf16 %v3061_v23, %v3060_v49  ;;  %v2718_v49 = vld [vmem:[%s8082_s8 + $0x378] sm:$0xff] }
 0xa8f   :  { %4556 = vmatpush1.bf16.msra.mxu0 %v4555_v41  ;;  %v2663_v41 = vld [vmem:[%s8082_s8 + $0x1c0] sm:$0xff] }
 0xa90   :  { %4558 = vmatprep.subr.bf16.mxu0 %v4557_v50  ;;  %v2665_v50 = vld [vmem:[%s8082_s8 + $0x1d0] sm:$0xff] }
 0xa91   :  { %v4599_v62 = vpack.c.bf16 %v2665_v50, %v2663_v41  ;;  %v4621_v50 = vpack.c.bf16 %v2690_v48, %v2688_v55  ;;  %v4645_v55 = vpack.c.bf16 %v2714_v45, %v2712_v44  ;;  %v2716_v48 = vld [vmem:[%s8082_s8 + $0x368] sm:$0xff]  ;;  %v2746_v44 = vld [vmem:[%s8082_s8 + $0x458] sm:$0xff] }
 0xa93   :  { %4560 = vmatpush1.bf16.msra.mxu0 %v4559_v47  ;;  %v2667_v47 = vld [vmem:[%s8082_s8 + $0x1e0] sm:$0xff] }
 0xa94   :  { %4562 = vmatprep.subr.bf16.mxu0 %v4561_v63  ;;  %v2669_v63 = vld [vmem:[%s8082_s8 + $0x1f0] sm:$0xff] }
 0xa95   :  { %v4603_v15 = vpack.c.bf16 %v2669_v63, %v2667_v47  ;;  %v2694_v47 = vld [vmem:[%s8082_s8 + $0x2b8] sm:$0xff]  ;;  %v3062_v63 = vld [vmem:[%s8084_s19 + $0xc0] sm:$0xff] }
 0xa97   :  { %4564 = vmatpush1.bf16.msra.mxu0 %v4563_v5  ;;  %v2671_v5 = vld [vmem:[%s8082_s8 + $0x200] sm:$0xff] }
 0xa98   :  { %4566 = vmatprep.subr.bf16.mxu0 %v4565_v6  ;;  %v2673_v6 = vld [vmem:[%s8082_s8 + $0x210] sm:$0xff] }
 0xa99   :  { %v4607_v19 = vpack.c.bf16 %v2673_v6, %v2671_v5  ;;  %v4625_v5 = vpack.c.bf16 %v2694_v47, %v2692_v57  ;;  %v2693_v6 = vld [vmem:[%s8082_s8 + $0x2b0] sm:$0xff]  ;;  %v2722_v57 = vld [vmem:[%s8082_s8 + $0x398] sm:$0xff]  ;;  %v2719_v47 = vld [vmem:[%s8082_s8 + $0x380] sm:$0xff] }
 0xa9b   :  { %4568 = vmatpush1.bf16.msra.mxu0 %v4567_v27 }
 0xa9c   :  { %4570 = vmatprep.subr.bf16.mxu0 %v4569_v35  ;;  %v4609_v35 = vpack.c.bf16 %v2678_v9, %v2676_v8  ;;  %v3046_v9 = vld [vmem:[%s8084_s19 + $0x40] sm:$0xff] }
 0xa9f   :  { %4572 = vmatpush1.bf16.msra.mxu0 %v4571_v22  ;;  %v2679_v22 = vld [vmem:[%s8082_s8 + $0x240] sm:$0xff] }
 0xaa0   :  { %4574 = vmatprep.subr.bf16.mxu0 %v4573_v24  ;;  %v2681_v24 = vld [vmem:[%s8082_s8 + $0x250] sm:$0xff] }
 0xaa1   :  { %v4615_v43 = vpack.c.bf16 %v2681_v24, %v2679_v22  ;;  %v2700_v22 = vld [vmem:[%s8082_s8 + $0x2e8] sm:$0xff]  ;;  %v2702_v24 = vld [vmem:[%s8082_s8 + $0x2f8] sm:$0xff] }
 0xaa2   :  { %v4633_v28 = vpack.c.bf16 %v2702_v24, %v2700_v22  ;;  %v2734_v22 = vld [vmem:[%s8082_s8 + $0x3f8] sm:$0xff] }
 0xaa3   :  { %4576 = vmatpush1.bf16.msra.mxu0 %v4575_v18  ;;  %v3054_v18 = vld [vmem:[%s8084_s19 + $0x80] sm:$0xff] }
 0xaa4   :  { %4578 = vmatprep.subr.bf16.mxu0 %v4577_v31  ;;  %v3055_v31 = vld [vmem:[%s8084_s19 + $0x88] sm:$0xff] }
 0xaa5   :  { %v7436_v33 = vpack.c.bf16 %v3055_v31, %v3054_v18  ;;  %v2701_v18 = vld [vmem:[%s8082_s8 + $0x2f0] sm:$0xff]  ;;  %v2704_v31 = vld [vmem:[%s8082_s8 + $0x308] sm:$0xff] }
 0xaa7   :  { %4580 = vmatpush1.bf16.msra.mxu0 %v4579_v52  ;;  %v3039_v52 = vld [vmem:[%s8084_s19 + $0x8] sm:$0xff]  ;;  %4734 = vmatprep.subr.bf16.mxu1 %v7436_v33 }
 0xaa8   :  { %4582 = vmatprep.subr.bf16.mxu0 %v4581_v13  ;;  %v3056_v13 = vld [vmem:[%s8084_s19 + $0x90] sm:$0xff]  ;;  %v7447_v25 = vpack.c.bf16 %v3039_v52, %v3038_v60  ;;  %v2706_v60 = vld [vmem:[%s8082_s8 + $0x318] sm:$0xff]  ;;  %v2703_v52 = vld [vmem:[%s8082_s8 + $0x300] sm:$0xff] }
 0xaa9   :  { %v7449_v29 = vpack.c.bf16 %v3057_v17, %v3056_v13  ;;  %v2705_v13 = vld [vmem:[%s8082_s8 + $0x310] sm:$0xff]  ;;  %v2708_v17 = vld [vmem:[%s8082_s8 + $0x328] sm:$0xff] }
 0xaaa   :  { %4736 = vmatpush3.bf16.msra.mxu1 %v7447_v25 }
 0xaab   :  { %4584 = vmatpush1.bf16.msra.mxu0 %v4583_v36  ;;  %v3041_v36 = vld [vmem:[%s8084_s19 + $0x18] sm:$0xff]  ;;  %4738 = vmatprep.subr.bf16.mxu1 %v7449_v29 }
 0xaac   :  { %4586 = vmatprep.subr.bf16.mxu0 %v4585_v37  ;;  %v3058_v37 = vld [vmem:[%s8084_s19 + $0xa0] sm:$0xff] }
 0xaad   :  { %v7481_v54 = vpack.c.bf16 %v3059_v42, %v3058_v37  ;;  %v2707_v42 = vld [vmem:[%s8082_s8 + $0x320] sm:$0xff] }
 0xaaf   :  { %4588 = vmatpush1.bf16.msra.mxu0 %v4587_v46 }
 0xab0   :  { %4590 = vmatprep.subr.bf16.mxu0 %v4589_v51  ;;  %v7473_v51 = vpack.c.bf16 %v3041_v36, %v3040_v21  ;;  %v2710_v21 = vld [vmem:[%s8082_s8 + $0x338] sm:$0xff]  ;;  %v4639_v36 = vpack.c.bf16 %v2705_v13, %v2703_v52  ;;  %v2737_v52 = vld [vmem:[%s8082_s8 + $0x410] sm:$0xff]  ;;  %v2740_v13 = vld [vmem:[%s8082_s8 + $0x428] sm:$0xff] }
 0xab1   :  { %v4641_v37 = vpack.c.bf16 %v2710_v21, %v2708_v17  ;;  %v2742_v17 = vld [vmem:[%s8082_s8 + $0x438] sm:$0xff] }
 0xab2   :  { %4740 = vmatpush3.bf16.msra.mxu1 %v7473_v51 }
 0xab3   :  { %4592 = vmatpush1.bf16.msra.mxu0 %v4591_v56  ;;  %v3042_v56 = vld [vmem:[%s8084_s19 + $0x20] sm:$0xff]  ;;  %4742 = vmatprep.subr.bf16.mxu1 %v7481_v54 }
 0xab4   :  { %4594 = vmatprep.subr.bf16.mxu0 %v4593_v7  ;;  %v3043_v7 = vld [vmem:[%s8084_s19 + $0x28] sm:$0xff] }
 0xab5   :  { %v7505_v41 = vpack.c.bf16 %v3043_v7, %v3042_v56  ;;  %v2711_v56 = vld [vmem:[%s8082_s8 + $0x340] sm:$0xff]  ;;  %v2713_v7 = vld [vmem:[%s8082_s8 + $0x350] sm:$0xff] }
 0xab6   :  { %v4647_v23 = vpack.c.bf16 %v2713_v7, %v2711_v56  ;;  %v2745_v56 = vld [vmem:[%s8082_s8 + $0x450] sm:$0xff]  ;;  %v2748_v7 = vld [vmem:[%s8082_s8 + $0x468] sm:$0xff] }
 0xab7   :  { %4596 = vmatpush1.bf16.msra.mxu0 %v4595_v12  ;;  %v2687_v12 = vld [vmem:[%s8082_s8 + $0x280] sm:$0xff]  ;;  %4744 = vmatpush3.bf16.msra.mxu1 %v7505_v41 }
 0xab8   :  { %4598 = vmatprep.subr.bf16.mxu0 %v4597_v34  ;;  %v2689_v34 = vld [vmem:[%s8082_s8 + $0x290] sm:$0xff]  ;;  %4746 = vmatprep.subr.bf16.mxu1 %v7511_v59 }
 0xab9   :  { %v4623_v1 = vpack.c.bf16 %v2689_v34, %v2687_v12  ;;  %v2715_v12 = vld [vmem:[%s8082_s8 + $0x360] sm:$0xff]  ;;  %v2717_v34 = vld [vmem:[%s8082_s8 + $0x370] sm:$0xff] }
 0xabb   :  { %4600 = vmatpush1.bf16.msra.mxu0 %v4599_v62  ;;  %v3044_v62 = vld [vmem:[%s8084_s19 + $0x30] sm:$0xff] }
 0xabc   :  { %4602 = vmatprep.subr.bf16.mxu0 %v4601_v11  ;;  %v3045_v11 = vld [vmem:[%s8084_s19 + $0x38] sm:$0xff] }
 0xabf   :  { %4604 = vmatpush1.bf16.msra.mxu0 %v4603_v15  ;;  %v3063_v15 = vld [vmem:[%s8084_s19 + $0xc8] sm:$0xff] }
 0xac0   :  { %4606 = vmatprep.subr.bf16.mxu0 %v4605_v4  ;;  %v7532_v4 = vpack.c.bf16 %v3045_v11, %v3044_v62  ;;  %v7538_v8 = vpack.c.bf16 %v3063_v15, %v3062_v63  ;;  %v4651_v62 = vpack.c.bf16 %v2717_v34, %v2715_v12  ;;  %v2721_v63 = vld [vmem:[%s8082_s8 + $0x390] sm:$0xff]  ;;  %v2724_v15 = vld [vmem:[%s8082_s8 + $0x3a8] sm:$0xff]  ;;  %v2754_v12 = vld [vmem:[%s8082_s8 + $0x498] sm:$0xff] }
 0xac2   :  { %4748 = vmatpush3.bf16.msra.mxu1 %v7532_v4 }
 0xac3   :  { %4750 = vmatprep.subr.bf16.mxu1 %v7538_v8 }
 0xb55   :  { %v2578_v10 = vpop.f32.mrb[32].mxu0 }
 0xb56   :  { %v2580_v27 = vpop.f32.mrb[33].mxu0 }
 0xb57   :  { %2863 = vmatprep.mubr.f32.mxu0 %v2580_v27  ;;  %v2698_v27 = vld [vmem:[%s8082_s8 + $0x2d8] sm:$0xff] }
 0xb58   :  { %2864 = vmatmul.mubr.f32.vlgmr.msra.gmra.mrb[38].mxu0 %v2578_v10  ;;  %v3047_v10 = vld [vmem:[%s8084_s19 + $0x48] sm:$0xff] }
 0xb59   :  { %4608 = vmatpush1.bf16.msra.mxu0 %v4607_v19  ;;  %v7425_v40 = vpop.f32.mrb[34].mxu0  ;;  %v2696_v19 = vld [vmem:[%s8082_s8 + $0x2c8] sm:$0xff]  ;;  %v7553_v39 = vpack.c.bf16 %v3047_v10, %v3046_v9  ;;  %v2725_v9 = vld [vmem:[%s8082_s8 + $0x3b0] sm:$0xff] }
 0xb5a   :  { %4610 = vmatprep.subr.bf16.mxu0 %v4609_v35  ;;  %v2586_v30 = vpop.f32.mrb[35].mxu0  ;;  %v4627_v35 = vpack.c.bf16 %v2693_v6, %v2691_v58  ;;  %v4629_v14 = vpack.c.bf16 %v2698_v27, %v2696_v19  ;;  %v4655_v58 = vpack.c.bf16 %v2721_v63, %v2719_v47  ;;  %v2723_v6 = vld [vmem:[%s8082_s8 + $0x3a0] sm:$0xff]  ;;  %v2728_v10 = vld [vmem:[%s8082_s8 + $0x3c8] sm:$0xff]  ;;  %v2730_v19 = vld [vmem:[%s8082_s8 + $0x3d8] sm:$0xff] }
 0xb5b   :  { %2934 = vmatprep.mubr.f32.mxu0 %v2586_v30  ;;  %4752 = vmatpush3.bf16.msra.mxu1 %v7553_v39  ;;  %v4637_v30 = vpack.c.bf16 %v2706_v60, %v2704_v31  ;;  %v4659_v27 = vpack.c.bf16 %v2725_v9, %v2723_v6  ;;  %v2738_v31 = vld [vmem:[%s8082_s8 + $0x418] sm:$0xff] }
 0xb5c   :  { %v2758_v47 = vld [vmem:[%s8082_s8 + $0x4b8] sm:$0xff] }
 0xb5d   :  { %4612 = vmatpush1.bf16.msra.mxu0 %v4611_v26  ;;  %v7470_v46 = vpop.f32.mrb[36].mxu0  ;;  %v4631_v26 = vpack.c.bf16 %v2697_v20, %v2695_v16  ;;  %v2729_v16 = vld [vmem:[%s8082_s8 + $0x3d0] sm:$0xff]  ;;  %v2732_v20 = vld [vmem:[%s8082_s8 + $0x3e8] sm:$0xff]  ;;  %v2762_v6 = vld [vmem:[%s8082_s8 + $0x4d8] sm:$0xff] }
 0xb5e   :  { %4614 = vmatprep.subr.bf16.mxu0 %v4613_v61  ;;  %v7478_v53 = vpop.f32.mrb[37].mxu0  ;;  %v4635_v61 = vpack.c.bf16 %v2701_v18, %v2699_v32  ;;  %v2733_v32 = vld [vmem:[%s8082_s8 + $0x3f0] sm:$0xff]  ;;  %v2736_v18 = vld [vmem:[%s8082_s8 + $0x408] sm:$0xff] }
 0xb61   :  { %4616 = vmatpush1.bf16.msra.mxu0 %v4615_v43  ;;  %v2709_v43 = vld [vmem:[%s8082_s8 + $0x330] sm:$0xff] }
 0xb62   :  { %4618 = vmatprep.subr.bf16.mxu0 %v4617_v2  ;;  %v4643_v2 = vpack.c.bf16 %v2709_v43, %v2707_v42  ;;  %v2741_v42 = vld [vmem:[%s8082_s8 + $0x430] sm:$0xff]  ;;  %v2744_v43 = vld [vmem:[%s8082_s8 + $0x448] sm:$0xff] }
 0xb65   :  { %4620 = vmatpush1.bf16.msra.mxu0 %v4619_v3  ;;  %v4649_v3 = vpack.c.bf16 %v2718_v49, %v2716_v48  ;;  %v2747_v49 = vld [vmem:[%s8082_s8 + $0x460] sm:$0xff] }
 0xb66   :  { %4622 = vmatprep.subr.bf16.mxu0 %v4621_v50  ;;  %v2720_v50 = vld [vmem:[%s8082_s8 + $0x388] sm:$0xff] }
 0xb67   :  { %v4653_v11 = vpack.c.bf16 %v2722_v57, %v2720_v50  ;;  %v2751_v57 = vld [vmem:[%s8082_s8 + $0x480] sm:$0xff] }
 0xb69   :  { %4624 = vmatpush1.bf16.msra.mxu0 %v4623_v1  ;;  %v2726_v1 = vld [vmem:[%s8082_s8 + $0x3b8] sm:$0xff] }
 0xb6a   :  { %4626 = vmatprep.subr.bf16.mxu0 %v4625_v5  ;;  %v4657_v5 = vpack.c.bf16 %v2726_v1, %v2724_v15  ;;  %v2755_v1 = vld [vmem:[%s8082_s8 + $0x4a0] sm:$0xff] }
 0xb6d   :  { %4628 = vmatpush1.bf16.msra.mxu0 %v4627_v35  ;;  %v4661_v35 = vpack.c.bf16 %v2730_v19, %v2728_v10  ;;  %v2759_v19 = vld [vmem:[%s8082_s8 + $0x4c0] sm:$0xff] }
 0xb6e   :  { %4630 = vmatprep.subr.bf16.mxu0 %v4629_v14  ;;  %v2727_v14 = vld [vmem:[%s8082_s8 + $0x3c0] sm:$0xff] }
 0xb6f   :  { %v4663_v24 = vpack.c.bf16 %v2729_v16, %v2727_v14  ;;  %v2766_v14 = vld [vmem:[%s8082_s8 + $0x4f8] sm:$0xff] }
 0xb71   :  { %4632 = vmatpush1.bf16.msra.mxu0 %v4631_v26  ;;  %v4665_v26 = vpack.c.bf16 %v2734_v22, %v2732_v20  ;;  %v2763_v22 = vld [vmem:[%s8082_s8 + $0x4e0] sm:$0xff] }
 0xb72   :  { %4634 = vmatprep.subr.bf16.mxu0 %v4633_v28  ;;  %v2731_v28 = vld [vmem:[%s8082_s8 + $0x3e0] sm:$0xff] }
 0xb73   :  { %v4667_v60 = vpack.c.bf16 %v2733_v32, %v2731_v28  ;;  %v2770_v28 = vld [vmem:[%s8082_s8 + $0x518] sm:$0xff] }
 0xb75   :  { %4636 = vmatpush1.bf16.msra.mxu0 %v4635_v61  ;;  %v4669_v61 = vpack.c.bf16 %v2738_v31, %v2736_v18  ;;  %v2767_v31 = vld [vmem:[%s8082_s8 + $0x500] sm:$0xff] }
 0xb76   :  { %4638 = vmatprep.subr.bf16.mxu0 %v4637_v30  ;;  %v2735_v30 = vld [vmem:[%s8082_s8 + $0x400] sm:$0xff] }
 0xb77   :  { %v4671_v21 = vpack.c.bf16 %v2737_v52, %v2735_v30  ;;  %v2774_v30 = vld [vmem:[%s8082_s8 + $0x538] sm:$0xff] }
 0xb79   :  { %4640 = vmatpush1.bf16.msra.mxu0 %v4639_v36  ;;  %v4673_v36 = vpack.c.bf16 %v2742_v17, %v2740_v13  ;;  %v2771_v17 = vld [vmem:[%s8082_s8 + $0x520] sm:$0xff] }
 0xb7a   :  { %4642 = vmatprep.subr.bf16.mxu0 %v4641_v37  ;;  %v2739_v37 = vld [vmem:[%s8082_s8 + $0x420] sm:$0xff] }
 0xb7b   :  { %v4675_v45 = vpack.c.bf16 %v2741_v42, %v2739_v37  ;;  %v2778_v37 = vld [vmem:[%s8082_s8 + $0x558] sm:$0xff] }
 0xb7d   :  { %4644 = vmatpush1.bf16.msra.mxu0 %v4643_v2  ;;  %v4677_v2 = vpack.c.bf16 %v2746_v44, %v2744_v43  ;;  %v2775_v44 = vld [vmem:[%s8082_s8 + $0x540] sm:$0xff] }
 0xb7e   :  { %4646 = vmatprep.subr.bf16.mxu0 %v4645_v55  ;;  %v2743_v55 = vld [vmem:[%s8082_s8 + $0x440] sm:$0xff] }
 0xb81   :  { %4648 = vmatpush1.bf16.msra.mxu0 %v4647_v23  ;;  %v2749_v23 = vld [vmem:[%s8082_s8 + $0x470] sm:$0xff] }
 0xb82   :  { %4650 = vmatprep.subr.bf16.mxu0 %v4649_v3  ;;  %v2752_v3 = vld [vmem:[%s8082_s8 + $0x488] sm:$0xff]  ;;  %v4683_v34 = vpack.c.bf16 %v2749_v23, %v2747_v49  ;;  %v2786_v49 = vld [vmem:[%s8082_s8 + $0x598] sm:$0xff] }
 0xb83   :  { %v4685_v50 = vpack.c.bf16 %v2754_v12, %v2752_v3  ;;  %v2783_v12 = vld [vmem:[%s8082_s8 + $0x580] sm:$0xff] }
 0xb85   :  { %4652 = vmatpush1.bf16.msra.mxu0 %v4651_v62  ;;  %v2753_v62 = vld [vmem:[%s8082_s8 + $0x490] sm:$0xff] }
 0xb86   :  { %4654 = vmatprep.subr.bf16.mxu0 %v4653_v11  ;;  %v2756_v11 = vld [vmem:[%s8082_s8 + $0x4a8] sm:$0xff]  ;;  %v4687_v63 = vpack.c.bf16 %v2753_v62, %v2751_v57  ;;  %v2790_v57 = vld [vmem:[%s8082_s8 + $0x5b8] sm:$0xff] }
 0xb87   :  { %v4689_v15 = vpack.c.bf16 %v2758_v47, %v2756_v11  ;;  %v2787_v47 = vld [vmem:[%s8082_s8 + $0x5a0] sm:$0xff] }
 0xb89   :  { %4656 = vmatpush1.bf16.msra.mxu0 %v4655_v58  ;;  %v2757_v58 = vld [vmem:[%s8082_s8 + $0x4b0] sm:$0xff] }
 0xb8a   :  { %4658 = vmatprep.subr.bf16.mxu0 %v4657_v5  ;;  %v2760_v5 = vld [vmem:[%s8082_s8 + $0x4c8] sm:$0xff]  ;;  %v4691_v9 = vpack.c.bf16 %v2757_v58, %v2755_v1  ;;  %v2794_v1 = vld [vmem:[%s8082_s8 + $0x5d8] sm:$0xff] }
 0xb8b   :  { %v4693_v10 = vpack.c.bf16 %v2762_v6, %v2760_v5  ;;  %v2791_v6 = vld [vmem:[%s8082_s8 + $0x5c0] sm:$0xff] }
 0xb8d   :  { %4660 = vmatpush1.bf16.msra.mxu0 %v4659_v27  ;;  %v2761_v27 = vld [vmem:[%s8082_s8 + $0x4d0] sm:$0xff] }
 0xb8e   :  { %4662 = vmatprep.subr.bf16.mxu0 %v4661_v35  ;;  %v2764_v35 = vld [vmem:[%s8082_s8 + $0x4e8] sm:$0xff]  ;;  %v4695_v16 = vpack.c.bf16 %v2761_v27, %v2759_v19  ;;  %v2798_v19 = vld [vmem:[%s8082_s8 + $0x5f8] sm:$0xff] }
 0xb8f   :  { %v4697_v20 = vpack.c.bf16 %v2766_v14, %v2764_v35  ;;  %v2795_v14 = vld [vmem:[%s8082_s8 + $0x5e0] sm:$0xff] }
 0xb91   :  { %4664 = vmatpush1.bf16.msra.mxu0 %v4663_v24  ;;  %v2765_v24 = vld [vmem:[%s8082_s8 + $0x4f0] sm:$0xff] }
 0xb92   :  { %4666 = vmatprep.subr.bf16.mxu0 %v4665_v26  ;;  %v2768_v26 = vld [vmem:[%s8082_s8 + $0x508] sm:$0xff]  ;;  %v4699_v32 = vpack.c.bf16 %v2765_v24, %v2763_v22  ;;  %v3064_v22 = vld [vmem:[%s8084_s19 + $0xd0] sm:$0xff]  ;;  %v3065_v24 = vld [vmem:[%s8084_s19 + $0xd8] sm:$0xff] }
 0xb93   :  { %v4701_v18 = vpack.c.bf16 %v2770_v28, %v2768_v26  ;;  %v4753_v26 = vpack.c.bf16 %v3065_v24, %v3064_v22  ;;  %v3048_v28 = vld [vmem:[%s8084_s19 + $0x50] sm:$0xff] }
 0xb94   :  { %v3231_v22 = vld [vmem:[%s8085_s20 + $0x50] sm:$0xff] }
 0xb95   :  { %4668 = vmatpush1.bf16.msra.mxu0 %v4667_v60  ;;  %v2769_v60 = vld [vmem:[%s8082_s8 + $0x510] sm:$0xff]  ;;  %4754 = vmatprep.subr.bf16.mxu1 %v4753_v26 }
 0xb96   :  { %4670 = vmatprep.subr.bf16.mxu0 %v4669_v61  ;;  %v2772_v61 = vld [vmem:[%s8082_s8 + $0x528] sm:$0xff]  ;;  %v4703_v52 = vpack.c.bf16 %v2769_v60, %v2767_v31 }
 0xb97   :  { %v4705_v13 = vpack.c.bf16 %v2774_v30, %v2772_v61  ;;  %v3067_v31 = vld [vmem:[%s8084_s19 + $0xe8] sm:$0xff]  ;;  %v3050_v61 = vld [vmem:[%s8084_s19 + $0x60] sm:$0xff] }
 0xb98   :  { %2935 = vmatmul.mubr.f32.vlgmr.msra.gmra.mrb[38].mxu0 %v7425_v40  ;;  %v2750_v40 = vld [vmem:[%s8082_s8 + $0x478] sm:$0xff]  ;;  %v3051_v30 = vld [vmem:[%s8084_s19 + $0x68] sm:$0xff] }
 0xb99   :  { %4672 = vmatpush1.bf16.msra.mxu0 %v4671_v21  ;;  %3005 = vmatprep.mubr.f32.mxu0 %v7478_v53  ;;  %v4679_v53 = vpack.c.bf16 %v2745_v56, %v2743_v55  ;;  %v4681_v48 = vpack.c.bf16 %v2750_v40, %v2748_v7  ;;  %v2773_v21 = vld [vmem:[%s8082_s8 + $0x530] sm:$0xff]  ;;  %v2782_v55 = vld [vmem:[%s8082_s8 + $0x578] sm:$0xff]  ;;  %v2779_v40 = vld [vmem:[%s8082_s8 + $0x560] sm:$0xff] }
 0xb9a   :  { %4674 = vmatprep.subr.bf16.mxu0 %v4673_v36  ;;  %v2776_v36 = vld [vmem:[%s8082_s8 + $0x548] sm:$0xff]  ;;  %v4707_v42 = vpack.c.bf16 %v2773_v21, %v2771_v17  ;;  %v3069_v17 = vld [vmem:[%s8084_s19 + $0xf8] sm:$0xff] }
 0xb9b   :  { %v4709_v43 = vpack.c.bf16 %v2778_v37, %v2776_v36  ;;  %v3052_v36 = vld [vmem:[%s8084_s19 + $0x70] sm:$0xff]  ;;  %v3053_v37 = vld [vmem:[%s8084_s19 + $0x78] sm:$0xff] }
 0xb9d   :  { %4676 = vmatpush1.bf16.msra.mxu0 %v4675_v45  ;;  %v2777_v45 = vld [vmem:[%s8082_s8 + $0x550] sm:$0xff] }
 0xb9e   :  { %4678 = vmatprep.subr.bf16.mxu0 %v4677_v2  ;;  %v2780_v2 = vld [vmem:[%s8082_s8 + $0x568] sm:$0xff]  ;;  %v4711_v56 = vpack.c.bf16 %v2777_v45, %v2775_v44 }
 0xb9f   :  { %v4713_v7 = vpack.c.bf16 %v2782_v55, %v2780_v2 }
 0xba1   :  { %4680 = vmatpush1.bf16.msra.mxu0 %v4679_v53  ;;  %v2781_v53 = vld [vmem:[%s8082_s8 + $0x570] sm:$0xff] }
 0xba2   :  { %4682 = vmatprep.subr.bf16.mxu0 %v4681_v48  ;;  %v2784_v48 = vld [vmem:[%s8082_s8 + $0x588] sm:$0xff]  ;;  %v4715_v23 = vpack.c.bf16 %v2781_v53, %v2779_v40 }
 0xba3   :  { %v4717_v3 = vpack.c.bf16 %v2786_v49, %v2784_v48 }
 0xba5   :  { %4684 = vmatpush1.bf16.msra.mxu0 %v4683_v34  ;;  %v2785_v34 = vld [vmem:[%s8082_s8 + $0x590] sm:$0xff] }
 0xba6   :  { %4686 = vmatprep.subr.bf16.mxu0 %v4685_v50  ;;  %v2788_v50 = vld [vmem:[%s8082_s8 + $0x5a8] sm:$0xff]  ;;  %v4719_v62 = vpack.c.bf16 %v2785_v34, %v2783_v12 }
 0xba7   :  { %v4721_v11 = vpack.c.bf16 %v2790_v57, %v2788_v50 }
 0xba9   :  { %4688 = vmatpush1.bf16.msra.mxu0 %v4687_v63  ;;  %v2789_v63 = vld [vmem:[%s8082_s8 + $0x5b0] sm:$0xff] }
 0xbaa   :  { %4690 = vmatprep.subr.bf16.mxu0 %v4689_v15  ;;  %v2792_v15 = vld [vmem:[%s8082_s8 + $0x5c8] sm:$0xff]  ;;  %v4723_v58 = vpack.c.bf16 %v2789_v63, %v2787_v47 }
 0xbab   :  { %v4725_v5 = vpack.c.bf16 %v2794_v1, %v2792_v15 }
 0xbad   :  { %4692 = vmatpush1.bf16.msra.mxu0 %v4691_v9  ;;  %v2793_v9 = vld [vmem:[%s8082_s8 + $0x5d0] sm:$0xff] }
 0xbae   :  { %4694 = vmatprep.subr.bf16.mxu0 %v4693_v10  ;;  %v2796_v10 = vld [vmem:[%s8082_s8 + $0x5e8] sm:$0xff]  ;;  %v4727_v27 = vpack.c.bf16 %v2793_v9, %v2791_v6 }
 0xbaf   :  { %v4729_v35 = vpack.c.bf16 %v2798_v19, %v2796_v10  ;;  %v3225_v10 = vld [vmem:[%s8085_s20 + $0x20] sm:$0xff]  ;;  %v3227_v19 = vld [vmem:[%s8085_s20 + $0x30] sm:$0xff] }
 0xbb1   :  { %4696 = vmatpush1.bf16.msra.mxu0 %v4695_v16  ;;  %v2797_v16 = vld [vmem:[%s8082_s8 + $0x5f0] sm:$0xff] }
 0xbb2   :  { %4698 = vmatprep.subr.bf16.mxu0 %v4697_v20  ;;  %v4731_v20 = vpack.c.bf16 %v2797_v16, %v2795_v14  ;;  %v7961_v14 = vpack.c.bf16 %v3227_v19, %v3225_v10 }
 0xbb5   :  { %4700 = vmatpush1.bf16.msra.mxu0 %v4699_v32  ;;  %v3049_v32 = vld [vmem:[%s8084_s19 + $0x58] sm:$0xff] }
 0xbb6   :  { %4702 = vmatprep.subr.bf16.mxu0 %v4701_v18  ;;  %v3066_v18 = vld [vmem:[%s8084_s19 + $0xe0] sm:$0xff] }
 0xbb7   :  { %v4757_v60 = vpack.c.bf16 %v3067_v31, %v3066_v18  ;;  %v3235_v18 = vld [vmem:[%s8085_s20 + $0x70] sm:$0xff] }
 0xbb9   :  { %4704 = vmatpush1.bf16.msra.mxu0 %v4703_v52  ;;  %v4759_v52 = vpack.c.bf16 %v3051_v30, %v3050_v61  ;;  %v3240_v61 = vld [vmem:[%s8085_s20 + $0x98] sm:$0xff] }
 0xbba   :  { %4706 = vmatprep.subr.bf16.mxu0 %v4705_v13  ;;  %v3068_v13 = vld [vmem:[%s8084_s19 + $0xf0] sm:$0xff] }
 0xbbb   :  { %v4761_v21 = vpack.c.bf16 %v3069_v17, %v3068_v13  ;;  %v3239_v13 = vld [vmem:[%s8085_s20 + $0x90] sm:$0xff] }
 0xbbd   :  { %4708 = vmatpush1.bf16.msra.mxu0 %v4707_v42  ;;  %v4763_v42 = vpack.c.bf16 %v3053_v37, %v3052_v36  ;;  %v3244_v36 = vld [vmem:[%s8085_s20 + $0xb8] sm:$0xff] }
 0xbbe   :  { %4710 = vmatprep.subr.bf16.mxu0 %v4709_v43 }
 0xbc1   :  { %4712 = vmatpush1.bf16.msra.mxu0 %v4711_v56 }
 0xbc2   :  { %4714 = vmatprep.subr.bf16.mxu0 %v4713_v7 }
 0xbc5   :  { %4716 = vmatpush1.bf16.msra.mxu0 %v4715_v23 }
 0xbc6   :  { %4718 = vmatprep.subr.bf16.mxu0 %v4717_v3 }
 0xbc9   :  { %4720 = vmatpush1.bf16.msra.mxu0 %v4719_v62 }
 0xbca   :  { %4722 = vmatprep.subr.bf16.mxu0 %v4721_v11 }
 0xbcd   :  { %4724 = vmatpush1.bf16.msra.mxu0 %v4723_v58  ;;  %v3226_v58 = vld [vmem:[%s8085_s20 + $0x28] sm:$0xff] }
 0xbce   :  { %4726 = vmatprep.subr.bf16.mxu0 %v4725_v5  ;;  %v3228_v5 = vld [vmem:[%s8085_s20 + $0x38] sm:$0xff] }
 0xbcf   :  { %v7946_v9 = vpack.c.bf16 %v3228_v5, %v3226_v58 }
 0xbd1   :  { %4728 = vmatpush1.bf16.msra.mxu0 %v4727_v27  ;;  %v3230_v27 = vld [vmem:[%s8085_s20 + $0x48] sm:$0xff] }
 0xbd2   :  { %4730 = vmatprep.subr.bf16.mxu0 %v4729_v35  ;;  %v3232_v35 = vld [vmem:[%s8085_s20 + $0x58] sm:$0xff] }
 0xbd3   :  { %v7964_v16 = vpack.c.bf16 %v3232_v35, %v3230_v27 }
 0xbd5   :  { %4732 = vmatpush1.bf16.msra.mxu0 %v4731_v20  ;;  %v3229_v20 = vld [vmem:[%s8085_s20 + $0x40] sm:$0xff] }
 0xbd6   :  { %v7973_v24 = vpack.c.bf16 %v3231_v22, %v3229_v20 }
 0xbd8   :  { %3006 = vmatmul.mubr.f32.vlgmr.msra.gmra.mrb[38].mxu0 %v7470_v46  ;;  %v4755_v46 = vpack.c.bf16 %v3049_v32, %v3048_v28  ;;  %v3236_v28 = vld [vmem:[%s8085_s20 + $0x78] sm:$0xff] }
 0xbd9   :  { %3492 = vmatprep.mubr.f32.mxu0 %v4896_v0 }
 0xbda   :  { %4756 = vmatpush3.bf16.msra.mxu1 %v4755_v46 }
 0xbdb   :  { %4758 = vmatprep.subr.bf16.mxu1 %v4757_v60 }
 0xbde   :  { %4760 = vmatpush3.bf16.msra.mxu1 %v4759_v52 }
 0xbdf   :  { %4762 = vmatprep.subr.bf16.mxu1 %v4761_v21 }
 0xbe2   :  { %4764 = vmatpush3.bf16.msra.mxu1 %v4763_v42 }
 0xbe3   :  { %4766 = vmatprep.subr.bf16.mxu1 %v7436_v33 }
 0xcab   :  { %v7904_v43 = vpop.f32.mrb[38].mxu0 }
 0xcac   :  { %v3012_v44 = vrot.slane %v7904_v43, 4  ;;  %v7907_v45 = vpop.f32.mrb[39].mxu0  ;;  %v3024_v63 = vmul.f32 %v7904_v43, %v7904_v43 }
 0xcad   :  { %v3018_v2 = vrot.slane %v7907_v45, 4  ;;  %v3025_v55 = vmul.f32 %v7907_v45, %v7907_v45 }
 0xcae   :  { %v3013_v56 = vadd.f32 %v3012_v44, %v7904_v43  ;;  %v3026_v15 = vrot.slane %v3024_v63, 4  ;;  %v3243_v44 = vld [vmem:[%s8085_s20 + $0xb0] sm:$0xff] }
 0xcaf   :  { %v3019_v7 = vadd.f32 %v3018_v2, %v7907_v45  ;;  %v3032_v40 = vrot.slane %v3025_v55, 4 }
 0xcb0   :  { %v3014_v53 = vrot.slane %v3013_v56, 2  ;;  %v3027_v1 = vadd.f32 %v3026_v15, %v3024_v63 }
 0xcb1   :  { %v3020_v48 = vrot.slane %v3019_v7, 2  ;;  %v3033_v49 = vadd.f32 %v3032_v40, %v3025_v55  ;;  %v3246_v55 = vld [vmem:[%s8085_s20 + $0xc8] sm:$0xff] }
 0xcb2   :  { %v3015_v33 = vadd.f32 %v3014_v53, %v3013_v56  ;;  %v3248_v56 = vld [vmem:[%s8085_s20 + $0xd8] sm:$0xff]  ;;  %v3247_v53 = vld [vmem:[%s8085_s20 + $0xd0] sm:$0xff] }
 0xcb3   :  { %v3021_v23 = vadd.f32 %v3020_v48, %v3019_v7  ;;  %v3034_v3 = vrot.slane %v3033_v49, 2  ;;  %v3245_v7 = vld [vmem:[%s8085_s20 + $0xc0] sm:$0xff]  ;;  %v4821_v40 = vpack.c.bf16 %v3248_v56, %v3246_v55  ;;  %v3250_v48 = vld [vmem:[%s8085_s20 + $0xe8] sm:$0xff] }
 0xcb4   :  { %v3016_v12 = vrot.slane %v3015_v33, 1 }
 0xcb5   :  { %v3022_v34 = vrot.slane %v3021_v23, 1  ;;  %v3035_v50 = vadd.f32 %v3034_v3, %v3033_v49  ;;  %v3252_v49 = vld [vmem:[%s8085_s20 + $0xf8] sm:$0xff]  ;;  %v3249_v3 = vld [vmem:[%s8085_s20 + $0xe0] sm:$0xff] }
 0xcb6   :  { %v3017_v11 = vadd.f32 %v3016_v12, %v3015_v33  ;;  %v4823_v33 = vpack.c.bf16 %v3247_v53, %v3245_v7  ;;  %v3251_v12 = vld [vmem:[%s8085_s20 + $0xf0] sm:$0xff] }
 0xcb7   :  { %v3023_v57 = vadd.f32 %v3022_v34, %v3021_v23  ;;  %v3036_v62 = vrot.slane %v3035_v50, 1  ;;  %v4825_v23 = vpack.c.bf16 %v3252_v49, %v3250_v48  ;;  %v4827_v34 = vpack.c.bf16 %v3251_v12, %v3249_v3 }
 0xcb9   :  { %3134 = vmatprep.mubr.f32.mxu1 %v3023_v57  ;;  %v3037_v47 = vadd.f32 %v3036_v62, %v3035_v50 }
 0xcba   :  { %3135 = vmatmul.mubr.f32.vlgmr.msra.gmra.mrb[44].mxu1 %v3017_v11 }
 0xcbb   :  { %4768 = vmatpush3.bf16.msra.mxu1 %v7447_v25  ;;  %3204 = vmatprep.mubr.f32.mxu1 %v3037_v47  ;;  %v3028_v25 = vrot.slane %v3027_v1, 2 }
 0xcbc   :  { %4770 = vmatprep.subr.bf16.mxu1 %v7449_v29 }
 0xcbd   :  { %v3029_v29 = vadd.f32 %v3028_v25, %v3027_v1 }
 0xcbf   :  { %4772 = vmatpush3.bf16.msra.mxu1 %v7473_v51  ;;  %v3030_v51 = vrot.slane %v3029_v29, 1 }
 0xcc0   :  { %4774 = vmatprep.subr.bf16.mxu1 %v7481_v54 }
 0xcc1   :  { %v3031_v54 = vadd.f32 %v3030_v51, %v3029_v29 }
 0xcc3   :  { %4776 = vmatpush3.bf16.msra.mxu1 %v7505_v41  ;;  %v3222_v41 = vld [vmem:[%s8085_s20 + $0x8] sm:$0xff] }
 0xcc4   :  { %4778 = vmatprep.subr.bf16.mxu1 %v7511_v59  ;;  %v3224_v59 = vld [vmem:[%s8085_s20 + $0x18] sm:$0xff] }
 0xcc7   :  { %4780 = vmatpush3.bf16.msra.mxu1 %v7532_v4  ;;  %v3221_v4 = vld [vmem:[%s8085_s20] sm:$0xff] }
 0xcc8   :  { %4782 = vmatprep.subr.bf16.mxu1 %v7538_v8  ;;  %v4797_v8 = vpack.c.bf16 %v3224_v59, %v3222_v41 }
 0xccb   :  { %4784 = vmatpush3.bf16.msra.mxu1 %v7553_v39  ;;  %v3223_v39 = vld [vmem:[%s8085_s20 + $0x10] sm:$0xff] }
 0xccc   :  { %4786 = vmatprep.subr.bf16.mxu1 %v4753_v26  ;;  %v7944_v6 = vpack.c.bf16 %v3223_v39, %v3221_v4  ;;  %v3234_v26 = vld [vmem:[%s8085_s20 + $0x68] sm:$0xff] }
 0xccd   :  { %v4809_v32 = vpack.c.bf16 %v3236_v28, %v3234_v26  ;;  %v3420_v28 = vld [vmem:[%s8088_s21 + $0x8] sm:$0xff] }
 0xccf   :  { %4788 = vmatpush3.bf16.msra.mxu1 %v4755_v46  ;;  %v3233_v46 = vld [vmem:[%s8085_s20 + $0x60] sm:$0xff] }
 0xcd0   :  { %4790 = vmatprep.subr.bf16.mxu1 %v4757_v60  ;;  %v4811_v31 = vpack.c.bf16 %v3235_v18, %v3233_v46  ;;  %v3238_v60 = vld [vmem:[%s8085_s20 + $0x88] sm:$0xff] }
 0xcd1   :  { %v4813_v30 = vpack.c.bf16 %v3240_v61, %v3238_v60 }
 0xcd3   :  { %4792 = vmatpush3.bf16.msra.mxu1 %v4759_v52  ;;  %v3237_v52 = vld [vmem:[%s8085_s20 + $0x80] sm:$0xff] }
 0xcd4   :  { %4794 = vmatprep.subr.bf16.mxu1 %v4761_v21  ;;  %v4815_v17 = vpack.c.bf16 %v3239_v13, %v3237_v52  ;;  %v3242_v21 = vld [vmem:[%s8085_s20 + $0xa8] sm:$0xff] }
 0xcd5   :  { %v4817_v37 = vpack.c.bf16 %v3244_v36, %v3242_v21 }
 0xcd7   :  { %4796 = vmatpush3.bf16.msra.mxu1 %v4763_v42  ;;  %v3241_v42 = vld [vmem:[%s8085_s20 + $0xa0] sm:$0xff] }
 0xcd8   :  { %4798 = vmatprep.subr.bf16.mxu1 %v4797_v8  ;;  %v4819_v2 = vpack.c.bf16 %v3243_v44, %v3241_v42 }
 0xcda   :  { %3205 = vmatmul.mubr.f32.vlgmr.msra.gmra.mrb[46].mxu1 %v3031_v54  ;;  %v3214_v54 = vld [vmem:[%s8086_s13] sm:$0x1] }
 0xcdb   :  { %3317 = vmatprep.mubr.f32.mxu1 %v4896_v0  ;;  %4800 = vmatpush1.bf16.msra.mxu1 %v7944_v6 }
 0xcdc   :  { %4802 = vmatprep.subr.bf16.mxu1 %v7946_v9 }
 0xcdf   :  { %4804 = vmatpush1.bf16.msra.mxu1 %v7961_v14 }
 0xce0   :  { %4806 = vmatprep.subr.bf16.mxu1 %v7964_v16 }
 0xce3   :  { %4808 = vmatpush1.bf16.msra.mxu1 %v7973_v24 }
 0xce4   :  { %4810 = vmatprep.subr.bf16.mxu1 %v4809_v32 }
 0xce7   :  { %4812 = vmatpush1.bf16.msra.mxu1 %v4811_v31 }
 0xce8   :  { %4814 = vmatprep.subr.bf16.mxu1 %v4813_v30 }
 0xceb   :  { %4816 = vmatpush1.bf16.msra.mxu1 %v4815_v17 }
 0xcec   :  { %4818 = vmatprep.subr.bf16.mxu1 %v4817_v37 }
 0xcef   :  { %4820 = vmatpush1.bf16.msra.mxu1 %v4819_v2 }
 0xcf0   :  { %4822 = vmatprep.subr.bf16.mxu1 %v4821_v40 }
 0xcf3   :  { %4824 = vmatpush1.bf16.msra.mxu1 %v4823_v33 }
 0xcf4   :  { %4826 = vmatprep.subr.bf16.mxu1 %v4825_v23 }
 0xcf7   :  { %4828 = vmatpush1.bf16.msra.mxu1 %v4827_v34 }
 0xcf8   :  { %4830 = vmatprep.subr.bf16.mxu1 %v4797_v8 }
 0xd8d   :  { %v3736_v50 = vpop.f32.mrb[44].mxu1 }
 0xd8e   :  { %v3737_v57 = vpop.f32.mrb[45].mxu1 }
 0xd8f   :  { %v3738_v62 = vadd.f32 %v3737_v57, %v3736_v50 }
 0xd91   :  { %v3210_v11 = vmul.f32 0.055555556, %v3738_v62 }
 0xd93   :  { %v3212_v1 = vmul.f32 %v3210_v11, %v3210_v11 }
 0xdad   :  { %v3771_v47 = vpop.f32.mrb[46].mxu1 }
 0xdae   :  { %v3772_v63 = vpop.f32.mrb[47].mxu1 }
 0xdaf   :  { %v3773_v15 = vadd.f32 %v3772_v63, %v3771_v47 }
 0xdb1   :  { %v3211_v25 = vmul.f32 0.055555556, %v3773_v15 }
 0xdb3   :  { %v3213_v29 = vsub.f32 %v3211_v25, %v3212_v1 }
 0xdb5   :  { %v3215_v51 = vadd.f32 1e-05, %v3213_v29 }
 0xdb7   :  { %4890 = vrsqrt.f32 %v3215_v51 }
 0xdc1   :  { %v4891_v41 = vpop.eup %4890 }
 0xdc2   :  { %v3217_v59 = vmul.f32 %v4891_v41, %v3214_v54 }
 0xdc4   :  { %3318 = vmatmul.mubr.f32.vlgmr.msra.gmra.mrb[48].mxu1 %v3217_v59  ;;  %v3219_v4 = vmul.f32 %v3217_v59, %v3210_v11 }
 0xdc5   :  { %4832 = vmatpush1.bf16.msra.mxu1 %v7944_v6  ;;  %3388 = vmatprep.mubr.f32.mxu1 %v4896_v0  ;;  %v3218_v0 = vld [vmem:[%s8087_s14] sm:$0x1] }
 0xdc6   :  { %4834 = vmatprep.subr.bf16.mxu1 %v7946_v9  ;;  %v3220_v8 = vsub.f32 %v3218_v0, %v3219_v4 }
 0xdc9   :  { %4836 = vmatpush1.bf16.msra.mxu1 %v7961_v14 }
 0xdca   :  { %4838 = vmatprep.subr.bf16.mxu1 %v7964_v16 }
 0xdcd   :  { %4840 = vmatpush1.bf16.msra.mxu1 %v7973_v24 }
 0xdce   :  { %4842 = vmatprep.subr.bf16.mxu1 %v4809_v32 }
 0xdd1   :  { %4844 = vmatpush1.bf16.msra.mxu1 %v4811_v31 }
 0xdd2   :  { %4846 = vmatprep.subr.bf16.mxu1 %v4813_v30 }
 0xdd5   :  { %4848 = vmatpush1.bf16.msra.mxu1 %v4815_v17 }
 0xdd6   :  { %4850 = vmatprep.subr.bf16.mxu1 %v4817_v37 }
 0xdd9   :  { %4852 = vmatpush1.bf16.msra.mxu1 %v4819_v2 }
 0xdda   :  { %4854 = vmatprep.subr.bf16.mxu1 %v4821_v40 }
 0xddd   :  { %4856 = vmatpush1.bf16.msra.mxu1 %v4823_v33 }
 0xdde   :  { %4858 = vmatprep.subr.bf16.mxu1 %v4825_v23 }
 0xde1   :  { %4860 = vmatpush1.bf16.msra.mxu1 %v4827_v34 }
 0xde4   :  { %3389 = vmatmul.mubr.f32.vlgmr.msra.gmra.mrb[50].mxu1 %v3220_v8 }
 0xe97   :  { %v3319_v39 = vpop.f32.mrb[48].mxu1 }
 0xe98   :  { %v3398_v58 = vrot.slane %v3319_v39, %v6242_v38  ;;  %v3321_v5 = vpop.f32.mrb[49].mxu1 }
 0xe99   :  { %v3402_v6 = vrot.slane %v3321_v5, %v6242_v38 }
 0xe9a   :  { %v3403_v9 = vmul.f32 %v3398_v58, %v7904_v43  ;;  %v3419_v43 = vld [vmem:[%s8088_s21] sm:$0xff] }
 0xe9b   :  { %v3404_v10 = vmul.f32 %v3402_v6, %v7907_v45 }
 0xeb7   :  { %v3390_v19 = vpop.f32.mrb[50].mxu1 }
 0xeb8   :  { %v3408_v27 = vrot.slane %v3390_v19, %v6242_v38  ;;  %v3392_v35 = vpop.f32.mrb[51].mxu1 }
 0xeb9   :  { %v3412_v14 = vrot.slane %v3392_v35, %v6242_v38  ;;  %v3423_v38 = vld [vmem:[%s8089_s22] sm:$0x3] }
 0xeba   :  { %v3413_v16 = vadd.f32 %v3408_v27, %v3403_v9 }
 0xebb   :  { %v3414_v20 = vadd.f32 %v3412_v14, %v3404_v10 }
 0xebc   :  { %v3415_v22 = vmul.f32 0.2, %v3413_v16 }
 0xebd   :  { %v3416_v24 = vmul.f32 0.2, %v3414_v20 }
 0xebe   :  { %v3417_v26 = vmax.f32 %v3413_v16, %v3415_v22 }
 0xebf   :  { %v3418_v32 = vmax.f32 %v3414_v20, %v3416_v24 }
 0xec0   :  { %v3421_v46 = vmul.f32 %v3419_v43, %v3417_v26 }
 0xec1   :  { %v3422_v45 = vmul.f32 %v3420_v28, %v3418_v32 }
 0xec3   :  { %3428 = vmatprep.subr.mxu0 %v3422_v45 }
 0xec4   :  { %3429 = vmatpush1.msra.mxu0 %v3421_v46 }
 0xec5   :  { %3545 = vmatmul.mubr.msk.f32.vlgmr.msra.gmra.mrb[40].mxu0 %vm3424_vm4, %v3423_v38 }
 0xf98   :  { %v3494_v18 = vpop.f32.mrb[40].mxu0 }
 0xf99   :  { %v3500_v31 = vsel %vm3499_vm5, %v3494_v18, 0.0  ;;  %v3496_v60 = vpop.f32.mrb[41].mxu0 }
 0xf9a   :  { %v3501_v61 = vsel %vm3499_vm5, %v3496_v60, 0.0 }
 0xf9b   :  { %v3502_v30 = vadd.f32 %v3501_v61, %v3500_v31 }
 0xf9d   :  { %3503 = vadd.xlane.f32.xlu0 %v3502_v30 }
0x102a   :  { %v3504_v52 = vpop.xlane.xlu0 %3503 }
0x102b   :  { %v3505_v13 = vsub.f32 0.0, %v3504_v52 }
0x102d   :  { %v3506_v17 = vmul.f32 1.442695, %v3505_v13 }
0x102f   :  { %4892 = vpow2.f32 %v3506_v17 }
0x1039   :  { %v4893_v21 = vpop.eup %4892 }
0x103a   :  { %v3508_v36 = vadd.f32 1.0, %v4893_v21 }
0x103c   :  { %4894 = vrcp.f32 %v3508_v36 }
0x1046   :  { %v4895_v37 = vpop.eup %4894 }
0x1047   :  { %3512 = vst.msk [vmem:[%s8090_s23] sm:$0x3] %vm3511_vm6, %v4895_v37 }

</bundles_post_ra>
